<compile_context>
chip_gen: v6e
topology: v6e:2x2x1
jax: 0.10.0
libtpu: 0.0.40
codegen_flags: <defaults>
</compile_context>

<pallas_src>
import functools

import jax
import jax.numpy as jnp
from jax.experimental import pallas as pl
from jax.experimental.pallas import tpu as pltpu

LANES = 128
_MIB = 1024 * 1024


def _round_up(v, m):
    return ((v + m - 1) // m) * m


def _vmem_capacity_bytes():
    """Per-TensorCore VMEM capacity; conservative v7x fallback if unknown."""
    try:
        return int(pltpu.get_tpu_info().vmem_capacity_bytes)
    except Exception:
        return 64 * _MIB


def _halo_block(th):
    """Smallest divisor of `th` that is >= 4 (row count of the halo block)."""
    for d in range(4, th + 1):
        if th % d == 0:
            return d
    return th


def _vmem_estimate(th, W, cin_p, cout_p, cdt_size, out_size):
    """Conservative per-grid-step VMEM estimate in bytes.

    Counts double-buffered input/output/weight blocks, both padded scratches,
    the im2col patch and the f32 matmul result (items the old estimate missed),
    plus a fixed margin for Mosaic-internal scratch.
    """
    hb = _halo_block(th)
    inp = 2 * (th + hb) * (W + 2) * cin_p * cdt_size           # body+halo x2
    out = 2 * th * W * cout_p * out_size                       # output blocks x2
    wts = 2 * 9 * (cin_p + cout_p) * cout_p * cdt_size         # w1+w2 blocks x2
    wts += 2 * 4 * cout_p * 4                                  # scale/bias x2
    scr = (th + 4) * (W + 2) * cin_p * cdt_size                # stitched window
    scr += (th + 2) * (W + 2) * cout_p * cdt_size              # padded intermediate
    tmp1 = (th + 2) * W * 9 * cin_p * cdt_size + (th + 2) * W * cout_p * 4
    tmp2 = th * W * 9 * cout_p * cdt_size + th * W * cout_p * 4
    return inp + out + wts + scr + max(tmp1, tmp2) + 2 * _MIB


def _choose_row_tile(H, W, N, cin_p, cout_p, cdt_size, out_size, budget,
                     min_steps=8):
    """Largest H-row tile that fits the VMEM budget while keeping enough grid
    steps for pipelining / megacore sharding and a reasonable matmul M."""
    cands = [d for d in range(H, 3, -1) if H % d == 0]   # divisors of H, >= 4
    assert cands, "double_conv Pallas kernel requires H >= 4"
    fitting = [d for d in cands
               if _vmem_estimate(d, W, cin_p, cout_p, cdt_size, out_size)
               <= budget]
    if not fitting:
        fitting = [cands[-1]]
    for d in fitting:
        if N * (H // d) >= min_steps and d * W >= 256:
            return d
    for d in fitting:
        if N * (H // d) >= 4:
            return d
    return fitting[0]


def _conv3x3_bn_relu(src_ref, w_ref, s_ref, b_ref, out_rows, out_cols):
    """3x3 valid conv over a zero-ring padded (out_rows+2, out_cols+2, C) VMEM
    window, fused with folded BatchNorm and ReLU.

    Built as ONE im2col patch (K = 9*C, taps in row-major (dy, dx) order) and
    ONE MXU matmul (bf16 operands, f32 accumulation).
    Returns (out_rows*out_cols, Cout) f32 post-ReLU activation.
    """
    c = src_ref.shape[-1]
    taps = [src_ref[dy:dy + out_rows, dx:dx + out_cols, :]
            for dy in range(3) for dx in range(3)]
    patch = jnp.concatenate(taps, axis=-1).reshape(out_rows * out_cols, 9 * c)
    acc = jnp.dot(patch, w_ref[...], preferred_element_type=jnp.float32)
    return jnp.maximum(acc * s_ref[...] + b_ref[...], 0.0)


def _double_conv_kernel(xb_ref, xh_ref, w1_ref, s1_ref, b1_ref,
                        w2_ref, s2_ref, b2_ref, o_ref, xwin_ref, ypad_ref):
    """Fused (conv3x3 + BN + ReLU) x 2 for one (image, row-tile) grid step.

    xb_ref   : (TH, W+2, Cin_p)    bf16 body rows of the pre-padded input
    xh_ref   : (HB, W+2, Cin_p)    bf16 halo rows just below the body block
    w*_ref   : (9*C, Cout_p)       bf16 packed weights
    s*/b*    : (1, Cout_p)         f32 folded BN scale / bias (incl. conv bias)
    o_ref    : (TH, W, Cout_p)     output block (compute dtype)
    xwin_ref : (TH+4, W+2, Cin_p)  stitched input window (scratch)
    ypad_ref : (TH+2, W+2, Cout_p) zero-ring padded intermediate (scratch)
    """
    TH, W, cout_p = o_ref.shape
    h = pl.program_id(1)
    last_h = pl.num_programs(1) - 1

    # Stitch the overlapping (TH+4)-row window; the zero halo ring comes from
    # the HBM-side spatial pre-padding, so no scratch zeroing is needed here.
    xwin_ref[0:TH, :, :] = xb_ref[...]
    xwin_ref[TH:TH + 4, :, :] = xh_ref[0:4, :, :]

    # Stage 1: conv1 + BN1 + ReLU over TH+2 rows (the +/-1 halo rows stage 2
    # needs are recomputed locally -- no cross-tile communication).
    y1 = _conv3x3_bn_relu(xwin_ref, w1_ref, s1_ref, b1_ref, TH + 2, W)

    # Intermediate stays in VMEM (bf16).  Only the 1-wide zero columns (every
    # step) and the image-boundary rows (first/last row tile) are zeroed; the
    # interior is completely overwritten each step.
    ypad_ref[:, 1:W + 1, :] = y1.reshape(TH + 2, W, cout_p).astype(ypad_ref.dtype)
    zero_col = jnp.zeros((TH + 2, 1, cout_p), ypad_ref.dtype)
    ypad_ref[:, 0:1, :] = zero_col
    ypad_ref[:, W + 1:W + 2, :] = zero_col

    @pl.when(h == 0)
    def _():  # intermediate row -1 of the image is conv zero-padding
        ypad_ref[0:1, :, :] = jnp.zeros((1, W + 2, cout_p), ypad_ref.dtype)

    @pl.when(h == last_h)
    def _():  # intermediate row H of the image is conv zero-padding
        ypad_ref[TH + 1:TH + 2, :, :] = jnp.zeros((1, W + 2, cout_p),
                                                  ypad_ref.dtype)

    # Stage 2: conv2 + BN2 + ReLU -> lane-dense bf16 output block.
    y2 = _conv3x3_bn_relu(ypad_ref, w2_ref, s2_ref, b2_ref, TH, W)
    o_ref[...] = y2.reshape(TH, W, cout_p).astype(o_ref.dtype)


def fused_double_conv(x_nhwc, w1_hwio, s1, b1, w2_hwio, s2, b2,
                      compute_dtype=jnp.bfloat16, out_dtype=None):
    """Channel-pads to the 128-lane width, packs weights for K=9*C matmuls,
    picks a VMEM-sized H-row tile and launches the fused kernel."""
    if out_dtype is None:
        out_dtype = compute_dtype
    N, H, W, Cin = x_nhwc.shape
    Cout = w1_hwio.shape[-1]
    Cin_p = _round_up(Cin, LANES)
    Cout_p = _round_up(Cout, LANES)
    cdt_size = jnp.dtype(compute_dtype).itemsize
    out_size = jnp.dtype(out_dtype).itemsize

    # Generation-aware budget: ~48 MiB scoped limit on v7x (64 MiB VMEM),
    # ~96 MiB on v5e/v6e (128 MiB).  Tiles target 75% of the scoped limit.
    vmem_limit = min(3 * _vmem_capacity_bytes() // 4, 110 * _MIB)
    tile_budget = 3 * vmem_limit // 4

    TH = _choose_row_tile(H, W, N, Cin_p, Cout_p, cdt_size, out_size,
                          tile_budget)
    nH = H // TH
    HB = _halo_block(TH)
    est = _vmem_estimate(TH, W, Cin_p, Cout_p, cdt_size, out_size)
    if est > vmem_limit:
        # TODO(synk): add W-column tiling (second halo axis) for images whose
        # single-row-tile working set still exceeds the scoped VMEM limit.
        raise ValueError(
            f"per-step working set {est} B exceeds VMEM limit {vmem_limit} B")

    # Spatial pre-pad in HBM: 2 zero rows on top, TH-2 (>=2) zero rows on the
    # bottom (so the padded row count H+TH divides into body/halo blocks) and
    # 1 zero column on each side.  Channel-pad to the 128-lane width.
    # TODO(synk): for tiny channel counts (e.g. a UNet 3->64 stem) fold a 2x2
    # space-to-depth into channels instead of zero-padding straight to 128.
    xp = jnp.pad(x_nhwc, ((0, 0), (2, TH - 2), (1, 1), (0, Cin_p - Cin)))
    xp = xp.astype(compute_dtype)

    def pack_w(w_hwio, cin, cin_p):
        # (3, 3, cin, Cout) -> (9*cin_p, Cout_p); K index = (dy*3+dx)*cin_p+ci,
        # matching the kernel's row-major (dy, dx) tap concatenation order.
        w = jnp.pad(w_hwio, ((0, 0), (0, 0), (0, cin_p - cin),
                             (0, Cout_p - Cout)))
        return w.reshape(9 * cin_p, Cout_p).astype(compute_dtype)

    def pack_sb(s, b):
        s = jnp.pad(s, (0, Cout_p - Cout), constant_values=1.0)
        b = jnp.pad(b, (0, Cout_p - Cout))
        return (s.reshape(1, Cout_p).astype(jnp.float32),
                b.reshape(1, Cout_p).astype(jnp.float32))

    w1p = pack_w(w1_hwio, Cin, Cin_p)
    w2p = pack_w(w2_hwio, Cout, Cout_p)
    s1p, b1p = pack_sb(s1, b1)
    s2p, b2p = pack_sb(s2, b2)

    halo_stride = TH // HB  # (h+1)*TH is always a multiple of HB

    cost = pl.CostEstimate(
        flops=2 * 9 * N * H * W * (Cin_p * Cout_p + Cout_p * Cout_p),
        transcendentals=0,
        bytes_accessed=int(xp.size * cdt_size
                           + N * H * W * Cout_p * out_size
                           + (w1p.size + w2p.size) * cdt_size
                           + 4 * Cout_p * 4))

    # NOTE: the constant-index weight/scale/bias blocks are double-buffered by
    # the pipeline; that duplication is included in _vmem_estimate.
    out = pl.pallas_call(
        _double_conv_kernel,
        out_shape=jax.ShapeDtypeStruct((N, H, W, Cout_p), out_dtype),
        grid_spec=pltpu.PrefetchScalarGridSpec(
            num_scalar_prefetch=0,
            grid=(N, nH),
            in_specs=[
                # TH-row body block of the pre-padded input.
                pl.BlockSpec((None, TH, W + 2, Cin_p),
                             lambda n, h: (n, h, 0, 0)),
                # HB (>=4) halo rows immediately below the body block.
                pl.BlockSpec((None, HB, W + 2, Cin_p),
                             lambda n, h: (n, (h + 1) * halo_stride, 0, 0)),
                pl.BlockSpec((9 * Cin_p, Cout_p), lambda n, h: (0, 0)),
                pl.BlockSpec((1, Cout_p), lambda n, h: (0, 0)),
                pl.BlockSpec((1, Cout_p), lambda n, h: (0, 0)),
                pl.BlockSpec((9 * Cout_p, Cout_p), lambda n, h: (0, 0)),
                pl.BlockSpec((1, Cout_p), lambda n, h: (0, 0)),
                pl.BlockSpec((1, Cout_p), lambda n, h: (0, 0)),
            ],
            out_specs=pl.BlockSpec((None, TH, W, Cout_p),
                                   lambda n, h: (n, h, 0, 0)),
            scratch_shapes=[
                pltpu.VMEM((TH + 4, W + 2, Cin_p), compute_dtype),
                pltpu.VMEM((TH + 2, W + 2, Cout_p), compute_dtype),
            ]),
        compiler_params=pltpu.CompilerParams(
            dimension_semantics=("parallel", "parallel"),
            vmem_limit_bytes=vmem_limit),
        cost_estimate=cost,
    )(xp, xp, w1p, s1p, b1p, w2p, s2p, b2p)

    return out[..., :Cout]


def _fold_bn(conv_b, gamma, beta, running_mean, running_var, eps=1e-5):
    """Fold conv bias + inference BatchNorm into a per-channel scale/bias."""
    scale = gamma / jnp.sqrt(running_var + eps)
    bias = (conv_b - running_mean) * scale + beta
    return scale, bias


def init_double_conv_params(key, in_ch, out_ch):
    """Deterministic synthetic parameters mirroring the PyTorch module shapes."""
    ks = jax.random.split(key, 6)
    # Conv weights in PyTorch OIHW layout, converted to HWIO for the kernel.
    w1_oihw = 0.1 * jax.random.normal(ks[0], (out_ch, in_ch, 3, 3), jnp.float32)
    b1 = 0.1 * jax.random.normal(ks[1], (out_ch,), jnp.float32)
    w2_oihw = 0.1 * jax.random.normal(ks[2], (out_ch, out_ch, 3, 3), jnp.float32)
    b2 = 0.1 * jax.random.normal(ks[3], (out_ch,), jnp.float32)
    # BatchNorm parameters (running stats at their PyTorch init values).
    g1 = 1.0 + 0.1 * jax.random.normal(ks[4], (out_ch,), jnp.float32)
    be1 = 0.05 * jnp.ones((out_ch,), jnp.float32)
    g2 = 1.0 + 0.1 * jax.random.normal(ks[5], (out_ch,), jnp.float32)
    be2 = -0.05 * jnp.ones((out_ch,), jnp.float32)
    rm = jnp.zeros((out_ch,), jnp.float32)
    rv = jnp.ones((out_ch,), jnp.float32)
    return {
        "w1": jnp.transpose(w1_oihw, (2, 3, 1, 0)),  # HWIO
        "b1": b1, "g1": g1, "be1": be1, "rm1": rm, "rv1": rv,
        "w2": jnp.transpose(w2_oihw, (2, 3, 1, 0)),  # HWIO
        "b2": b2, "g2": g2, "be2": be2, "rm2": rm, "rv2": rv,
    }


@functools.partial(jax.jit, static_argnames=("compute_dtype", "out_dtype"))
def double_conv_forward(x_nchw, params, compute_dtype=jnp.bfloat16,
                        out_dtype=None):
    # NCHW -> NHWC for the TPU kernel.
    x = jnp.transpose(x_nchw, (0, 2, 3, 1))
    s1, bb1 = _fold_bn(params["b1"], params["g1"], params["be1"],
                       params["rm1"], params["rv1"])
    s2, bb2 = _fold_bn(params["b2"], params["g2"], params["be2"],
                       params["rm2"], params["rv2"])
    y = fused_double_conv(x, params["w1"], s1, bb1, params["w2"], s2, bb2,
                          compute_dtype=compute_dtype, out_dtype=out_dtype)
    # NHWC -> NCHW to match the PyTorch output convention.
    return jnp.transpose(y, (0, 3, 1, 2))


def _reference_forward(x_nchw, params, compute_dtype=jnp.bfloat16):
    """Plain-JAX reference mirroring the kernel's mixed precision
    (bf16 operands / intermediate, f32 accumulation)."""
    def step(x, w_hwio, b, g, be, rm, rv):
        y = jax.lax.conv_general_dilated(
            x.astype(compute_dtype), w_hwio.astype(compute_dtype),
            window_strides=(1, 1), padding="SAME",
            dimension_numbers=("NCHW", "HWIO", "NCHW"),
            preferred_element_type=jnp.float32)
        s, bb = _fold_bn(b, g, be, rm, rv)
        y = y * s[None, :, None, None] + bb[None, :, None, None]
        return jnp.maximum(y, 0.0)
    y = step(x_nchw, params["w1"], params["b1"], params["g1"], params["be1"],
             params["rm1"], params["rv1"])
    y = step(y, params["w2"], params["b2"], params["g2"], params["be2"],
             params["rm2"], params["rv2"])
    return y


if __name__ == "__main__":
    key = jax.random.PRNGKey(0)
    kx, kp = jax.random.split(key)

    N, C_in, H, W = 2, 4, 16, 16
    C_out = 8
    x = jax.random.normal(kx, (N, C_in, H, W), jnp.float32)
    params = init_double_conv_params(kp, C_in, C_out)

    out = double_conv_forward(x, params)
    out = jax.block_until_ready(out)
    assert out.shape == (N, C_out, H, W)

    ref = _reference_forward(x, params)
    # The kernel writes bf16 back to HBM; compare against the bf16-quantized
    # reference in f32.
    out_f = out.astype(jnp.float32)
    ref_q = ref.astype(jnp.bfloat16).astype(jnp.float32)
    max_err = float(jnp.max(jnp.abs(out_f - ref_q)))
    assert jnp.allclose(out_f, ref_q, atol=5e-2, rtol=5e-2), max_err

    print("KERNEL_OK")
</pallas_src>

<mosaic_0001>
module attributes {stable_mosaic.version = 11 : i64} {
  func.func @_double_conv_kernel(%arg0: i32, %arg1: i32, %arg2: memref<1x8x18x128xbf16, #tpu.memory_space<vmem>>, %arg3: memref<1x4x18x128xbf16, #tpu.memory_space<vmem>>, %arg4: memref<1152x128xbf16, #tpu.memory_space<vmem>>, %arg5: memref<1x128xf32, #tpu.memory_space<vmem>>, %arg6: memref<1x128xf32, #tpu.memory_space<vmem>>, %arg7: memref<1152x128xbf16, #tpu.memory_space<vmem>>, %arg8: memref<1x128xf32, #tpu.memory_space<vmem>>, %arg9: memref<1x128xf32, #tpu.memory_space<vmem>>, %arg10: memref<1x8x16x128xbf16, #tpu.memory_space<vmem>>, %arg11: memref<12x18x128xbf16, #tpu.memory_space<vmem>>, %arg12: memref<10x18x128xbf16, #tpu.memory_space<vmem>>) attributes {dimension_semantics = [#tpu.dimension_semantics<parallel>, #tpu.dimension_semantics<parallel>], iteration_bounds = array<i64: 2, 2>, scalar_prefetch = 0 : i64, scratch_operands = 2 : i64, tpu.core_type = #tpu.core_type<tc>, window_params = [{transform_indices = @transform_0, window_bounds = array<i64: 1, 8, 18, 128>}, {transform_indices = @transform_1, window_bounds = array<i64: 1, 4, 18, 128>}, {pipeline_mode = #tpu.pipeline_mode<synchronous>, transform_indices = @transform_2, window_bounds = array<i64: 1152, 128>}, {pipeline_mode = #tpu.pipeline_mode<synchronous>, transform_indices = @transform_3, window_bounds = array<i64: 1, 128>}, {pipeline_mode = #tpu.pipeline_mode<synchronous>, transform_indices = @transform_4, window_bounds = array<i64: 1, 128>}, {pipeline_mode = #tpu.pipeline_mode<synchronous>, transform_indices = @transform_5, window_bounds = array<i64: 1152, 128>}, {pipeline_mode = #tpu.pipeline_mode<synchronous>, transform_indices = @transform_6, window_bounds = array<i64: 1, 128>}, {pipeline_mode = #tpu.pipeline_mode<synchronous>, transform_indices = @transform_7, window_bounds = array<i64: 1, 128>}, {transform_indices = @transform_8, window_bounds = array<i64: 1, 8, 16, 128>}]} {
    %c0 = arith.constant 0 : index
    %c0_0 = arith.constant 0 : index
    %c0_1 = arith.constant 0 : index
    %c0_2 = arith.constant 0 : index
    %0 = vector.load %arg2[%c0, %c0_0, %c0_1, %c0_2] : memref<1x8x18x128xbf16, #tpu.memory_space<vmem>>, vector<1x8x18x128xbf16>
    %1 = vector.shape_cast %0 : vector<1x8x18x128xbf16> to vector<8x18x128xbf16>
    %c0_3 = arith.constant 0 : index
    %c0_4 = arith.constant 0 : index
    %c0_5 = arith.constant 0 : index
    %2 = vector.load %arg11[%c0_3, %c0_4, %c0_5] : memref<12x18x128xbf16, #tpu.memory_space<vmem>>, vector<8x18x128xbf16>
    tpu.vector_store %arg11[%c0_3, %c0_4, %c0_5], %1 {strides = array<i32>} : memref<12x18x128xbf16, #tpu.memory_space<vmem>>, vector<8x18x128xbf16>,
    %c0_6 = arith.constant 0 : index
    %c0_7 = arith.constant 0 : index
    %c0_8 = arith.constant 0 : index
    %c0_9 = arith.constant 0 : index
    %3 = vector.load %arg3[%c0_6, %c0_7, %c0_8, %c0_9] : memref<1x4x18x128xbf16, #tpu.memory_space<vmem>>, vector<1x4x18x128xbf16>
    %4 = vector.shape_cast %3 : vector<1x4x18x128xbf16> to vector<4x18x128xbf16>
    %c8 = arith.constant 8 : index
    %c0_10 = arith.constant 0 : index
    %c0_11 = arith.constant 0 : index
    %5 = vector.load %arg11[%c8, %c0_10, %c0_11] : memref<12x18x128xbf16, #tpu.memory_space<vmem>>, vector<4x18x128xbf16>
    tpu.vector_store %arg11[%c8, %c0_10, %c0_11], %4 {strides = array<i32>} : memref<12x18x128xbf16, #tpu.memory_space<vmem>>, vector<4x18x128xbf16>,
    %c0_12 = arith.constant 0 : index
    %c0_13 = arith.constant 0 : index
    %c0_14 = arith.constant 0 : index
    %6 = vector.load %arg11[%c0_12, %c0_13, %c0_14] : memref<12x18x128xbf16, #tpu.memory_space<vmem>>, vector<10x16x128xbf16>
    %c0_15 = arith.constant 0 : index
    %c1 = arith.constant 1 : index
    %c0_16 = arith.constant 0 : index
    %7 = vector.load %arg11[%c0_15, %c1, %c0_16] : memref<12x18x128xbf16, #tpu.memory_space<vmem>>, vector<10x16x128xbf16>
    %c0_17 = arith.constant 0 : index
    %c2 = arith.constant 2 : index
    %c0_18 = arith.constant 0 : index
    %8 = vector.load %arg11[%c0_17, %c2, %c0_18] : memref<12x18x128xbf16, #tpu.memory_space<vmem>>, vector<10x16x128xbf16>
    %c1_19 = arith.constant 1 : index
    %c0_20 = arith.constant 0 : index
    %c0_21 = arith.constant 0 : index
    %9 = vector.load %arg11[%c1_19, %c0_20, %c0_21] : memref<12x18x128xbf16, #tpu.memory_space<vmem>>, vector<10x16x128xbf16>
    %c1_22 = arith.constant 1 : index
    %c1_23 = arith.constant 1 : index
    %c0_24 = arith.constant 0 : index
    %10 = vector.load %arg11[%c1_22, %c1_23, %c0_24] : memref<12x18x128xbf16, #tpu.memory_space<vmem>>, vector<10x16x128xbf16>
    %c1_25 = arith.constant 1 : index
    %c2_26 = arith.constant 2 : index
    %c0_27 = arith.constant 0 : index
    %11 = vector.load %arg11[%c1_25, %c2_26, %c0_27] : memref<12x18x128xbf16, #tpu.memory_space<vmem>>, vector<10x16x128xbf16>
    %c2_28 = arith.constant 2 : index
    %c0_29 = arith.constant 0 : index
    %c0_30 = arith.constant 0 : index
    %12 = vector.load %arg11[%c2_28, %c0_29, %c0_30] : memref<12x18x128xbf16, #tpu.memory_space<vmem>>, vector<10x16x128xbf16>
    %c2_31 = arith.constant 2 : index
    %c1_32 = arith.constant 1 : index
    %c0_33 = arith.constant 0 : index
    %13 = vector.load %arg11[%c2_31, %c1_32, %c0_33] : memref<12x18x128xbf16, #tpu.memory_space<vmem>>, vector<10x16x128xbf16>
    %c2_34 = arith.constant 2 : index
    %c2_35 = arith.constant 2 : index
    %c0_36 = arith.constant 0 : index
    %14 = vector.load %arg11[%c2_34, %c2_35, %c0_36] : memref<12x18x128xbf16, #tpu.memory_space<vmem>>, vector<10x16x128xbf16>
    %15 = tpu.concatenate %6, %7, %8, %9, %10, %11, %12, %13, %14 in 2 : vector<10x16x128xbf16>, vector<10x16x128xbf16>, vector<10x16x128xbf16>, vector<10x16x128xbf16>, vector<10x16x128xbf16>, vector<10x16x128xbf16>, vector<10x16x128xbf16>, vector<10x16x128xbf16>, vector<10x16x128xbf16> -> vector<10x16x1152xbf16>
    %16 = vector.shape_cast %15 : vector<10x16x1152xbf16> to vector<160x1152xbf16>
    %c0_37 = arith.constant 0 : index
    %c0_38 = arith.constant 0 : index
    %17 = vector.load %arg4[%c0_37, %c0_38] : memref<1152x128xbf16, #tpu.memory_space<vmem>>, vector<1152x128xbf16>
    %cst = arith.constant dense<0.000000e+00> : vector<160x128xf32>
    %18 = tpu.matmul %16, %17, %cst {dimension_numbers = #tpu.dot_dimension_numbers<[1], [0], [0], [1], [0, 0, 1, 1], [], []>} : vector<160x1152xbf16>, vector<1152x128xbf16>, vector<160x128xf32> -> vector<160x128xf32>
    %c0_39 = arith.constant 0 : index
    %c0_40 = arith.constant 0 : index
    %19 = vector.load %arg5[%c0_39, %c0_40] : memref<1x128xf32, #tpu.memory_space<vmem>>, vector<1x128xf32>
    %20 = vector.broadcast %19 : vector<1x128xf32> to vector<160x128xf32>
    %21 = arith.mulf %18, %20 : vector<160x128xf32>
    %c0_41 = arith.constant 0 : index
    %c0_42 = arith.constant 0 : index
    %22 = vector.load %arg6[%c0_41, %c0_42] : memref<1x128xf32, #tpu.memory_space<vmem>>, vector<1x128xf32>
    %23 = vector.broadcast %22 : vector<1x128xf32> to vector<160x128xf32>
    %24 = arith.addf %21, %23 : vector<160x128xf32>
    %cst_43 = arith.constant 0.000000e+00 : f32
    %25 = vector.broadcast %cst_43 : f32 to vector<160x128xf32>
    %26 = arith.maximumf %24, %25 : vector<160x128xf32>
    %27 = vector.shape_cast %26 : vector<160x128xf32> to vector<10x16x128xf32>
    %28 = arith.truncf %27 : vector<10x16x128xf32> to vector<10x16x128xbf16>
    %c0_44 = arith.constant 0 : index
    %c1_45 = arith.constant 1 : index
    %c0_46 = arith.constant 0 : index
    %29 = vector.load %arg12[%c0_44, %c1_45, %c0_46] : memref<10x18x128xbf16, #tpu.memory_space<vmem>>, vector<10x16x128xbf16>
    tpu.vector_store %arg12[%c0_44, %c1_45, %c0_46], %28 {strides = array<i32>} : memref<10x18x128xbf16, #tpu.memory_space<vmem>>, vector<10x16x128xbf16>,
    %cst_47 = arith.constant 0.000000e+00 : bf16
    %30 = vector.broadcast %cst_47 : bf16 to vector<10x1x128xbf16>
    %c0_48 = arith.constant 0 : index
    %c0_49 = arith.constant 0 : index
    %c0_50 = arith.constant 0 : index
    %31 = vector.load %arg12[%c0_48, %c0_49, %c0_50] : memref<10x18x128xbf16, #tpu.memory_space<vmem>>, vector<10x1x128xbf16>
    tpu.vector_store %arg12[%c0_48, %c0_49, %c0_50], %30 {strides = array<i32>} : memref<10x18x128xbf16, #tpu.memory_space<vmem>>, vector<10x1x128xbf16>,
    %c0_51 = arith.constant 0 : index
    %c17 = arith.constant 17 : index
    %c0_52 = arith.constant 0 : index
    %32 = vector.load %arg12[%c0_51, %c17, %c0_52] : memref<10x18x128xbf16, #tpu.memory_space<vmem>>, vector<10x1x128xbf16>
    tpu.vector_store %arg12[%c0_51, %c17, %c0_52], %30 {strides = array<i32>} : memref<10x18x128xbf16, #tpu.memory_space<vmem>>, vector<10x1x128xbf16>,
    %c0_i32 = arith.constant 0 : i32
    %33 = arith.cmpi eq, %arg1, %c0_i32 : i32
    %34 = arith.extui %33 : i1 to i32
    %c0_i32_53 = arith.constant 0 : i32
    %35 = arith.cmpi ne, %34, %c0_i32_53 : i32
    scf.if %35 {
      %cst_94 = arith.constant 0.000000e+00 : bf16
      %65 = vector.broadcast %cst_94 : bf16 to vector<1x18x128xbf16>
      %c0_95 = arith.constant 0 : index
      %c0_96 = arith.constant 0 : index
      %c0_97 = arith.constant 0 : index
      %66 = vector.load %arg12[%c0_95, %c0_96, %c0_97] : memref<10x18x128xbf16, #tpu.memory_space<vmem>>, vector<1x18x128xbf16>
      tpu.vector_store %arg12[%c0_95, %c0_96, %c0_97], %65 {strides = array<i32>} : memref<10x18x128xbf16, #tpu.memory_space<vmem>>, vector<1x18x128xbf16>,
    } else {
    }
    %c1_i32 = arith.constant 1 : i32
    %36 = arith.cmpi eq, %arg1, %c1_i32 : i32
    %37 = arith.extui %36 : i1 to i32
    %c0_i32_54 = arith.constant 0 : i32
    %38 = arith.cmpi ne, %37, %c0_i32_54 : i32
    scf.if %38 {
      %cst_94 = arith.constant 0.000000e+00 : bf16
      %65 = vector.broadcast %cst_94 : bf16 to vector<1x18x128xbf16>
      %c9 = arith.constant 9 : index
      %c0_95 = arith.constant 0 : index
      %c0_96 = arith.constant 0 : index
      %66 = vector.load %arg12[%c9, %c0_95, %c0_96] : memref<10x18x128xbf16, #tpu.memory_space<vmem>>, vector<1x18x128xbf16>
      tpu.vector_store %arg12[%c9, %c0_95, %c0_96], %65 {strides = array<i32>} : memref<10x18x128xbf16, #tpu.memory_space<vmem>>, vector<1x18x128xbf16>,
    } else {
    }
    %c0_55 = arith.constant 0 : index
    %c0_56 = arith.constant 0 : index
    %c0_57 = arith.constant 0 : index
    %39 = vector.load %arg12[%c0_55, %c0_56, %c0_57] : memref<10x18x128xbf16, #tpu.memory_space<vmem>>, vector<8x16x128xbf16>
    %c0_58 = arith.constant 0 : index
    %c1_59 = arith.constant 1 : index
    %c0_60 = arith.constant 0 : index
    %40 = vector.load %arg12[%c0_58, %c1_59, %c0_60] : memref<10x18x128xbf16, #tpu.memory_space<vmem>>, vector<8x16x128xbf16>
    %c0_61 = arith.constant 0 : index
    %c2_62 = arith.constant 2 : index
    %c0_63 = arith.constant 0 : index
    %41 = vector.load %arg12[%c0_61, %c2_62, %c0_63] : memref<10x18x128xbf16, #tpu.memory_space<vmem>>, vector<8x16x128xbf16>
    %c1_64 = arith.constant 1 : index
    %c0_65 = arith.constant 0 : index
    %c0_66 = arith.constant 0 : index
    %42 = vector.load %arg12[%c1_64, %c0_65, %c0_66] : memref<10x18x128xbf16, #tpu.memory_space<vmem>>, vector<8x16x128xbf16>
    %c1_67 = arith.constant 1 : index
    %c1_68 = arith.constant 1 : index
    %c0_69 = arith.constant 0 : index
    %43 = vector.load %arg12[%c1_67, %c1_68, %c0_69] : memref<10x18x128xbf16, #tpu.memory_space<vmem>>, vector<8x16x128xbf16>
    %c1_70 = arith.constant 1 : index
    %c2_71 = arith.constant 2 : index
    %c0_72 = arith.constant 0 : index
    %44 = vector.load %arg12[%c1_70, %c2_71, %c0_72] : memref<10x18x128xbf16, #tpu.memory_space<vmem>>, vector<8x16x128xbf16>
    %c2_73 = arith.constant 2 : index
    %c0_74 = arith.constant 0 : index
    %c0_75 = arith.constant 0 : index
    %45 = vector.load %arg12[%c2_73, %c0_74, %c0_75] : memref<10x18x128xbf16, #tpu.memory_space<vmem>>, vector<8x16x128xbf16>
    %c2_76 = arith.constant 2 : index
    %c1_77 = arith.constant 1 : index
    %c0_78 = arith.constant 0 : index
    %46 = vector.load %arg12[%c2_76, %c1_77, %c0_78] : memref<10x18x128xbf16, #tpu.memory_space<vmem>>, vector<8x16x128xbf16>
    %c2_79 = arith.constant 2 : index
    %c2_80 = arith.constant 2 : index
    %c0_81 = arith.constant 0 : index
    %47 = vector.load %arg12[%c2_79, %c2_80, %c0_81] : memref<10x18x128xbf16, #tpu.memory_space<vmem>>, vector<8x16x128xbf16>
    %48 = tpu.concatenate %39, %40, %41, %42, %43, %44, %45, %46, %47 in 2 : vector<8x16x128xbf16>, vector<8x16x128xbf16>, vector<8x16x128xbf16>, vector<8x16x128xbf16>, vector<8x16x128xbf16>, vector<8x16x128xbf16>, vector<8x16x128xbf16>, vector<8x16x128xbf16>, vector<8x16x128xbf16> -> vector<8x16x1152xbf16>
    %49 = vector.shape_cast %48 : vector<8x16x1152xbf16> to vector<128x1152xbf16>
    %c0_82 = arith.constant 0 : index
    %c0_83 = arith.constant 0 : index
    %50 = vector.load %arg7[%c0_82, %c0_83] : memref<1152x128xbf16, #tpu.memory_space<vmem>>, vector<1152x128xbf16>
    %cst_84 = arith.constant dense<0.000000e+00> : vector<128x128xf32>
    %51 = tpu.matmul %49, %50, %cst_84 {dimension_numbers = #tpu.dot_dimension_numbers<[1], [0], [0], [1], [0, 0, 1, 1], [], []>} : vector<128x1152xbf16>, vector<1152x128xbf16>, vector<128x128xf32> -> vector<128x128xf32>
    %c0_85 = arith.constant 0 : index
    %c0_86 = arith.constant 0 : index
    %52 = vector.load %arg8[%c0_85, %c0_86] : memref<1x128xf32, #tpu.memory_space<vmem>>, vector<1x128xf32>
    %53 = vector.broadcast %52 : vector<1x128xf32> to vector<128x128xf32>
    %54 = arith.mulf %51, %53 : vector<128x128xf32>
    %c0_87 = arith.constant 0 : index
    %c0_88 = arith.constant 0 : index
    %55 = vector.load %arg9[%c0_87, %c0_88] : memref<1x128xf32, #tpu.memory_space<vmem>>, vector<1x128xf32>
    %56 = vector.broadcast %55 : vector<1x128xf32> to vector<128x128xf32>
    %57 = arith.addf %54, %56 : vector<128x128xf32>
    %cst_89 = arith.constant 0.000000e+00 : f32
    %58 = vector.broadcast %cst_89 : f32 to vector<128x128xf32>
    %59 = arith.maximumf %57, %58 : vector<128x128xf32>
    %60 = vector.shape_cast %59 : vector<128x128xf32> to vector<8x16x128xf32>
    %61 = arith.truncf %60 : vector<8x16x128xf32> to vector<8x16x128xbf16>
    %c0_90 = arith.constant 0 : index
    %c0_91 = arith.constant 0 : index
    %c0_92 = arith.constant 0 : index
    %c0_93 = arith.constant 0 : index
    %62 = vector.load %arg10[%c0_90, %c0_91, %c0_92, %c0_93] : memref<1x8x16x128xbf16, #tpu.memory_space<vmem>>, vector<1x8x16x128xbf16>
    %63 = vector.shape_cast %62 : vector<1x8x16x128xbf16> to vector<8x16x128xbf16>
    %64 = vector.shape_cast %61 : vector<8x16x128xbf16> to vector<1x8x16x128xbf16>
    tpu.vector_store %arg10[%c0_90, %c0_91, %c0_92, %c0_93], %64 {strides = array<i32>} : memref<1x8x16x128xbf16, #tpu.memory_space<vmem>>, vector<1x8x16x128xbf16>,
    return
  }
  func.func @transform_0(%arg0: i32, %arg1: i32) -> (i32, i32, i32, i32) {
    %c0_i32 = arith.constant 0 : i32
    %c0_i32_0 = arith.constant 0 : i32
    %c0_i32_1 = arith.constant 0 : i32
    return %arg0, %arg1, %c0_i32, %c0_i32_0 : i32, i32, i32, i32
  }
  func.func @transform_1(%arg0: i32, %arg1: i32) -> (i32, i32, i32, i32) {
    %c1_i32 = arith.constant 1 : i32
    %0 = arith.addi %arg1, %c1_i32 : i32
    %c2_i32 = arith.constant 2 : i32
    %1 = arith.muli %0, %c2_i32 : i32
    %c0_i32 = arith.constant 0 : i32
    %c0_i32_0 = arith.constant 0 : i32
    %c0_i32_1 = arith.constant 0 : i32
    return %arg0, %1, %c0_i32, %c0_i32_0 : i32, i32, i32, i32
  }
  func.func @transform_2(%arg0: i32, %arg1: i32) -> (i32, i32) {
    %c0_i32 = arith.constant 0 : i32
    %c0_i32_0 = arith.constant 0 : i32
    %c0_i32_1 = arith.constant 0 : i32
    return %c0_i32, %c0_i32_0 : i32, i32
  }
  func.func @transform_3(%arg0: i32, %arg1: i32) -> (i32, i32) {
    %c0_i32 = arith.constant 0 : i32
    %c0_i32_0 = arith.constant 0 : i32
    %c0_i32_1 = arith.constant 0 : i32
    return %c0_i32, %c0_i32_0 : i32, i32
  }
  func.func @transform_4(%arg0: i32, %arg1: i32) -> (i32, i32) {
    %c0_i32 = arith.constant 0 : i32
    %c0_i32_0 = arith.constant 0 : i32
    %c0_i32_1 = arith.constant 0 : i32
    return %c0_i32, %c0_i32_0 : i32, i32
  }
  func.func @transform_5(%arg0: i32, %arg1: i32) -> (i32, i32) {
    %c0_i32 = arith.constant 0 : i32
    %c0_i32_0 = arith.constant 0 : i32
    %c0_i32_1 = arith.constant 0 : i32
    return %c0_i32, %c0_i32_0 : i32, i32
  }
  func.func @transform_6(%arg0: i32, %arg1: i32) -> (i32, i32) {
    %c0_i32 = arith.constant 0 : i32
    %c0_i32_0 = arith.constant 0 : i32
    %c0_i32_1 = arith.constant 0 : i32
    return %c0_i32, %c0_i32_0 : i32, i32
  }
  func.func @transform_7(%arg0: i32, %arg1: i32) -> (i32, i32) {
    %c0_i32 = arith.constant 0 : i32
    %c0_i32_0 = arith.constant 0 : i32
    %c0_i32_1 = arith.constant 0 : i32
    return %c0_i32, %c0_i32_0 : i32, i32
  }
  func.func @transform_8(%arg0: i32, %arg1: i32) -> (i32, i32, i32, i32) {
    %c0_i32 = arith.constant 0 : i32
    %c0_i32_0 = arith.constant 0 : i32
    %c0_i32_1 = arith.constant 0 : i32
    return %arg0, %arg1, %c0_i32, %c0_i32_0 : i32, i32, i32, i32
  }
}

</mosaic_0001>

<bundles_post_ra>
// kernel: double_conv_forward.1
= control target key start
LH: loop header
LB: loop body
LE: loop exit
PB: predicated region body
PF: predicated region fallthrough
CT: control target
= control target key end

     0   :  { %s6775_s27 = smov 0   ;;  %s6777_s28 = smov 0   ;;  %s8570_s0 = inlined_call_operand.vmem [shape: bf16[2,24,18,128], index: 0, kind: input, shape index: {}, may-alias: {0,1}]   ;;  %s8571_s1 = inlined_call_operand.vmem [shape: bf16[2,24,18,128], index: 1, kind: input, shape index: {}, may-alias: {0,1}]   ;;  %s8572_s2 = inlined_call_operand.vmem [shape: bf16[1152,128], index: 2, kind: input, shape index: {}]   ;;  %s8573_s3 = inlined_call_operand.vmem [shape: f32[1,128], index: 3, kind: input, shape index: {}]   ;;  %s8574_s4 = inlined_call_operand.vmem [shape: f32[1,128], index: 4, kind: input, shape index: {}]   ;;  %s8575_s5 = inlined_call_operand.vmem [shape: bf16[1152,128], index: 5, kind: input, shape index: {}]   ;;  %s8576_s6 = inlined_call_operand.vmem [shape: f32[1,128], index: 6, kind: input, shape index: {}]   ;;  %s8577_s7 = inlined_call_operand.vmem [shape: f32[1,128], index: 7, kind: input, shape index: {}]   ;;  %s8578_s8 = inlined_call_operand.vmem [shape: bf16[2,16,16,128], index: 8, kind: output, shape index: {}]  }
   0x1   :  { %s6779_s29 = smov 0   ;;  %s6781_s30 = smov 0  }
   0x2   :  { %s6783_s9 = smov 0  }
   0x3 LB: > { %s27_s10 = sadd.s32 1, %s6718_s29  ;;  %s30_s11 = sadd.s32 1, %s6722_s30  ;;  %s6726_s9 = sphi %s6783_s9, %s18_s9   ;;  %s6722_s30 = sphi %s6781_s30, %s8665_s30   ;;  %s6718_s29 = sphi %s6779_s29, %s8664_s29   ;;  %s6714_s28 = sphi %s6777_s28, %s8663_s28   ;;  %s6710_s27 = sphi %s6775_s27, %s8662_s27  }
   0x4   : > { %p28_p0 = scmp.ge.s32.totalorder %s27_s10, 2  ;;  %p5223_p1 = scmp.ge.s32.totalorder %s6726_s9, 1 }
   0x5   : > { %p310_p2 = scmp.lt.s32.totalorder %s6726_s9, 5 }
   0x6   : > { %s8667_s10 = smov (%p28_p0, %s27_s10), 0  ;;  %s8669_s11 = smov (!%p28_p0, %s30_s11), %s6722_s30 }
   0x7   : > { %p311_p3 = pnand %p5223_p1, %p310_p2  ;;  %p32_p4 = scmp.ge.s32.totalorder %s8669_s11, 2 }
   0x9   : > { %s8671_s11 = smov (%p32_p4, %s8669_s11), 0  ;;  %314 = sbr.rel (%p311_p3) target bundleno = 893 (0x37d), region = 52 }
   0xe   : > { %v6382_v0 = vld [vmem:[%s8572_s2 + $0x78] sm:$0xff]   ;;  %s6822_s20 = sshll.u32 %s6710_s27, 3  ;;  %v6386_v4 = vld [vmem:[%s8572_s2 + $0x70] sm:$0xff]   ;;  %p367_p5 = scmp.lt.s32.totalorder %s6714_s28, 1  ;;  %v6390_v8 = vld [vmem:[%s8572_s2 + $0x68] sm:$0xff]   ;;  %vm850_vm0 = vcmask 1046528  }
   0xf   : > { %v6383_v1 = vld [vmem:[%s8572_s2 + $0xf8] sm:$0xff]   ;;  %5675 = vmatprep.subr.bf16.mxu0 %v6382_v0  ;;  %v6387_v5 = vld [vmem:[%s8572_s2 + $0xf0] sm:$0xff]   ;;  %p369_p6 = scmp.lt.s32.totalorder %s6822_s20, 23  ;;  %p395_p7 = scmp.lt.s32.totalorder %s6822_s20, 15  ;;  %v6391_v9 = vld [vmem:[%s8572_s2 + $0xe8] sm:$0xff]   ;;  %vm2949_vm2 = vcmask 1043456  }
  0x10   : > { %v6384_v2 = vld [vmem:[%s8572_s2 + $0x38] sm:$0xff]   ;;  %5751 = vmatprep.subr.bf16.mxu1 %v6383_v1  ;;  %v6388_v6 = vld [vmem:[%s8572_s2 + $0x30] sm:$0xff]   ;;  %s8673_s28 = smov (!%p367_p5, %s6714_s28), 1  ;;  %v6392_v10 = vld [vmem:[%s8572_s2 + $0x28] sm:$0xff]   ;;  %vm689_vm1 = vsmask.f32 7424 }
  0x11   : > { %v6385_v3 = vld [vmem:[%s8572_s2 + $0xb8] sm:$0xff]   ;;  %5676 = vmatpush3.bf16.msra.mxu0 %v6384_v2  ;;  %v6389_v7 = vld [vmem:[%s8572_s2 + $0xb0] sm:$0xff]   ;;  %s5231_s21 = sshll.u32 %s8673_s28, 5  ;;  %v6393_v11 = vld [vmem:[%s8572_s2 + $0xa8] sm:$0xff]   ;;  %vm2950_vm3 = vsmask.f32 7938 }
  0x12   : > { %5752 = vmatpush3.bf16.msra.mxu1 %v6385_v3  ;;  %5677 = vmatprep.subr.bf16.mxu0 %v6386_v4  ;;  %s396_s24 = scalar_select %p395_p7, %s6822_s20, 15  ;;  %v6394_v12 = vld [vmem:[%s8572_s2 + $0x60] sm:$0xff]   ;;  %v6398_v16 = vld [vmem:[%s8572_s2 + $0x58] sm:$0xff]   ;;  %v6402_v20 = vld [vmem:[%s8572_s2 + $0x50] sm:$0xff]   ;;  %vm2746_vm4 = vsmask.f32 256 }
  0x13   : > { %5753 = vmatprep.subr.bf16.mxu1 %v6387_v5  ;;  %s6862_s12 = scalar_select %p369_p6, %s6822_s20, 23  ;;  %v6395_v13 = vld [vmem:[%s8572_s2 + $0xe0] sm:$0xff]   ;;  %v6399_v17 = vld [vmem:[%s8572_s2 + $0xd8] sm:$0xff]   ;;  %v6403_v21 = vld [vmem:[%s8572_s2 + $0xd0] sm:$0xff]   ;;  %vm2956_vm5 = vcmask 1040384  }
  0x14   : > { %s5230_s15 = sshll.u32 %s396_s24, 1  ;;  %v6396_v14 = vld [vmem:[%s8572_s2 + $0x20] sm:$0xff]   ;;  %v6400_v18 = vld [vmem:[%s8572_s2 + $0x18] sm:$0xff]   ;;  %v6404_v22 = vld [vmem:[%s8572_s2 + $0x10] sm:$0xff]   ;;  %vm2747_vm6 = vsmask.f32 4368 }
  0x15   : > { %5678 = vmatpush3.bf16.msra.mxu0 %v6388_v6  ;;  %s399_s18 = sadd.s32 %s5231_s21, %s5230_s15  ;;  %v6397_v15 = vld [vmem:[%s8572_s2 + $0xa0] sm:$0xff]   ;;  %v6401_v19 = vld [vmem:[%s8572_s2 + $0x98] sm:$0xff]   ;;  %s6337_s25 = smul.u32 3, %s6862_s12  ;;  %v6405_v23 = vld [vmem:[%s8572_s2 + $0x90] sm:$0xff]  }
  0x16   : > { %5754 = vmatpush3.bf16.msra.mxu1 %v6389_v7  ;;  %5679 = vmatprep.subr.bf16.mxu0 %v6390_v8  ;;  %s5232_s23 = sshll.u32 %s399_s18, 2  ;;  %s6338_s18 = smul.u32 72, %s8673_s28  ;;  %v6406_v24 = vld [vmem:[%s8572_s2 + $0x48] sm:$0xff]   ;;  %v6410_v28 = vld [vmem:[%s8572_s2 + $0x40] sm:$0xff]   ;;  %v6419_v35 = vld [vmem:[%s8572_s2 + $0x178] sm:$0xff]  }
  0x17   : > { %5755 = vmatprep.subr.bf16.mxu1 %v6391_v9  ;;  %s6879_s14 = scalar_lea.vmem %s8578_s8, %s5232_s23  ;;  %v6407_v25 = vld [vmem:[%s8572_s2 + $0xc8] sm:$0xff]   ;;  %v6411_v29 = vld [vmem:[%s8572_s2 + $0xc0] sm:$0xff]   ;;  %s5667_s15 = sadd.s32 8, %s6822_s20  ;;  %v6420_v0 = vld [vmem:[%s8572_s2 + $0x138] sm:$0xff]  }
  0x18   : > { %s373_s12 = sadd.s32 %s6338_s18, %s6337_s25  ;;  %v6408_v26 = vld [vmem:[%s8572_s2 + $0x8] sm:$0xff]   ;;  %v6412_v30 = vld [vmem:[%s8572_s2] sm:$0xff]   ;;  %p6954_p8 = scmp.lt.s32.totalorder %s5667_s15, 23  ;;  %v6426_v8 = vld [vmem:[%s8572_s2 + $0x170] sm:$0xff]  }
  0x19   : > { %5680 = vmatpush3.bf16.msra.mxu0 %v6392_v10  ;;  %s5225_s16 = sshll.u32 %s373_s12, 2  ;;  %v6409_v27 = vld [vmem:[%s8572_s2 + $0x88] sm:$0xff]   ;;  %v6413_v31 = vld [vmem:[%s8572_s2 + $0x80] sm:$0xff]   ;;  %vm7696_vm7 = vmand %vm2949_vm2, %vm2950_vm3  ;;  %p5417_p9 = scmp.ne.s32.totalorder %s6710_s27, 0 }
  0x1a   : > { %5756 = vmatpush3.bf16.msra.mxu1 %v6393_v11  ;;  %5681 = vmatprep.subr.bf16.mxu0 %v6394_v12  ;;  %s6927_s13 = scalar_lea.vmem %s8570_s0, %s5225_s16  ;;  %s8675_s15 = smov (!%p6954_p8, %s5667_s15), 23  ;;  %vm7706_vm8 = vmand %vm2956_vm5, %vm2746_vm4 }
  0x1b   : > { %5757 = vmatprep.subr.bf16.mxu1 %v6395_v13  ;;  %v404_v32 = vld [vmem:[%s6927_s13] sm:$0xff]   ;;  %v406_v33 = vld [vmem:[%s6927_s13 + $0x8] sm:$0x1]  ;;  %v407_v34 = vld [vmem:[%s6927_s13 + $0xc] sm:$0xff]   ;;  %s6339_s23 = smul.u32 3, %s8675_s15 }
  0x1c   : > { %428 = vst [vmem:[#allocation2] sm:$0xff] %v404_v32   ;;  %430 = vst [vmem:[#allocation2 + $0x8] sm:$0x1] %v406_v33  ;;  %v409_v36 = vld [vmem:[%s6927_s13 + $0x14] sm:$0x1]  ;;  %v410_v37 = vld [vmem:[%s6927_s13 + $0x18] sm:$0xff]  }
  0x1d   : > { %5682 = vmatpush3.bf16.msra.mxu0 %v6396_v14  ;;  %431 = vst [vmem:[#allocation2 + $0xc] sm:$0xff] %v407_v34   ;;  %433 = vst [vmem:[#allocation2 + $0x14] sm:$0x1] %v409_v36  ;;  %v412_v38 = vld [vmem:[%s6927_s13 + $0x20] sm:$0x1]  ;;  %v413_v39 = vld [vmem:[%s6927_s13 + $0x24] sm:$0xff]   ;;  %s7028_s21 = sadd.s32 %s6339_s23, %s6338_s18 }
  0x1e   : > { %5758 = vmatpush3.bf16.msra.mxu1 %v6397_v15  ;;  %5683 = vmatprep.subr.bf16.mxu0 %v6398_v16  ;;  %434 = vst [vmem:[#allocation2 + $0x18] sm:$0xff] %v410_v37   ;;  %436 = vst [vmem:[#allocation2 + $0x20] sm:$0x1] %v412_v38  ;;  %v416_v52 = vld [vmem:[%s6927_s13 + $0x30] sm:$0xff]   ;;  %v419_v3 = vld [vmem:[%s6927_s13 + $0x3c] sm:$0xff]   ;;  %s5228_s19 = sshll.u32 %s7028_s21, 2 }
  0x1f   : > { %5759 = vmatprep.subr.bf16.mxu1 %v6399_v17  ;;  %437 = vst [vmem:[#allocation2 + $0x24] sm:$0xff] %v413_v39   ;;  %440 = vst [vmem:[#allocation2 + $0x30] sm:$0xff] %v416_v52   ;;  %v6447_v13 = vld [vmem:[%s8572_s2 + $0x1f8] sm:$0xff]   ;;  %v6433_v32 = vld [vmem:[%s8572_s2 + $0x168] sm:$0xff]   ;;  %s7065_s17 = scalar_lea.vmem %s8571_s1, %s5228_s19 }
  0x20   : > { %443 = vst [vmem:[#allocation2 + $0x3c] sm:$0xff] %v419_v3   ;;  %v415_v33 = vld [vmem:[%s6927_s13 + $0x2c] sm:$0x1]  ;;  %v6461_v3 = vld [vmem:[%s8572_s2 + $0x1b0] sm:$0xff]   ;;  %vm7714_vm9 = vmor %vm2746_vm4, %vm2747_vm6 }
  0x21   : > { %5684 = vmatpush3.bf16.msra.mxu0 %v6400_v18  ;;  %439 = vst [vmem:[#allocation2 + $0x2c] sm:$0x1] %v415_v33  ;;  %vm7753_vm10 = vmand %vm2956_vm5, %vm2950_vm3 }
  0x22   : > { %5760 = vmatpush3.bf16.msra.mxu1 %v6401_v19  ;;  %5685 = vmatprep.subr.bf16.mxu0 %v6402_v20 }
  0x23   : > { %5761 = vmatprep.subr.bf16.mxu1 %v6403_v21  ;;  %v477_v40 = vld [vmem:[#allocation2] sm:$0xf]  ;;  %v478_v41 = vld [vmem:[#allocation2 + $0x4] sm:$0xf] }
  0x24   : > { %v5233_v42 = vcombine.low %v477_v40, %v478_v41  ;;  %v6415_v43 = vld [vmem:[#allocation2 + $0x8] ss:$0 sps:$4 sm:$0x11]   ;;  %v518_v44 = vld [vmem:[#allocation2 + $0xc] sm:$0xf] }
  0x25   : > { %5686 = vmatpush3.bf16.msra.mxu0 %v6404_v22  ;;  %v6946_v45 = vld [vmem:[#allocation2 + $0x10] sm:$0xf]  ;;  %v507_v46 = vld [vmem:[#allocation2] sm:$0xe]  ;;  %v698_v49 = vshll.u32 %v6415_v43, 16  ;;  %v852_v54 = vrot.slane %v6415_v43, 1 }
  0x26   : > { %5762 = vmatpush3.bf16.msra.mxu1 %v6405_v23  ;;  %5687 = vmatprep.subr.bf16.mxu0 %v6406_v24  ;;  %v691_v47 = vshrl.u32 %v5233_v42, 16  ;;  %v693_v48 = vshll.u32 %v5233_v42, 16  ;;  %v6949_v50 = vcombine.low %v518_v44, %v6946_v45  ;;  %v479_v51 = vld [vmem:[#allocation2 + $0xc] sm:$0xf]  ;;  %v5253_v53 = vcombine.low %v507_v46, %v478_v41  ;;  %v480_v55 = vld [vmem:[#allocation2 + $0x10] sm:$0xf] }
  0x27   : > { %5763 = vmatprep.subr.bf16.mxu1 %v6407_v25  ;;  %v700_v57 = vrot.slane %v698_v49, 1  ;;  %v520_v58 = vld [vmem:[#allocation2 + $0x18] sm:$0xf]  ;;  %v6959_v60 = vcombine.low %v479_v51, %v480_v55  ;;  %v6422_v61 = vld [vmem:[#allocation2 + $0x14] ss:$0 sps:$4 sm:$0x11]  }
  0x28   : > { %v695_v56 = vrot.slane %v693_v48, 1  ;;  %2192 = vmatprep.mubr.bf16.mxu1 %v6949_v50  ;;  %v851_v59 = vrot.slane %v5253_v53, 1  ;;  %v6961_v62 = vld [vmem:[#allocation2 + $0x1c] sm:$0xf]  ;;  %v508_v2 = vld [vmem:[#allocation2 + $0xc] sm:$0xe] }
  0x29   : > { %5688 = vmatpush3.bf16.msra.mxu0 %v6408_v26  ;;  %v6967_v1 = vcombine.low %v520_v58, %v6961_v62  ;;  %v703_v5 = vshrl.u32 %v6959_v60, 16  ;;  %v705_v6 = vshll.u32 %v6959_v60, 16  ;;  %v710_v7 = vshll.u32 %v6422_v61, 16  ;;  %v481_v9 = vld [vmem:[#allocation2 + $0x18] sm:$0xf]  ;;  %v6427_v24 = vld [vmem:[%s8572_s2 + $0x130] sm:$0xff]  }
  0x2a   : > { %5764 = vmatpush3.bf16.msra.mxu1 %v6409_v27  ;;  %5689 = vmatprep.subr.bf16.mxu0 %v6410_v28  ;;  %v696_v63 = vor.u32 %v695_v56, %v691_v47  ;;  %v853_v4 = vsel %vm850_vm0, %v851_v59, %v852_v54  ;;  %v5254_v11 = vcombine.low %v508_v2, %v480_v55  ;;  %v482_v12 = vld [vmem:[#allocation2 + $0x1c] sm:$0xf]  ;;  %v855_v16 = vrot.slane %v6422_v61, 1  ;;  %v6989_v18 = vld [vmem:[#allocation2 + $0x20] ss:$0 sps:$4 sm:$0x11]  }
  0x2b   : > { %5765 = vmatprep.subr.bf16.mxu1 %v6411_v29  ;;  %v707_v14 = vrot.slane %v705_v6, 1  ;;  %v712_v15 = vrot.slane %v710_v7, 1  ;;  %v6987_v17 = vcombine.low %v481_v9, %v482_v12  ;;  %v522_v20 = vld [vmem:[#allocation2 + $0x24] sm:$0xf]  ;;  %v6991_v21 = vld [vmem:[#allocation2 + $0x28] sm:$0xf] }
  0x2c   : > { %v701_v10 = vsel %vm689_vm1, %v696_v63, %v700_v57  ;;  %v854_v19 = vrot.slane %v5254_v11, 1  ;;  %v6448_v22 = vld [vmem:[%s8572_s2 + $0x1b8] sm:$0xff]   ;;  %v722_v27 = vshll.u32 %v6989_v18, 16  ;;  %v422_v28 = vld [vmem:[%s6927_s13 + $0x48] sm:$0xff]   ;;  %v483_v38 = vld [vmem:[#allocation2 + $0x24] sm:$0xf] }
  0x2d   : > { %5690 = vmatpush3.bf16.msra.mxu0 %v6412_v30  ;;  %2079 = vmatprep.mubr.bf16.mxu0 %v701_v10  ;;  %v708_v23 = vor.u32 %v707_v14, %v703_v5  ;;  %v715_v25 = vshrl.u32 %v6987_v17, 16  ;;  %v717_v26 = vshll.u32 %v6987_v17, 16  ;;  %v7005_v30 = vcombine.low %v522_v20, %v6991_v21  ;;  %446 = vst [vmem:[#allocation2 + $0x48] sm:$0xff] %v422_v28   ;;  %v484_v39 = vld [vmem:[#allocation2 + $0x28] sm:$0xf]  ;;  %v6440_v44 = vld [vmem:[%s8572_s2 + $0x160] sm:$0xff]  }
  0x2e   : > { %5766 = vmatpush3.bf16.msra.mxu1 %v6413_v31  ;;  %5827 = vmatprep.subr.bf16.mxu0 %v6419_v35  ;;  %v856_v29 = vsel %vm850_vm0, %v854_v19, %v855_v16  ;;  %v509_v31 = vld [vmem:[#allocation2 + $0x18] sm:$0xe]  ;;  %v724_v36 = vrot.slane %v722_v27, 1  ;;  %v6434_v40 = vld [vmem:[%s8572_s2 + $0x128] sm:$0xff]   ;;  %v7016_v41 = vcombine.low %v483_v38, %v484_v39  ;;  %v510_v43 = vld [vmem:[#allocation2 + $0x24] sm:$0xe] }
  0x2f   : > { %5903 = vmatprep.subr.bf16.mxu1 %v6447_v13  ;;  %v713_v34 = vsel %vm689_vm1, %v708_v23, %v712_v15  ;;  %v719_v35 = vrot.slane %v717_v26, 1  ;;  %v5255_v37 = vcombine.low %v509_v31, %v482_v12  ;;  %v6456_v46 = vld [vmem:[%s8572_s2 + $0x1f0] sm:$0xff]   ;;  %v858_v47 = vrot.slane %v6989_v18, 1  ;;  %v418_v53 = vld [vmem:[%s6927_s13 + $0x38] sm:$0x1]  ;;  %v6471_v38 = vld [vmem:[%s8572_s2 + $0x1a8] sm:$0xff]  }
  0x30   : > { %2080 = vmatmul.mubr.bf16.vlgmr.msra.gmra.mxu0 %v5233_v42  ;;  %v729_v48 = vshll.u32 %v7016_v41, 16  ;;  %v524_v49 = vld [vmem:[#allocation2 + $0x30] sm:$0xf]  ;;  %v425_v55 = vld [vmem:[%s6927_s13 + $0x54] sm:$0xff]   ;;  %v727_v56 = vshrl.u32 %v7016_v41, 16  ;;  %v5256_v59 = vcombine.low %v510_v43, %v484_v39 }
  0x31   : > { %2193 = vmatmul.mubr.bf16.vlgmr.msra.gmra.mxu1 %v853_v4  ;;  %5828 = vmatpush3.bf16.msra.mxu0 %v6420_v0  ;;  %v720_v42 = vor.u32 %v719_v35, %v715_v25  ;;  %v857_v52 = vrot.slane %v5255_v37, 1  ;;  %v485_v54 = vld [vmem:[#allocation2 + $0x30] sm:$0xf]  ;;  %v7036_v58 = vld [vmem:[#allocation2 + $0x34] sm:$0xf]  ;;  %449 = vst [vmem:[#allocation2 + $0x54] sm:$0xff] %v425_v55  }
  0x32   : > { %2200 = vmatprep.mubr.bf16.mxu1 %v6967_v1  ;;  %5829 = vmatprep.subr.bf16.mxu0 %v6426_v8  ;;  %v731_v57 = vrot.slane %v729_v48, 1  ;;  %442 = vst [vmem:[#allocation2 + $0x38] sm:$0x1] %v418_v53  ;;  %v7038_v61 = vld [vmem:[#allocation2 + $0x34] sm:$0xf]  ;;  %v6445_v0 = vld [vmem:[%s8572_s2 + $0x120] sm:$0xff]   ;;  %v7055_v5 = vcombine.low %v524_v49, %v7036_v58 }
  0x33   : > { %5904 = vmatpush3.bf16.msra.mxu1 %v6448_v22  ;;  %2087 = vmatprep.mubr.bf16.mxu0 %v713_v34  ;;  %v725_v51 = vsel %vm689_vm1, %v720_v42, %v724_v36  ;;  %v7041_v63 = vcombine.low %v485_v54, %v7038_v61  ;;  %v6436_v2 = vld [vmem:[#allocation2 + $0x2c] ss:$0 sps:$4 sm:$0x11]   ;;  %v859_v4 = vsel %vm850_vm0, %v857_v52, %v858_v47  ;;  %v860_v9 = vrot.slane %v5256_v59, 1  ;;  %v6455_v11 = vld [vmem:[%s8572_s2 + $0x118] sm:$0xff]   ;;  %v6463_v15 = vld [vmem:[%s8572_s2 + $0x150] sm:$0xff]  }
  0x34   : > { %5905 = vmatprep.subr.bf16.mxu1 %v6456_v46  ;;  %v732_v7 = vor.u32 %v731_v57, %v727_v56  ;;  %v734_v8 = vshll.u32 %v6436_v2, 16  ;;  %v861_v12 = vrot.slane %v6436_v2, 1  ;;  %v526_v13 = vld [vmem:[#allocation2 + $0x3c] sm:$0xf]  ;;  %v7067_v14 = vld [vmem:[#allocation2 + $0x40] sm:$0xf] }
  0x35   : > { %5830 = vmatpush3.bf16.msra.mxu0 %v6427_v24  ;;  %v741_v6 = vshll.u32 %v7041_v63, 16  ;;  %v739_v10 = vshrl.u32 %v7041_v63, 16  ;;  %v421_v19 = vld [vmem:[%s6927_s13 + $0x44] sm:$0x1]  ;;  %v511_v24 = vld [vmem:[#allocation2 + $0x30] sm:$0xe] }
  0x36   : > { %5831 = vmatprep.subr.bf16.mxu0 %v6433_v32  ;;  %v736_v16 = vrot.slane %v734_v8, 1  ;;  %445 = vst [vmem:[#allocation2 + $0x44] sm:$0x1] %v421_v19  ;;  %v452_v22 = vld [vmem:[%s7065_s17] sm:$0xff]   ;;  %v487_v25 = vld [vmem:[#allocation2 + $0x3c] sm:$0xf]  ;;  %v7083_v32 = vcombine.low %v526_v13, %v7067_v14  ;;  %v5257_v34 = vcombine.low %v511_v24, %v7038_v61 }
  0x37   : > { %5906 = vmatpush3.bf16.msra.mxu1 %v6461_v3  ;;  %v743_v18 = vrot.slane %v741_v6, 1  ;;  %v488_v26 = vld [vmem:[#allocation2 + $0x40] sm:$0xf]  ;;  %465 = vst [vmem:[#allocation2 + $0x60] sm:$0xff] %v452_v22   ;;  %v6470_v36 = vld [vmem:[%s8572_s2 + $0x1e8] sm:$0xff]  }
  0x38   : > { %2088 = vmatmul.mubr.bf16.gmra.mxu0 %v6959_v60  ;;  %v6454_v60 = vld [vmem:[%s8572_s2 + $0x158] sm:$0xff]   ;;  %v737_v23 = vsel %vm689_vm1, %v732_v7, %v736_v16  ;;  %v7077_v28 = vcombine.low %v487_v25, %v488_v26  ;;  %5907 = vmatprep.subr.bf16.mxu1 %v6470_v36  ;;  %v6472_v42 = vld [vmem:[%s8572_s2 + $0x148] sm:$0xff]   ;;  %v863_v47 = vrot.slane %v5257_v34, 1  ;;  %v6474_v2 = vld [vmem:[%s8572_s2 + $0x1e0] sm:$0xff]  }
  0x39   : > { %2201 = vmatmul.mubr.bf16.gmra.mxu1 %v856_v29  ;;  %2095 = vmatprep.mubr.bf16.mxu0 %v725_v51  ;;  %v6442_v20 = vld [vmem:[#allocation2 + $0x38] ss:$0 sps:$4 sm:$0x11]   ;;  %v6464_v29 = vld [vmem:[%s8572_s2 + $0x110] sm:$0xff]   ;;  %v744_v31 = vor.u32 %v743_v18, %v739_v10  ;;  %v512_v37 = vld [vmem:[#allocation2 + $0x3c] sm:$0xe] }
  0x3a   : > { %2208 = vmatprep.mubr.bf16.mxu1 %v7005_v30  ;;  %5832 = vmatpush3.bf16.msra.mxu0 %v6434_v40  ;;  %v746_v27 = vshll.u32 %v6442_v20, 16  ;;  %v753_v35 = vshll.u32 %v7077_v28, 16  ;;  %v751_v39 = vshrl.u32 %v7077_v28, 16  ;;  %v424_v40 = vld [vmem:[%s6927_s13 + $0x50] sm:$0x1]  ;;  %v864_v48 = vrot.slane %v6442_v20, 1 }
  0x3b   : > { %5833 = vmatprep.subr.bf16.mxu0 %v6440_v44  ;;  %448 = vst [vmem:[#allocation2 + $0x50] sm:$0x1] %v424_v40  ;;  %v489_v49 = vld [vmem:[#allocation2 + $0x48] sm:$0xf]  ;;  %v490_v51 = vld [vmem:[#allocation2 + $0x4c] sm:$0xf]  ;;  %5908 = vmatpush3.bf16.msra.mxu1 %v6471_v38  ;;  %v5258_v56 = vcombine.low %v512_v37, %v488_v26 }
  0x3c   : > { %v748_v33 = vrot.slane %v746_v27, 1  ;;  %v755_v46 = vrot.slane %v753_v35, 1  ;;  %v528_v53 = vld [vmem:[#allocation2 + $0x48] sm:$0xf]  ;;  %v7102_v54 = vld [vmem:[#allocation2 + $0x4c] sm:$0xf]  ;;  %v7104_v55 = vcombine.low %v489_v49, %v490_v51  ;;  %5909 = vmatprep.subr.bf16.mxu1 %v6474_v2 }
  0x3d   : > { %v6450_v44 = vld [vmem:[#allocation2 + $0x44] ss:$0 sps:$4 sm:$0x11]   ;;  %v427_v3 = vld [vmem:[%s6927_s13 + $0x5c] sm:$0x1]  ;;  %v866_v6 = vrot.slane %v5258_v56, 1 }
  0x3e   : > { %5834 = vmatpush3.bf16.msra.mxu0 %v6445_v0  ;;  %v749_v43 = vsel %vm689_vm1, %v744_v31, %v748_v33  ;;  %v758_v52 = vshll.u32 %v6450_v44, 16  ;;  %v756_v57 = vor.u32 %v755_v46, %v751_v39  ;;  %v765_v61 = vshll.u32 %v7104_v55, 16  ;;  %v6473_v0 = vld [vmem:[%s8572_s2 + $0x108] sm:$0xff]   ;;  %451 = vst [vmem:[#allocation2 + $0x5c] sm:$0x1] %v427_v3  ;;  %v6479_v24 = vld [vmem:[%s8572_s2 + $0x1a0] sm:$0xff]  }
  0x3f   : > { %5835 = vmatprep.subr.bf16.mxu0 %v6454_v60  ;;  %v7112_v60 = vcombine.low %v528_v53, %v7102_v54  ;;  %v867_v13 = vrot.slane %v6450_v44, 1  ;;  %v530_v16 = vld [vmem:[#allocation2 + $0x54] sm:$0xf]  ;;  %v7122_v18 = vld [vmem:[#allocation2 + $0x58] sm:$0xf]  ;;  %5910 = vmatpush3.bf16.msra.mxu1 %v6479_v24  ;;  %v6483_v49 = vld [vmem:[%s8572_s2 + $0x140] sm:$0xff]  }
  0x40   : > { %2096 = vmatmul.mubr.bf16.gmra.mxu0 %v6987_v17  ;;  %v862_v17 = vsel %vm850_vm0, %v860_v9, %v861_v12  ;;  %v760_v59 = vrot.slane %v758_v52, 1  ;;  %v763_v9 = vshrl.u32 %v7104_v55, 16  ;;  %v767_v10 = vrot.slane %v765_v61, 1  ;;  %v492_v12 = vld [vmem:[#allocation2 + $0x58] sm:$0xf] }
  0x41   : > { %2209 = vmatmul.mubr.bf16.gmra.mxu1 %v859_v4  ;;  %2103 = vmatprep.mubr.bf16.mxu0 %v737_v23  ;;  %v455_v4 = vld [vmem:[%s7065_s17 + $0xc] sm:$0xff]   ;;  %v513_v20 = vld [vmem:[#allocation2 + $0x48] sm:$0xe]  ;;  %v514_v23 = vld [vmem:[#allocation2 + $0x54] sm:$0xe] }
  0x42   : > { %2216 = vmatprep.mubr.bf16.mxu1 %v7055_v5  ;;  %5836 = vmatpush3.bf16.msra.mxu0 %v6455_v11  ;;  %v6458_v7 = vld [vmem:[#allocation2 + $0x50] ss:$0 sps:$4 sm:$0x11]   ;;  %468 = vst [vmem:[#allocation2 + $0x6c] sm:$0xff] %v455_v4   ;;  %v761_v8 = vsel %vm689_vm1, %v756_v57, %v760_v59  ;;  %v491_v11 = vld [vmem:[#allocation2 + $0x54] sm:$0xf]  ;;  %v768_v25 = vor.u32 %v767_v10, %v763_v9 }
  0x43   : > { %5837 = vmatprep.subr.bf16.mxu0 %v6463_v15  ;;  %v770_v15 = vshll.u32 %v6458_v7, 16  ;;  %v7124_v19 = vcombine.low %v491_v11, %v492_v12  ;;  %v6481_v27 = vld [vmem:[%s8572_s2 + $0x1d8] sm:$0xff]   ;;  %v5259_v31 = vcombine.low %v513_v20, %v490_v51  ;;  %v5260_v35 = vcombine.low %v514_v23, %v492_v12  ;;  %v454_v39 = vld [vmem:[%s7065_s17 + $0x8] sm:$0x1]  ;;  %v493_v40 = vld [vmem:[#allocation2 + $0x60] sm:$0xf] }
  0x44   : > { %5911 = vmatprep.subr.bf16.mxu1 %v6481_v27  ;;  %v532_v44 = vld [vmem:[#allocation2 + $0x60] sm:$0xf]  ;;  %467 = vst [vmem:[#allocation2 + $0x68] sm:$0x1] %v454_v39  ;;  %v494_v46 = vld [vmem:[#allocation2 + $0x64] sm:$0xf] }
  0x45   : > { %v772_v22 = vrot.slane %v770_v15, 1  ;;  %v777_v26 = vshll.u32 %v7124_v19, 16  ;;  %v6466_v33 = vld [vmem:[#allocation2 + $0x5c] ss:$0 sps:$4 sm:$0x11]   ;;  %v775_v34 = vshrl.u32 %v7124_v19, 16 }
  0x46   : > { %5838 = vmatpush3.bf16.msra.mxu0 %v6464_v29  ;;  %v868_v29 = vsel %vm850_vm0, %v866_v6, %v867_v13  ;;  %v782_v38 = vshll.u32 %v6466_v33, 16  ;;  %v872_v51 = vrot.slane %v5260_v35, 1  ;;  %v873_v56 = vrot.slane %v6466_v33, 1  ;;  %v458_v2 = vld [vmem:[%s7065_s17 + $0x18] sm:$0xff]   ;;  %v457_v4 = vld [vmem:[%s7065_s17 + $0x14] sm:$0x1] }
  0x47   : > { %5839 = vmatprep.subr.bf16.mxu0 %v6472_v42  ;;  %v773_v36 = vsel %vm689_vm1, %v768_v25, %v772_v22  ;;  %v779_v37 = vrot.slane %v777_v26, 1  ;;  %v869_v42 = vrot.slane %v5259_v31, 1  ;;  %471 = vst [vmem:[#allocation2 + $0x78] sm:$0xff] %v458_v2   ;;  %v6489_v6 = vld [vmem:[%s8572_s2 + $0x100] sm:$0xff]   ;;  %470 = vst [vmem:[#allocation2 + $0x74] sm:$0x1] %v457_v4 }
  0x48   : > { %2104 = vmatmul.mubr.bf16.gmra.mxu0 %v7016_v41  ;;  %v865_v41 = vsel %vm850_vm0, %v863_v47, %v864_v48  ;;  %v7146_v47 = vld [vmem:[#allocation2 + $0x64] sm:$0xf]  ;;  %v7148_v48 = vcombine.low %v493_v40, %v494_v46  ;;  %v784_v53 = vrot.slane %v782_v38, 1  ;;  %v6490_v11 = vld [vmem:[%s8572_s2 + $0x190] sm:$0xff]   ;;  %v6492_v25 = vld [vmem:[%s8572_s2 + $0x1c8] sm:$0xff]   ;;  %v874_v26 = vsel %vm850_vm0, %v872_v51, %v873_v56 }
  0x49   : > { %2217 = vmatmul.mubr.bf16.gmra.mxu1 %v862_v17  ;;  %2111 = vmatprep.mubr.bf16.mxu0 %v749_v43  ;;  %v6482_v17 = vld [vmem:[%s8572_s2 + $0x198] sm:$0xff]   ;;  %v870_v43 = vrot.slane %v6458_v7, 1  ;;  %v780_v52 = vor.u32 %v779_v37, %v775_v34  ;;  %v7159_v61 = vcombine.low %v532_v44, %v7146_v47  ;;  %v534_v9 = vld [vmem:[#allocation2 + $0x6c] sm:$0xf]  ;;  %v7168_v10 = vld [vmem:[#allocation2 + $0x70] sm:$0xf] }
  0x4a   : > { %2224 = vmatprep.mubr.bf16.mxu1 %v7083_v32  ;;  %5840 = vmatpush3.bf16.msra.mxu0 %v6473_v0  ;;  %v789_v57 = vshll.u32 %v7148_v48, 16  ;;  %v515_v0 = vld [vmem:[#allocation2 + $0x60] sm:$0xe]  ;;  %v495_v12 = vld [vmem:[#allocation2 + $0x6c] sm:$0xf]  ;;  %v7183_v27 = vcombine.low %v534_v9, %v7168_v10 }
  0x4b   : > { %5912 = vmatpush3.bf16.msra.mxu1 %v6482_v17  ;;  %5841 = vmatprep.subr.bf16.mxu0 %v6483_v49  ;;  %v871_v59 = vsel %vm850_vm0, %v869_v42, %v870_v43  ;;  %v785_v7 = vsel %vm689_vm1, %v780_v52, %v784_v53  ;;  %v496_v13 = vld [vmem:[#allocation2 + $0x70] sm:$0xf]  ;;  %v6494_v31 = vld [vmem:[%s8572_s2 + $0x1c0] sm:$0xff]   ;;  %v516_v37 = vld [vmem:[#allocation2 + $0x6c] sm:$0xe] }
  0x4c   : > { %v791_v3 = vrot.slane %v789_v57, 1  ;;  %v7175_v20 = vcombine.low %v495_v12, %v496_v13  ;;  %v6496_v40 = vld [vmem:[%s8572_s2 + $0x180] sm:$0xff]   ;;  %v7203_v43 = vld [vmem:[%s8572_s2 + $0x238] sm:$0xff]   ;;  %v548_v44 = vld [vmem:[#allocation2 + $0xc] sm:$0xe] }
  0x4d   : > { %v559_v51 = vld [vmem:[#allocation2 + $0x18] sm:$0xf]  ;;  %v7210_v56 = vld [vmem:[#allocation2 + $0x1c] sm:$0xf] }
  0x4e   : > { %5842 = vmatpush3.bf16.msra.mxu0 %v6489_v6  ;;  %v801_v24 = vshll.u32 %v7175_v20, 16  ;;  %v6486_v33 = vld [vmem:[#allocation2 + $0x74] ss:$0 sps:$4 sm:$0x11]   ;;  %v799_v35 = vshrl.u32 %v7175_v20, 16  ;;  %v7213_v57 = vcombine.low %v559_v51, %v7210_v56 }
  0x4f   : > { %v806_v38 = vshll.u32 %v6486_v33, 16  ;;  %v536_v39 = vld [vmem:[#allocation2 + $0x78] sm:$0xf]  ;;  %v7198_v42 = vld [vmem:[#allocation2 + $0x7c] sm:$0xf]  ;;  %6269 = vmatprep.subr.bf16.mxu0 %v7203_v43  ;;  %v879_v9 = vrot.slane %v6486_v33, 1 }
  0x50   : > { %2112 = vmatmul.mubr.bf16.gmra.mxu0 %v7041_v63  ;;  %v7136_v63 = vcombine.low %v530_v16, %v7122_v18  ;;  %v5261_v16 = vcombine.low %v515_v0, %v494_v46  ;;  %v7208_v53 = vcombine.low %v536_v39, %v7198_v42  ;;  %v6495_v0 = vld [vmem:[#allocation2 + $0x14] ss:$0 sps:$4 sm:$0x11]   ;;  %v1274_v4 = vshll.u32 %v7213_v57, 16 }
  0x51   : > { %2225 = vmatmul.mubr.bf16.gmra.mxu1 %v865_v41  ;;  %2119 = vmatprep.mubr.bf16.mxu0 %v761_v8  ;;  %v787_v41 = vshrl.u32 %v7148_v48, 16  ;;  %v6476_v8 = vld [vmem:[#allocation2 + $0x68] ss:$0 sps:$4 sm:$0x11]   ;;  %v808_v49 = vrot.slane %v806_v38, 1  ;;  %v989_v33 = vshll.u32 %v6495_v0, 16 }
  0x52   : > { %2232 = vmatprep.mubr.bf16.mxu1 %v7112_v60  ;;  %v794_v15 = vshll.u32 %v6476_v8, 16  ;;  %v876_v17 = vrot.slane %v6476_v8, 1  ;;  %v7247_v51 = vld [vmem:[#allocation2 + $0x38] ss:$0 sps:$4 sm:$0x11]  }
  0x53   : > { %v792_v22 = vor.u32 %v791_v3, %v787_v41  ;;  %v561_v41 = vld [vmem:[#allocation2 + $0x24] sm:$0xf]  ;;  %v1272_v3 = vshrl.u32 %v7213_v57, 16 }
  0x54   : > { %v796_v23 = vrot.slane %v794_v15, 1  ;;  %v984_v15 = vshll.u32 %v6949_v50, 16 }
  0x56   : > { %v797_v34 = vsel %vm689_vm1, %v792_v22, %v796_v23  ;;  %v549_v22 = vld [vmem:[#allocation2 + $0x18] sm:$0xe] }
  0x57   : > { %v5284_v39 = vcombine.low %v549_v22, %v6961_v62  ;;  %v7250_v62 = vld [vmem:[#allocation2 + $0x40] sm:$0xf]  ;;  %v461_v22 = vld [vmem:[%s7065_s17 + $0x24] sm:$0xff]  }
  0x58   : > { %2120 = vmatmul.mubr.bf16.gmra.mxu0 %v7077_v28  ;;  %v6484_v28 = vld [vmem:[%s8572_s2 + $0x1d0] sm:$0xff]   ;;  %474 = vst [vmem:[#allocation2 + $0x84] sm:$0xff] %v461_v22   ;;  %v552_v22 = vld [vmem:[#allocation2 + $0x3c] sm:$0xe] }
  0x59   : > { %2233 = vmatmul.mubr.bf16.gmra.mxu1 %v868_v29  ;;  %2127 = vmatprep.mubr.bf16.mxu0 %v773_v36  ;;  %v875_v29 = vrot.slane %v5261_v16, 1  ;;  %v803_v36 = vrot.slane %v801_v24, 1  ;;  %v1142_v24 = vrot.slane %v6495_v0, 1  ;;  %v550_v0 = vld [vmem:[#allocation2 + $0x24] sm:$0xe] }
  0x5a   : > { %2240 = vmatprep.mubr.bf16.mxu1 %v7136_v63  ;;  %5913 = vmatprep.subr.bf16.mxu1 %v6484_v28  ;;  %v7215_v28 = vld [vmem:[#allocation2 + $0x20] ss:$0 sps:$4 sm:$0x11]  }
  0x5b   : > { %5914 = vmatpush3.bf16.msra.mxu1 %v6490_v11  ;;  %v804_v46 = vor.u32 %v803_v36, %v799_v35  ;;  %v877_v52 = vsel %vm850_vm0, %v875_v29, %v876_v17  ;;  %v1279_v6 = vshll.u32 %v7215_v28, 16  ;;  %v982_v17 = vshrl.u32 %v6949_v50, 16  ;;  %v7238_v35 = vld [vmem:[#allocation2 + $0x34] sm:$0xf] }
  0x5c   : > { %5915 = vmatprep.subr.bf16.mxu1 %v6492_v25  ;;  %v986_v36 = vrot.slane %v984_v15, 1  ;;  %v996_v50 = vshll.u32 %v6967_v1, 16 }
  0x5d   : > { %v809_v2 = vsel %vm689_vm1, %v804_v46, %v808_v49  ;;  %v1281_v12 = vrot.slane %v1279_v6, 1  ;;  %v991_v49 = vrot.slane %v989_v33, 1 }
  0x60   : > { %2128 = vmatmul.mubr.bf16.gmra.mxu0 %v7104_v55  ;;  %v6493_v55 = vld [vmem:[%s8572_s2 + $0x188] sm:$0xff]  }
  0x61   : > { %2241 = vmatmul.mubr.bf16.gmra.mxu1 %v871_v59  ;;  %2135 = vmatprep.mubr.bf16.mxu0 %v785_v7  ;;  %v5283_v59 = vcombine.low %v548_v44, %v6946_v45  ;;  %v7222_v7 = vld [vmem:[#allocation2 + $0x28] sm:$0xf]  ;;  %v1276_v45 = vrot.slane %v1274_v4, 1 }
  0x62   : > { %2248 = vmatprep.mubr.bf16.mxu1 %v7159_v61  ;;  %5916 = vmatpush3.bf16.msra.mxu1 %v6493_v55  ;;  %v7226_v11 = vcombine.low %v561_v41, %v7222_v7  ;;  %v1144_v41 = vrot.slane %v5284_v39, 1 }
  0x63   : > { %5917 = vmatprep.subr.bf16.mxu1 %v6494_v31  ;;  %v1141_v23 = vrot.slane %v5283_v59, 1  ;;  %v1277_v25 = vor.u32 %v1276_v45, %v1272_v3  ;;  %v563_v31 = vld [vmem:[#allocation2 + $0x30] sm:$0xf]  ;;  %v565_v59 = vld [vmem:[#allocation2 + $0x3c] sm:$0xf]  ;;  %v994_v45 = vshrl.u32 %v6967_v1, 16 }
  0x64   : > { %v1286_v16 = vshll.u32 %v7226_v11, 16  ;;  %v1284_v55 = vshrl.u32 %v7226_v11, 16  ;;  %v7241_v38 = vcombine.low %v563_v31, %v7238_v35  ;;  %v7270_v31 = vld [vmem:[#allocation2 + $0x4c] sm:$0xf] }
  0x66   : > { %5918 = vmatpush3.bf16.msra.mxu1 %v6496_v40  ;;  %v1288_v29 = vrot.slane %v1286_v16, 1  ;;  %v1143_v40 = vsel %vm850_vm0, %v1141_v23, %v1142_v24  ;;  %v1296_v4 = vshrl.u32 %v7241_v38, 16  ;;  %v6503_v16 = vld [vmem:[%s8572_s2 + $0x230] sm:$0xff]   ;;  %v5285_v23 = vcombine.low %v550_v0, %v6991_v21 }
  0x68   : > { %2136 = vmatmul.mubr.bf16.gmra.mxu0 %v7124_v19  ;;  %v5262_v19 = vcombine.low %v516_v37, %v496_v13  ;;  %v7229_v13 = vld [vmem:[#allocation2 + $0x2c] ss:$0 sps:$4 sm:$0x11]   ;;  %v6500_v37 = vld [vmem:[#allocation2 + $0x20] ss:$0 sps:$4 sm:$0x11]   ;;  %v1289_v44 = vor.u32 %v1288_v29, %v1284_v55 }
  0x69   : > { %2249 = vmatmul.mubr.bf16.gmra.mxu1 %v874_v26  ;;  %2143 = vmatprep.mubr.bf16.mxu0 %v797_v34  ;;  %v1282_v34 = vsel %vm689_vm1, %v1277_v25, %v1281_v12  ;;  %v998_v12 = vrot.slane %v996_v50, 1  ;;  %v1001_v15 = vshll.u32 %v6500_v37, 16  ;;  %v6504_v25 = vld [vmem:[#allocation2 + $0x2c] ss:$0 sps:$4 sm:$0x11]   ;;  %v1147_v33 = vrot.slane %v5285_v23, 1 }
  0x6a   : > { %2256 = vmatprep.mubr.bf16.mxu1 %v7183_v27  ;;  %v878_v8 = vrot.slane %v5262_v19, 1  ;;  %v987_v19 = vor.u32 %v986_v36, %v982_v17  ;;  %v1008_v17 = vshll.u32 %v7005_v30, 16  ;;  %v6507_v36 = vld [vmem:[%s8572_s2 + $0x228] sm:$0xff]   ;;  %v1018_v23 = vshrl.u32 %v7055_v5, 16 }
  0x6b   : > { %v999_v21 = vor.u32 %v998_v12, %v994_v45  ;;  %v6516_v12 = vld [vmem:[%s8572_s2 + $0x218] sm:$0xff]  }
  0x6c   : > { %v880_v26 = vsel %vm850_vm0, %v878_v8, %v879_v9  ;;  %v7256_v8 = vcombine.low %v565_v59, %v7250_v62  ;;  %v992_v9 = vsel %vm689_vm1, %v987_v19, %v991_v49  ;;  %v1006_v49 = vshrl.u32 %v7005_v30, 16 }
  0x6d   : > { %v1013_v19 = vshll.u32 %v6504_v25, 16 }
  0x6e   : > { %v1310_v29 = vshll.u32 %v7256_v8, 16 }
  0x6f   : > { %v1015_v45 = vrot.slane %v1013_v19, 1 }
  0x70   : > { %2144 = vmatmul.mubr.bf16.gmra.mxu0 %v7148_v48  ;;  %v1291_v48 = vshll.u32 %v7229_v13, 16 }
  0x71   : > { %2257 = vmatmul.mubr.bf16.gmra.mxu1 %v877_v52  ;;  %2151 = vmatprep.mubr.bf16.mxu0 %v809_v2  ;;  %v1298_v52 = vshll.u32 %v7241_v38, 16  ;;  %v1145_v2 = vrot.slane %v6500_v37, 1  ;;  %v551_v37 = vld [vmem:[#allocation2 + $0x30] sm:$0xe] }
  0x72   : > { %2264 = vmatprep.mubr.bf16.mxu1 %v7208_v53  ;;  %v1293_v46 = vrot.slane %v1291_v48, 1  ;;  %v567_v48 = vld [vmem:[#allocation2 + $0x48] sm:$0xf]  ;;  %v5286_v59 = vcombine.low %v551_v37, %v7036_v58  ;;  %v6522_v37 = vld [vmem:[%s8572_s2 + $0x210] sm:$0xff]  }
  0x73   : > { %v1300_v6 = vrot.slane %v1298_v52, 1  ;;  %v1146_v24 = vsel %vm850_vm0, %v1144_v41, %v1145_v2  ;;  %v1010_v52 = vrot.slane %v1008_v17, 1  ;;  %v6508_v41 = vld [vmem:[#allocation2 + $0x38] ss:$0 sps:$4 sm:$0x11]   ;;  %v6511_v2 = vld [vmem:[%s8572_s2 + $0x220] sm:$0xff]  }
  0x74   : > { %v1294_v3 = vsel %vm689_vm1, %v1289_v44, %v1293_v46  ;;  %v1312_v46 = vrot.slane %v1310_v29, 1  ;;  %v553_v17 = vld [vmem:[#allocation2 + $0x48] sm:$0xe] }
  0x75   : > { %v1301_v1 = vor.u32 %v1300_v6, %v1296_v4  ;;  %v7292_v6 = vld [vmem:[#allocation2 + $0x50] ss:$0 sps:$4 sm:$0x11]  }
  0x78   : > { %2152 = vmatmul.mubr.bf16.gmra.mxu0 %v7175_v20  ;;  %v1303_v20 = vshll.u32 %v7247_v51, 16 }
  0x79   : > { %2265 = vmatmul.mubr.bf16.gmra.mxu1 %v880_v26  ;;  %2305 = vmatprep.mubr.bf16.mxu0 %v1143_v40  ;;  %v7267_v26 = vld [vmem:[#allocation2 + $0x44] ss:$0 sps:$4 sm:$0x11]   ;;  %v7279_v40 = vcombine.low %v567_v48, %v7270_v31 }
  0x7a   : > { %2418 = vmatprep.mubr.bf16.mxu1 %v1282_v34  ;;  %v1305_v55 = vrot.slane %v1303_v20, 1  ;;  %v1148_v34 = vrot.slane %v6504_v25, 1  ;;  %v1315_v39 = vshll.u32 %v7267_v26, 16  ;;  %v569_v20 = vld [vmem:[#allocation2 + $0x54] sm:$0xf] }
  0x7b   : > { %v1322_v30 = vshll.u32 %v7279_v40, 16  ;;  %v1320_v29 = vshrl.u32 %v7279_v40, 16 }
  0x7c   : > { %v1306_v44 = vsel %vm689_vm1, %v1301_v1, %v1305_v55  ;;  %v1149_v0 = vsel %vm850_vm0, %v1147_v33, %v1148_v34  ;;  %v1317_v4 = vrot.slane %v1315_v39, 1  ;;  %v6512_v33 = vld [vmem:[#allocation2 + $0x44] ss:$0 sps:$4 sm:$0x11]  }
  0x7d   : > { %v1324_v48 = vrot.slane %v1322_v30, 1  ;;  %v1037_v19 = vshll.u32 %v6512_v33, 16 }
  0x80   : > { %2306 = vmatmul.mubr.bf16.vlgmr.msra.gmra.mxu0 %v992_v9  ;;  %v1011_v9 = vor.u32 %v1010_v52, %v1006_v49 }
  0x81   : > { %2419 = vmatmul.mubr.bf16.vlgmr.msra.gmra.mxu1 %v7213_v57  ;;  %6270 = vmatpush3.bf16.msra.mxu0 %v7203_v43  ;;  %v1003_v57 = vrot.slane %v1001_v15, 1  ;;  %v1308_v43 = vshrl.u32 %v7256_v8, 16  ;;  %v1150_v15 = vrot.slane %v5286_v59, 1  ;;  %v5288_v59 = vcombine.low %v553_v17, %v7102_v54 }
  0x82   : > { %2426 = vmatprep.mubr.bf16.mxu1 %v1294_v3  ;;  %2313 = vmatprep.mubr.bf16.mxu0 %v1146_v24  ;;  %v1020_v3 = vshll.u32 %v7055_v5, 16  ;;  %v1327_v24 = vshll.u32 %v7292_v6, 16  ;;  %v5287_v5 = vcombine.low %v552_v22, %v7067_v14  ;;  %v460_v14 = vld [vmem:[%s7065_s17 + $0x20] sm:$0x1]  ;;  %v1056_v54 = vshll.u32 %v7136_v63, 16 }
  0x83   : > { %6271 = vmatprep.subr.bf16.mxu0 %v6503_v16  ;;  %v1004_v50 = vsel %vm689_vm1, %v999_v21, %v1003_v57  ;;  %v1313_v58 = vor.u32 %v1312_v46, %v1308_v43  ;;  %v1016_v21 = vsel %vm689_vm1, %v1011_v9, %v1015_v45  ;;  %v1025_v57 = vshll.u32 %v6508_v41, 16  ;;  %v571_v46 = vld [vmem:[#allocation2 + $0x60] sm:$0xf]  ;;  %473 = vst [vmem:[#allocation2 + $0x80] sm:$0x1] %v460_v14 }
  0x84   : > { %v1022_v1 = vrot.slane %v1020_v3, 1  ;;  %v1329_v39 = vrot.slane %v1327_v24, 1  ;;  %v1325_v43 = vor.u32 %v1324_v48, %v1320_v29  ;;  %v6526_v3 = vld [vmem:[%s8572_s2 + $0x208] sm:$0xff]   ;;  %v1044_v9 = vshll.u32 %v7112_v60, 16  ;;  %v7332_v45 = vld [vmem:[#allocation2 + $0x54] sm:$0xe] }
  0x85   : > { %6272 = vmatpush3.bf16.msra.mxu0 %v6503_v16  ;;  %v1151_v16 = vrot.slane %v6508_v41, 1  ;;  %v1318_v55 = vsel %vm689_vm1, %v1313_v58, %v1317_v4  ;;  %v1027_v52 = vrot.slane %v1025_v57, 1  ;;  %v1154_v41 = vrot.slane %v6512_v33, 1  ;;  %v590_v57 = vld [vmem:[#allocation2 + $0x24] sm:$0xe] }
  0x86   : > { %6273 = vmatprep.subr.bf16.mxu0 %v6507_v36  ;;  %v1023_v49 = vor.u32 %v1022_v1, %v1018_v23  ;;  %v1030_v23 = vshrl.u32 %v7083_v32, 16  ;;  %v1039_v1 = vrot.slane %v1037_v19, 1  ;;  %v1156_v48 = vrot.slane %v5288_v59, 1 }
  0x87   : > { %v1152_v34 = vsel %vm850_vm0, %v1150_v15, %v1151_v16  ;;  %v6515_v15 = vld [vmem:[#allocation2 + $0x50] ss:$0 sps:$4 sm:$0x11]   ;;  %v6530_v16 = vld [vmem:[%s8572_s2 + $0x200] sm:$0xff]   ;;  %v5289_v14 = vcombine.low %v7332_v45, %v7122_v18  ;;  %v1046_v45 = vrot.slane %v1044_v9, 1 }
  0x88   : > { %2314 = vmatmul.mubr.bf16.gmra.mxu0 %v1004_v50  ;;  %v7317_v50 = vld [vmem:[#allocation2 + $0x64] sm:$0xf]  ;;  %v1028_v22 = vsel %vm689_vm1, %v1023_v49, %v1027_v52  ;;  %v573_v49 = vld [vmem:[#allocation2 + $0x6c] sm:$0xf]  ;;  %v7352_v52 = vld [vmem:[#allocation2 + $0x70] sm:$0xf] }
  0x89   : > { %2427 = vmatmul.mubr.bf16.gmra.mxu1 %v7226_v11  ;;  %v7295_v11 = vld [vmem:[#allocation2 + $0x58] sm:$0xf]  ;;  %2321 = vmatprep.mubr.bf16.mxu0 %v1149_v0  ;;  %v1153_v0 = vrot.slane %v5287_v5, 1  ;;  %v7328_v58 = vcombine.low %v571_v46, %v7317_v50 }
  0x8a   : > { %2434 = vmatprep.mubr.bf16.mxu1 %v1306_v44  ;;  %6274 = vmatpush3.bf16.msra.mxu0 %v6507_v36  ;;  %v7303_v25 = vcombine.low %v569_v20, %v7295_v11  ;;  %v7311_v36 = vld [vmem:[#allocation2 + $0x5c] ss:$0 sps:$4 sm:$0x11]   ;;  %v463_v20 = vld [vmem:[%s7065_s17 + $0x2c] sm:$0x1] }
  0x8b   : > { %6275 = vmatprep.subr.bf16.mxu0 %v6511_v2  ;;  %476 = vst [vmem:[#allocation2 + $0x8c] sm:$0x1] %v463_v20  ;;  %v1155_v29 = vsel %vm850_vm0, %v1153_v0, %v1154_v41  ;;  %v1346_v5 = vshll.u32 %v7328_v58, 16  ;;  %v1042_v20 = vshrl.u32 %v7112_v60, 16  ;;  %v1444_v60 = vrot.slane %v7292_v6, 1 }
  0x8c   : > { %v1334_v44 = vshll.u32 %v7303_v25, 16  ;;  %v1332_v4 = vshrl.u32 %v7303_v25, 16 }
  0x8d   : > { %v1348_v0 = vrot.slane %v1346_v5, 1  ;;  %v7387_v5 = vld [vmem:[#allocation2 + $0x7c] sm:$0xf] }
  0x8e   : > { %6276 = vmatpush3.bf16.msra.mxu0 %v6511_v2  ;;  %v1339_v2 = vshll.u32 %v7311_v36, 16  ;;  %v1336_v30 = vrot.slane %v1334_v44, 1  ;;  %v592_v44 = vld [vmem:[#allocation2 + $0x3c] sm:$0xe] }
  0x8f   : > { %6277 = vmatprep.subr.bf16.mxu0 %v6516_v12 }
  0x90   : > { %2322 = vmatmul.mubr.bf16.gmra.mxu0 %v1016_v21  ;;  %v1341_v17 = vrot.slane %v1339_v2, 1  ;;  %v589_v21 = vld [vmem:[#allocation2 + $0x18] sm:$0xe]  ;;  %v1337_v33 = vor.u32 %v1336_v30, %v1332_v4  ;;  %v7360_v2 = vcombine.low %v573_v49, %v7352_v52  ;;  %v1438_v4 = vrot.slane %v7247_v51, 1  ;;  %v593_v30 = vld [vmem:[#allocation2 + $0x48] sm:$0xe] }
  0x91   : > { %2435 = vmatmul.mubr.bf16.gmra.mxu1 %v7241_v38  ;;  %v1032_v38 = vshll.u32 %v7083_v32, 16  ;;  %2329 = vmatprep.mubr.bf16.mxu0 %v1152_v34  ;;  %v5313_v32 = vcombine.low %v589_v21, %v7210_v56  ;;  %v5314_v34 = vcombine.low %v590_v57, %v7222_v7  ;;  %v5316_v56 = vcombine.low %v592_v44, %v7250_v62 }
  0x92   : > { %2442 = vmatprep.mubr.bf16.mxu1 %v1318_v55  ;;  %6278 = vmatpush3.bf16.msra.mxu0 %v6516_v12  ;;  %v1330_v12 = vsel %vm689_vm1, %v1325_v43, %v1329_v39  ;;  %v7341_v55 = vld [vmem:[#allocation2 + $0x68] ss:$0 sps:$4 sm:$0x11]   ;;  %v591_v39 = vld [vmem:[#allocation2 + $0x30] sm:$0xe]  ;;  %v1432_v43 = vrot.slane %v7215_v28, 1 }
  0x93   : > { %6279 = vmatprep.subr.bf16.mxu0 %v6522_v37  ;;  %v1034_v24 = vrot.slane %v1032_v38, 1  ;;  %v5315_v46 = vcombine.low %v591_v39, %v7238_v35  ;;  %v1344_v7 = vshrl.u32 %v7328_v58, 16  ;;  %v1431_v19 = vrot.slane %v5313_v32, 1 }
  0x94   : > { %v1434_v59 = vrot.slane %v5314_v34, 1  ;;  %v1435_v28 = vrot.slane %v7229_v13, 1  ;;  %v1342_v35 = vsel %vm689_vm1, %v1337_v33, %v1341_v17  ;;  %v1351_v18 = vshll.u32 %v7341_v55, 16  ;;  %v575_v33 = vld [vmem:[#allocation2 + $0x78] sm:$0xf] }
  0x95   : > { %v1035_v38 = vor.u32 %v1034_v24, %v1030_v23  ;;  %v1437_v41 = vrot.slane %v5315_v46, 1  ;;  %v6519_v24 = vld [vmem:[#allocation2 + $0x5c] ss:$0 sps:$4 sm:$0x11]   ;;  %v1441_v51 = vrot.slane %v7267_v26, 1  ;;  %v1447_v57 = vrot.slane %v7311_v36, 1 }
  0x96   : > { %6280 = vmatpush3.bf16.msra.mxu0 %v6522_v37  ;;  %v1157_v37 = vrot.slane %v6515_v15, 1  ;;  %v7366_v62 = vsel %vm850_vm0, %v1434_v59, %v1435_v28  ;;  %v1353_v17 = vrot.slane %v1351_v18, 1  ;;  %v1047_v26 = vor.u32 %v1046_v45, %v1042_v20  ;;  %v555_v34 = vld [vmem:[#allocation2 + $0x60] sm:$0xe] }
  0x97   : > { %6281 = vmatprep.subr.bf16.mxu0 %v6526_v3  ;;  %v1040_v13 = vsel %vm689_vm1, %v1035_v38, %v1039_v1  ;;  %v5317_v1 = vcombine.low %v593_v30, %v7270_v31  ;;  %v1159_v32 = vrot.slane %v5289_v14, 1  ;;  %v1356_v39 = vshrl.u32 %v7360_v2, 16  ;;  %v6523_v59 = vld [vmem:[#allocation2 + $0x68] ss:$0 sps:$4 sm:$0x11]  }
  0x98   : > { %2330 = vmatmul.mubr.bf16.gmra.mxu0 %v1028_v22  ;;  %v1158_v22 = vsel %vm850_vm0, %v1156_v48, %v1157_v37  ;;  %v1358_v48 = vshll.u32 %v7360_v2, 16  ;;  %v7399_v46 = vcombine.low %v575_v33, %v7387_v5  ;;  %v1054_v38 = vshrl.u32 %v7136_v63, 16 }
  0x99   : > { %2443 = vmatmul.mubr.bf16.gmra.mxu1 %v7256_v8  ;;  %v1049_v8 = vshll.u32 %v6515_v15, 16  ;;  %2337 = vmatprep.mubr.bf16.mxu0 %v1155_v29  ;;  %v594_v15 = vld [vmem:[#allocation2 + $0x54] sm:$0xe]  ;;  %v7374_v29 = vsel %vm850_vm0, %v1437_v41, %v1438_v4  ;;  %v1443_v31 = vrot.slane %v5317_v1, 1  ;;  %v1058_v49 = vrot.slane %v1056_v54, 1 }
  0x9a   : > { %2450 = vmatprep.mubr.bf16.mxu1 %v1330_v12  ;;  %6282 = vmatpush3.bf16.msra.mxu0 %v6526_v3  ;;  %v7363_v3 = vsel %vm850_vm0, %v1431_v19, %v1432_v43  ;;  %v1440_v12 = vrot.slane %v5316_v56, 1  ;;  %v5318_v9 = vcombine.low %v594_v15, %v7295_v11  ;;  %v1160_v11 = vrot.slane %v6519_v24, 1  ;;  %v577_v4 = vld [vmem:[#allocation2 + $0x84] sm:$0xf] }
  0x9b   : > { %6283 = vmatprep.subr.bf16.mxu0 %v6530_v16  ;;  %v1051_v23 = vrot.slane %v1049_v8, 1  ;;  %v7391_v44 = vsel %vm850_vm0, %v1443_v31, %v1444_v60  ;;  %v1360_v8 = vrot.slane %v1358_v48, 1  ;;  %v1061_v56 = vshll.u32 %v6519_v24, 16 }
  0x9c   : > { %v7384_v21 = vsel %vm850_vm0, %v1440_v12, %v1441_v51  ;;  %v1446_v6 = vrot.slane %v5318_v9, 1  ;;  %v1161_v19 = vsel %vm850_vm0, %v1159_v32, %v1160_v11  ;;  %v1370_v18 = vshll.u32 %v7399_v46, 16  ;;  %v6527_v9 = vld [vmem:[#allocation2 + $0x74] ss:$0 sps:$4 sm:$0x11]  }
  0x9d   : > { %v1052_v14 = vsel %vm689_vm1, %v1047_v26, %v1051_v23  ;;  %v1361_v28 = vor.u32 %v1360_v8, %v1356_v39  ;;  %v1068_v41 = vshll.u32 %v7159_v61, 16  ;;  %v1059_v63 = vor.u32 %v1058_v49, %v1054_v38 }
  0x9e   : > { %6284 = vmatpush3.bf16.msra.mxu0 %v6530_v16  ;;  %v1349_v16 = vor.u32 %v1348_v0, %v1344_v7  ;;  %v7394_v37 = vsel %vm850_vm0, %v1446_v6, %v1447_v57  ;;  %v5290_v7 = vcombine.low %v555_v34, %v7146_v47  ;;  %v7408_v0 = vld [vmem:[#allocation2 + $0x80] ss:$0 sps:$4 sm:$0x11]   ;;  %v1063_v54 = vrot.slane %v1061_v56, 1  ;;  %v7412_v47 = vld [vmem:[#allocation2 + $0x88] sm:$0xf] }
  0x9f   : > { %v1163_v30 = vrot.slane %v6523_v59, 1  ;;  %v1368_v20 = vshrl.u32 %v7399_v46, 16  ;;  %v1372_v12 = vrot.slane %v1370_v18, 1  ;;  %v1375_v15 = vshll.u32 %v7408_v0, 16 }
  0xa0   : > { %2338 = vmatmul.mubr.bf16.gmra.mxu0 %v1040_v13  ;;  %v1354_v36 = vsel %vm689_vm1, %v1349_v16, %v1353_v17  ;;  %v556_v13 = vld [vmem:[#allocation2 + $0x6c] sm:$0xe]  ;;  %v1064_v23 = vsel %vm689_vm1, %v1059_v63, %v1063_v54  ;;  %v1066_v24 = vshrl.u32 %v7159_v61, 16  ;;  %v1070_v51 = vrot.slane %v1068_v41, 1 }
  0xa1   : > { %2451 = vmatmul.mubr.bf16.gmra.mxu1 %v7279_v40  ;;  %v7380_v40 = vld [vmem:[#allocation2 + $0x74] ss:$0 sps:$4 sm:$0x11]   ;;  %2345 = vmatprep.mubr.bf16.mxu0 %v1158_v22  ;;  %v5302_v22 = vcombine.low %v577_v4, %v7412_v47  ;;  %v1073_v17 = vshll.u32 %v6523_v59, 16  ;;  %v5291_v1 = vcombine.low %v556_v13, %v7168_v10  ;;  %v1373_v16 = vor.u32 %v1372_v12, %v1368_v20  ;;  %v557_v10 = vld [vmem:[#allocation2 + $0x78] sm:$0xe] }
  0xa2   : > { %2458 = vmatprep.mubr.bf16.mxu1 %v1342_v35  ;;  %v1363_v43 = vshll.u32 %v7380_v40, 16  ;;  %v1377_v48 = vrot.slane %v1375_v15, 1  ;;  %v7423_v57 = vld [vmem:[#allocation2 + $0x8c] ss:$0 sps:$4 sm:$0x11]   ;;  %v1080_v33 = vshll.u32 %v7183_v27, 16  ;;  %v1071_v61 = vor.u32 %v1070_v51, %v1066_v24 }
  0xa3   : > { %v1382_v26 = vshll.u32 %v5302_v22, 16  ;;  %v1075_v31 = vrot.slane %v1073_v17, 1  ;;  %v1165_v6 = vrot.slane %v5291_v1, 1  ;;  %v1166_v32 = vrot.slane %v6527_v9, 1  ;;  %v596_v12 = vld [vmem:[#allocation2 + $0x6c] sm:$0xe] }
  0xa4   : > { %v1365_v35 = vrot.slane %v1363_v43, 1  ;;  %v1380_v11 = vshrl.u32 %v5302_v22, 16  ;;  %v1387_v39 = vshll.u32 %v7423_v57, 16  ;;  %v1078_v8 = vshrl.u32 %v7183_v27, 16  ;;  %v597_v15 = vld [vmem:[#allocation2 + $0x78] sm:$0xe] }
  0xa5   : > { %v1384_v34 = vrot.slane %v1382_v26, 1  ;;  %v1082_v43 = vrot.slane %v1080_v33, 1  ;;  %v5292_v38 = vcombine.low %v557_v10, %v7198_v42  ;;  %v1167_v49 = vsel %vm850_vm0, %v1165_v6, %v1166_v32  ;;  %v6531_v56 = vld [vmem:[#allocation2 + $0x80] ss:$0 sps:$4 sm:$0x11]  }
  0xa6   : > { %v1366_v45 = vsel %vm689_vm1, %v1361_v28, %v1365_v35  ;;  %v1092_v59 = vshll.u32 %v7208_v53, 16  ;;  %v1169_v27 = vrot.slane %v6531_v56, 1  ;;  %v1097_v54 = vshll.u32 %v6531_v56, 16 }
  0xa7   : > { %v1083_v28 = vor.u32 %v1082_v43, %v1078_v8  ;;  %v1168_v18 = vrot.slane %v5292_v38, 1 }
  0xa8   : > { %2346 = vmatmul.mubr.bf16.gmra.mxu0 %v1052_v14  ;;  %v1085_v14 = vshll.u32 %v6527_v9, 16  ;;  %v1094_v63 = vrot.slane %v1092_v59, 1 }
  0xa9   : > { %2459 = vmatmul.mubr.bf16.gmra.mxu1 %v7303_v25  ;;  %2353 = vmatprep.mubr.bf16.mxu0 %v1161_v19  ;;  %v1162_v25 = vrot.slane %v5290_v7, 1  ;;  %v1385_v7 = vor.u32 %v1384_v34, %v1380_v11  ;;  %v1389_v19 = vrot.slane %v1387_v39, 1  ;;  %v1170_v4 = vsel %vm850_vm0, %v1168_v18, %v1169_v27 }
  0xaa   : > { %2466 = vmatprep.mubr.bf16.mxu1 %v1354_v36  ;;  %v1076_v36 = vsel %vm689_vm1, %v1071_v61, %v1075_v31  ;;  %v1087_v35 = vrot.slane %v1085_v14, 1 }
  0xab   : > { %v1164_v60 = vsel %vm850_vm0, %v1162_v25, %v1163_v30  ;;  %v1390_v41 = vsel %vm689_vm1, %v1385_v7, %v1389_v19  ;;  %v1099_v30 = vrot.slane %v1097_v54, 1 }
  0xac   : > { %v1088_v42 = vsel %vm689_vm1, %v1083_v28, %v1087_v35 }
  0xb0   : > { %2354 = vmatmul.mubr.bf16.gmra.mxu0 %v1064_v23  ;;  %v598_v23 = vld [vmem:[#allocation2 + $0x84] sm:$0xe] }
  0xb1   : > { %2467 = vmatmul.mubr.bf16.gmra.mxu1 %v7328_v58  ;;  %2361 = vmatprep.mubr.bf16.mxu0 %v1164_v60  ;;  %v1378_v58 = vsel %vm689_vm1, %v1373_v16, %v1377_v48  ;;  %v5322_v24 = vcombine.low %v598_v23, %v7412_v47 }
  0xb2   : > { %2474 = vmatprep.mubr.bf16.mxu1 %v1366_v45  ;;  %v1450_v45 = vrot.slane %v7341_v55, 1 }
  0xb3   : > { %v1458_v51 = vrot.slane %v5322_v24, 1 }
  0xb8   : > { %2362 = vmatmul.mubr.bf16.gmra.mxu0 %v1076_v36 }
  0xb9   : > { %2475 = vmatmul.mubr.bf16.gmra.mxu1 %v7360_v2  ;;  %2369 = vmatprep.mubr.bf16.mxu0 %v1167_v49  ;;  %v1090_v2 = vshrl.u32 %v7208_v53, 16  ;;  %v595_v53 = vld [vmem:[#allocation2 + $0x60] sm:$0xe] }
  0xba   : > { %2482 = vmatprep.mubr.bf16.mxu1 %v1378_v58 }
  0xbb   : > { %v1095_v25 = vor.u32 %v1094_v63, %v1090_v2 }
  0xbd   : > { %v1100_v13 = vsel %vm689_vm1, %v1095_v25, %v1099_v30 }
  0xc0   : > { %2370 = vmatmul.mubr.bf16.gmra.mxu0 %v1088_v42 }
  0xc1   : > { %2483 = vmatmul.mubr.bf16.gmra.mxu1 %v7399_v46  ;;  %2377 = vmatprep.mubr.bf16.mxu0 %v1170_v4  ;;  %v5319_v46 = vcombine.low %v595_v53, %v7317_v50  ;;  %v1453_v50 = vrot.slane %v7380_v40, 1 }
  0xc2   : > { %2490 = vmatprep.mubr.bf16.mxu1 %v1390_v41 }
  0xc3   : > { %v1449_v20 = vrot.slane %v5319_v46, 1 }
  0xc8   : > { %2378 = vmatmul.mubr.bf16.gmra.mxu0 %v1100_v13 }
  0xc9   : > { %2491 = vmatmul.mubr.bf16.gmra.mxu1 %v5302_v22  ;;  %6285 = vmatprep.mubr.bf16.mxu0 %v7363_v3  ;;  %v5320_v22 = vcombine.low %v596_v12, %v7352_v52  ;;  %v1451_v3 = vsel %vm850_vm0, %v1449_v20, %v1450_v45 }
  0xd0   : > { %6286 = vmatmul.mubr.bf16.vlgmr.msra.gmra.mxu0 %v7366_v62  ;;  %v5321_v62 = vcombine.low %v597_v15, %v7387_v5  ;;  %v1459_v5 = vrot.slane %v7423_v57, 1 }
  0xd1   : > { %6289 = vmatprep.mubr.bf16.mxu0 %v7374_v29  ;;  %v1452_v29 = vrot.slane %v5320_v22, 1 }
  0xd3   : > { %v1454_v55 = vsel %vm850_vm0, %v1452_v29, %v1453_v50 }
  0xd8   : > { %6290 = vmatmul.mubr.bf16.gmra.mxu0 %v7384_v21  ;;  %v1455_v21 = vrot.slane %v5321_v62, 1 }
  0xd9   : > { %6293 = vmatprep.mubr.bf16.mxu0 %v7391_v44  ;;  %v1456_v44 = vrot.slane %v7408_v0, 1 }
  0xdb   : > { %v1457_v52 = vsel %vm850_vm0, %v1455_v21, %v1456_v44 }
  0xe0   : > { %6294 = vmatmul.mubr.bf16.gmra.mxu0 %v7394_v37  ;;  %v1460_v37 = vsel %vm850_vm0, %v1458_v51, %v1459_v5 }
  0xe1   : > { %6297 = vmatprep.mubr.bf16.mxu0 %v1451_v3 }
  0xe8   : > { %6298 = vmatmul.mubr.bf16.gmra.mxu0 %v1454_v55 }
  0xe9   : > { %6301 = vmatprep.mubr.bf16.mxu0 %v1457_v52 }
  0xf0   : > { %v5691_v1 = vpop.f32.mrf.mxu0  ;;  %6302 = vmatmul.mubr.bf16.gmra.mxu0 %v1460_v37 }
  0xf1   : > { %v5767_v17 = vpop.f32.mrf.mxu1 }
  0xf2   : > { %v5692_v0 = vpop.f32.mrf.mxu0 }
  0xf3   : > { %v5768_v40 = vpop.f32.mrf.mxu1  ;;  %v5693_v16 = vadd.f32 %v5692_v0, %v5691_v1 }
  0xf4   : > { %v5769_v60 = vadd.f32 %v5768_v40, %v5767_v17  ;;  %v5694_v48 = vpop.f32.mrf.mxu0 }
  0xf5   : > { %v5770_v9 = vpop.f32.mrf.mxu1 }
  0xf6   : > { %v7458_v47 = vadd.f32 %v5769_v60, %v5693_v16  ;;  %v5695_v61 = vpop.f32.mrf.mxu0 }
  0xf7   : > { %v5771_v26 = vpop.f32.mrf.mxu1  ;;  %v5696_v6 = vadd.f32 %v5695_v61, %v5694_v48 }
  0xf8   : > { %v5772_v33 = vadd.f32 %v5771_v26, %v5770_v9  ;;  %v5697_v32 = vpop.f32.mrf.mxu0 }
  0xf9   : > { %v5773_v31 = vpop.f32.mrf.mxu1 }
  0xfa   : > { %v7460_v10 = vadd.f32 %v5772_v33, %v5696_v6  ;;  %v5698_v11 = vpop.f32.mrf.mxu0 }
  0xfb   : > { %v5774_v57 = vpop.f32.mrf.mxu1  ;;  %v5699_v39 = vadd.f32 %v5698_v11, %v5697_v32 }
  0xfc   : > { %v5775_v58 = vadd.f32 %v5774_v57, %v5773_v31  ;;  %v5700_v36 = vpop.f32.mrf.mxu0 }
  0xfd   : > { %v5776_v34 = vpop.f32.mrf.mxu1 }
  0xfe   : > { %v7462_v43 = vadd.f32 %v5775_v58, %v5699_v39  ;;  %v5701_v38 = vpop.f32.mrf.mxu0 }
  0xff   : > { %v5777_v8 = vpop.f32.mrf.mxu1  ;;  %v5702_v56 = vadd.f32 %v5701_v38, %v5700_v36 }
 0x100   : > { %v5778_v14 = vadd.f32 %v5777_v8, %v5776_v34  ;;  %v5703_v7 = vpop.f32.mrf.mxu0 }
 0x101   : > { %v5779_v49 = vpop.f32.mrf.mxu1 }
 0x102   : > { %v7464_v59 = vadd.f32 %v5778_v14, %v5702_v56  ;;  %v5704_v35 = vpop.f32.mrf.mxu0 }
 0x103   : > { %v5780_v19 = vpop.f32.mrf.mxu1  ;;  %v5705_v27 = vadd.f32 %v5704_v35, %v5703_v7 }
 0x104   : > { %v5781_v28 = vadd.f32 %v5780_v19, %v5779_v49  ;;  %v5706_v41 = vpop.f32.mrf.mxu0 }
 0x105   : > { %v5782_v18 = vpop.f32.mrf.mxu1 }
 0x106   : > { %v7466_v2 = vadd.f32 %v5781_v28, %v5705_v27  ;;  %v5707_v54 = vpop.f32.mrf.mxu0 }
 0x107   : > { %v5783_v42 = vpop.f32.mrf.mxu1  ;;  %v5708_v25 = vadd.f32 %v5707_v54, %v5706_v41 }
 0x108   : > { %v5784_v63 = vadd.f32 %v5783_v42, %v5782_v18  ;;  %v5709_v30 = vpop.f32.mrf.mxu0 }
 0x109   : > { %v5785_v4 = vpop.f32.mrf.mxu1 }
 0x10a   : > { %v7468_v53 = vadd.f32 %v5784_v63, %v5708_v25  ;;  %v5710_v20 = vpop.f32.mrf.mxu0 }
 0x10b   : > { %v5786_v13 = vpop.f32.mrf.mxu1  ;;  %v5711_v12 = vadd.f32 %v5710_v20, %v5709_v30 }
 0x10c   : > { %v5787_v46 = vadd.f32 %v5786_v13, %v5785_v4  ;;  %v5712_v15 = vpop.f32.mrf.mxu0 }
 0x10d   : > { %v5788_v45 = vpop.f32.mrf.mxu1 }
 0x10e   : > { %v7470_v3 = vadd.f32 %v5787_v46, %v5711_v12  ;;  %v5713_v29 = vpop.f32.mrf.mxu0 }
 0x10f   : > { %v5789_v22 = vpop.f32.mrf.mxu1  ;;  %v5714_v21 = vadd.f32 %v5713_v29, %v5712_v15 }
 0x110   : > { %v5790_v62 = vadd.f32 %v5789_v22, %v5788_v45  ;;  %v5715_v44 = vpop.f32.mrf.mxu0 }
 0x111   : > { %v5791_v50 = vpop.f32.mrf.mxu1 }
 0x112   : > { %v7472_v55 = vadd.f32 %v5790_v62, %v5714_v21  ;;  %v5716_v52 = vpop.f32.mrf.mxu0 }
 0x113   : > { %v5792_v23 = vpop.f32.mrf.mxu1  ;;  %v5717_v5 = vadd.f32 %v5716_v52, %v5715_v44 }
 0x114   : > { %v5793_v24 = vadd.f32 %v5792_v23, %v5791_v50  ;;  %v5718_v37 = vpop.f32.mrf.mxu0 }
 0x115   : > { %v5794_v51 = vpop.f32.mrf.mxu1 }
 0x116   : > { %v7474_v1 = vadd.f32 %v5793_v24, %v5717_v5  ;;  %v5719_v60 = vpop.f32.mrf.mxu0 }
 0x117   : > { %v5795_v17 = vpop.f32.mrf.mxu1  ;;  %v5720_v9 = vadd.f32 %v5719_v60, %v5718_v37 }
 0x118   : > { %v5796_v40 = vadd.f32 %v5795_v17, %v5794_v51  ;;  %v5721_v16 = vpop.f32.mrf.mxu0 }
 0x119   : > { %v5797_v0 = vpop.f32.mrf.mxu1 }
 0x11a   : > { %v7476_v26 = vadd.f32 %v5796_v40, %v5720_v9  ;;  %v5722_v61 = vpop.f32.mrf.mxu0 }
 0x11b   : > { %v5798_v48 = vpop.f32.mrf.mxu1  ;;  %v5723_v6 = vadd.f32 %v5722_v61, %v5721_v16 }
 0x11c   : > { %v5799_v33 = vadd.f32 %v5798_v48, %v5797_v0  ;;  %v5724_v32 = vpop.f32.mrf.mxu0 }
 0x11d   : > { %v5800_v31 = vpop.f32.mrf.mxu1 }
 0x11e   : > { %v7478_v58 = vadd.f32 %v5799_v33, %v5723_v6  ;;  %v5725_v34 = vpop.f32.mrf.mxu0 }
 0x11f   : > { %v5801_v57 = vpop.f32.mrf.mxu1  ;;  %v5726_v36 = vadd.f32 %v5725_v34, %v5724_v32 }
 0x120   : > { %v5802_v11 = vadd.f32 %v5801_v57, %v5800_v31  ;;  %v5727_v8 = vpop.f32.mrf.mxu0 }
 0x121   : > { %v5803_v39 = vpop.f32.mrf.mxu1 }
 0x122   : > { %v7480_v38 = vadd.f32 %v5802_v11, %v5726_v36  ;;  %v5728_v56 = vpop.f32.mrf.mxu0 }
 0x123   : > { %v5804_v14 = vpop.f32.mrf.mxu1  ;;  %v5729_v19 = vadd.f32 %v5728_v56, %v5727_v8 }
 0x124   : > { %v5805_v49 = vadd.f32 %v5804_v14, %v5803_v39  ;;  %v5730_v28 = vpop.f32.mrf.mxu0 }
 0x125   : > { %v5806_v7 = vpop.f32.mrf.mxu1 }
 0x126   : > { %v7482_v18 = vadd.f32 %v5805_v49, %v5729_v19  ;;  %v5731_v41 = vpop.f32.mrf.mxu0 }
 0x127   : > { %v5807_v35 = vpop.f32.mrf.mxu1  ;;  %v5732_v63 = vadd.f32 %v5731_v41, %v5730_v28 }
 0x128   : > { %v5808_v27 = vadd.f32 %v5807_v35, %v5806_v7  ;;  %v5733_v54 = vpop.f32.mrf.mxu0 }
 0x129   : > { %v5809_v42 = vpop.f32.mrf.mxu1 }
 0x12a   : > { %v7484_v25 = vadd.f32 %v5808_v27, %v5732_v63  ;;  %v5734_v13 = vpop.f32.mrf.mxu0 }
 0x12b   : > { %v5810_v4 = vpop.f32.mrf.mxu1  ;;  %v5735_v20 = vadd.f32 %v5734_v13, %v5733_v54 }
 0x12c   : > { %v5811_v30 = vadd.f32 %v5810_v4, %v5809_v42  ;;  %v5736_v45 = vpop.f32.mrf.mxu0 }
 0x12d   : > { %v5812_v46 = vpop.f32.mrf.mxu1 }
 0x12e   : > { %v7486_v15 = vadd.f32 %v5811_v30, %v5735_v20  ;;  %v5737_v62 = vpop.f32.mrf.mxu0 }
 0x12f   : > { %v5813_v12 = vpop.f32.mrf.mxu1  ;;  %v5738_v50 = vadd.f32 %v5737_v62, %v5736_v45 }
 0x130   : > { %8580 = vst [vmem:[#allocation4_spill] sm:$0xff] %v7486_v15  ;;  %v5814_v22 = vadd.f32 %v5813_v12, %v5812_v46  ;;  %v5739_v21 = vpop.f32.mrf.mxu0 }
 0x131   : > { %v5815_v29 = vpop.f32.mrf.mxu1 }
 0x132   : > { %v7488_v23 = vadd.f32 %v5814_v22, %v5738_v50  ;;  %v5740_v52 = vpop.f32.mrf.mxu0 }
 0x133   : > { %v5816_v44 = vpop.f32.mrf.mxu1  ;;  %v5741_v5 = vadd.f32 %v5740_v52, %v5739_v21 }
 0x134   : > { %8581 = vst [vmem:[#allocation5_spill] sm:$0xff] %v7488_v23  ;;  %v5817_v24 = vadd.f32 %v5816_v44, %v5815_v29  ;;  %v5742_v37 = vpop.f32.mrf.mxu0 }
 0x135   : > { %v5818_v51 = vpop.f32.mrf.mxu1 }
 0x136   : > { %v7490_v40 = vadd.f32 %v5817_v24, %v5741_v5  ;;  %v5743_v0 = vpop.f32.mrf.mxu0 }
 0x137   : > { %v5819_v17 = vpop.f32.mrf.mxu1  ;;  %v5744_v16 = vadd.f32 %v5743_v0, %v5742_v37 }
 0x138   : > { %8582 = vst [vmem:[#allocation6_spill] sm:$0xff] %v7490_v40  ;;  %v5820_v60 = vadd.f32 %v5819_v17, %v5818_v51  ;;  %v5745_v48 = vpop.f32.mrf.mxu0 }
 0x139   : > { %v5821_v9 = vpop.f32.mrf.mxu1 }
 0x13a   : > { %v7492_v61 = vadd.f32 %v5820_v60, %v5744_v16  ;;  %v5746_v6 = vpop.f32.mrf.mxu0 }
 0x13b   : > { %v5822_v33 = vpop.f32.mrf.mxu1  ;;  %v5747_v57 = vadd.f32 %v5746_v6, %v5745_v48 }
 0x13c   : > { %8583 = vst [vmem:[#allocation7_spill] sm:$0xff] %v7492_v61  ;;  %v5823_v31 = vadd.f32 %v5822_v33, %v5821_v9  ;;  %v5748_v11 = vpop.f32.mrf.mxu0 }
 0x13d   : > { %v5824_v32 = vpop.f32.mrf.mxu1 }
 0x13e   : > { %v7494_v39 = vadd.f32 %v5823_v31, %v5747_v57  ;;  %v5749_v8 = vpop.f32.mrf.mxu0 }
 0x13f   : > { %v5825_v34 = vpop.f32.mrf.mxu1  ;;  %v5750_v49 = vadd.f32 %v5749_v8, %v5748_v11 }
 0x140   : > { %8584 = vst [vmem:[#allocation8_spill] sm:$0xff] %v7494_v39  ;;  %v5826_v36 = vadd.f32 %v5825_v34, %v5824_v32  ;;  %v5843_v56 = vpop.f32.mrf.mxu0 }
 0x141   : > { %v7496_v14 = vpop.f32.mrf.mxu1 }
 0x142   : > { %v7500_v19 = vadd.f32 %v5826_v36, %v5750_v49  ;;  %v5844_v28 = vpop.f32.mrf.mxu0 }
 0x143   : > { %v7498_v7 = vpop.f32.mrf.mxu1  ;;  %v5845_v27 = vadd.f32 %v5844_v28, %v5843_v56 }
 0x144   : > { %8585 = vst [vmem:[#allocation9_spill] sm:$0xff] %v7500_v19  ;;  %v5846_v41 = vpop.f32.mrf.mxu0 }
 0x145   : > { %v7502_v35 = vpop.f32.mrf.mxu1  ;;  %v7507_v63 = vadd.f32 %v5845_v27, %v7458_v47 }
 0x146   : > { %v5847_v54 = vpop.f32.mrf.mxu0 }
 0x147   : > { %v7504_v42 = vpop.f32.mrf.mxu1  ;;  %v5848_v30 = vadd.f32 %v5847_v54, %v5846_v41 }
 0x148   : > { %v5849_v13 = vpop.f32.mrf.mxu0 }
 0x149   : > { %v7509_v4 = vpop.f32.mrf.mxu1  ;;  %v7514_v20 = vadd.f32 %v5848_v30, %v7460_v10 }
 0x14a   : > { %v5850_v45 = vpop.f32.mrf.mxu0 }
 0x14b   : > { %v7511_v46 = vpop.f32.mrf.mxu1  ;;  %v5851_v22 = vadd.f32 %v5850_v45, %v5849_v13 }
 0x14c   : > { %v5852_v62 = vpop.f32.mrf.mxu0 }
 0x14d   : > { %v7516_v12 = vpop.f32.mrf.mxu1  ;;  %v7521_v47 = vadd.f32 %v5851_v22, %v7462_v43 }
 0x14e   : > { %v5853_v50 = vpop.f32.mrf.mxu0 }
 0x14f   : > { %v7518_v29 = vpop.f32.mrf.mxu1  ;;  %v5854_v44 = vadd.f32 %v5853_v50, %v5852_v62 }
 0x150   : > { %v5855_v24 = vpop.f32.mrf.mxu0 }
 0x151   : > { %v7523_v21 = vpop.f32.mrf.mxu1  ;;  %v7528_v10 = vadd.f32 %v5854_v44, %v7464_v59 }
 0x152   : > { %v5856_v51 = vpop.f32.mrf.mxu0 }
 0x153   : > { %v7525_v52 = vpop.f32.mrf.mxu1  ;;  %v5857_v37 = vadd.f32 %v5856_v51, %v5855_v24 }
 0x154   : > { %v5858_v17 = vpop.f32.mrf.mxu0 }
 0x155   : > { %v7530_v5 = vpop.f32.mrf.mxu1  ;;  %v7535_v43 = vadd.f32 %v5857_v37, %v7466_v2 }
 0x156   : > { %v5859_v0 = vpop.f32.mrf.mxu0 }
 0x157   : > { %v7532_v60 = vpop.f32.mrf.mxu1  ;;  %v5860_v16 = vadd.f32 %v5859_v0, %v5858_v17 }
 0x158   : > { %v5861_v48 = vpop.f32.mrf.mxu0 }
 0x159   : > { %v7537_v9 = vpop.f32.mrf.mxu1  ;;  %v7542_v59 = vadd.f32 %v5860_v16, %v7468_v53 }
 0x15a   : > { %v5862_v31 = vpop.f32.mrf.mxu0 }
 0x15b   : > { %v7539_v33 = vpop.f32.mrf.mxu1 }
 0x15c   : > { %v5864_v32 = vpop.f32.mrf.mxu0 }
 0x15d   : > { %v7544_v6 = vpop.f32.mrf.mxu1 }
 0x15e   : > { %v5865_v11 = vpop.f32.mrf.mxu0 }
 0x15f   : > { %v7546_v57 = vpop.f32.mrf.mxu1 }
 0x160   : > { %v5867_v2 = vpop.f32.mrf.mxu0 }
 0x161   : > { %v7548_v34 = vpop.f32.mrf.mxu1 }
 0x162   : > { %v5868_v8 = vpop.f32.mrf.mxu0 }
 0x163   : > { %v7550_v36 = vpop.f32.mrf.mxu1  ;;  %v5869_v56 = vadd.f32 %v5868_v8, %v5867_v2 }
 0x164   : > { %v5870_v28 = vpop.f32.mrf.mxu0 }
 0x165   : > { %v7552_v49 = vpop.f32.mrf.mxu1  ;;  %v7555_v53 = vadd.f32 %v5869_v56, %v7474_v1 }
 0x166   : > { %v5871_v41 = vpop.f32.mrf.mxu0 }
 0x167   : > { %v5947_v27 = vpop.f32.mrf.mxu1  ;;  %v5872_v30 = vadd.f32 %v5871_v41, %v5870_v28 }
 0x168   : > { %v5873_v13 = vpop.f32.mrf.mxu0 }
 0x169   : > { %v5949_v54 = vpop.f32.mrf.mxu1  ;;  %v7558_v22 = vadd.f32 %v5872_v30, %v7476_v26 }
 0x16a   : > { %v5874_v62 = vpop.f32.mrf.mxu0 }
 0x16b   : > { %v5950_v45 = vpop.f32.mrf.mxu1 }
 0x16c   : > { %v5876_v44 = vpop.f32.mrf.mxu0 }
 0x16d   : > { %v5952_v50 = vpop.f32.mrf.mxu1 }
 0x16e   : > { %v5877_v51 = vpop.f32.mrf.mxu0 }
 0x16f   : > { %v5953_v24 = vpop.f32.mrf.mxu1 }
 0x170   : > { %v5879_v17 = vpop.f32.mrf.mxu0 }
 0x171   : > { %v7560_v37 = vpop.f32.mrf.mxu1 }
 0x172   : > { %v5880_v1 = vpop.f32.mrf.mxu0 }
 0x173   : > { %v7562_v0 = vpop.f32.mrf.mxu1  ;;  %v5881_v2 = vadd.f32 %v5880_v1, %v5879_v17 }
 0x174   : > { %v5882_v8 = vpop.f32.mrf.mxu0 }
 0x175   : > { %v7564_v16 = vpop.f32.mrf.mxu1  ;;  %v7569_v26 = vadd.f32 %v5881_v2, %v7482_v18 }
 0x176   : > { %8586 = vst [vmem:[#allocation10_spill] sm:$0xff] %v7564_v16  ;;  %v5883_v28 = vpop.f32.mrf.mxu0 }
 0x177   : > { %v7566_v56 = vpop.f32.mrf.mxu1  ;;  %8588 = vst [vmem:[#allocation12_spill] sm:$0xff] %v7569_v26  ;;  %v5884_v30 = vadd.f32 %v5883_v28, %v5882_v8 }
 0x178   : > { %8587 = vst [vmem:[#allocation11_spill] sm:$0xff] %v7566_v56  ;;  %v5885_v19 = vpop.f32.mrf.mxu0 }
 0x179   : > { %v7571_v41 = vpop.f32.mrf.mxu1  ;;  %v7576_v61 = vadd.f32 %v5884_v30, %v7484_v25  ;;  %v5863_v30 = vadd.f32 %v5862_v31, %v5861_v48  ;;  %v5933_v48 = vadd.f32 %v7525_v52, %v7523_v21  ;;  %v5936_v31 = vadd.f32 %v7532_v60, %v7530_v5 }
 0x17a   : > { %8589 = vst [vmem:[#allocation13_spill] sm:$0xff] %v7571_v41  ;;  %v5886_v40 = vpop.f32.mrf.mxu0  ;;  %v5951_v21 = vadd.f32 %v5950_v45, %v5949_v54  ;;  %v5954_v60 = vadd.f32 %v5953_v24, %v5952_v50 }
 0x17b   : > { %v7573_v39 = vpop.f32.mrf.mxu1  ;;  %8591 = vst [vmem:[#allocation15_spill] sm:$0xff] %v7576_v61  ;;  %v5866_v61 = vadd.f32 %v5865_v11, %v5864_v32  ;;  %v5939_v32 = vadd.f32 %v7539_v33, %v7537_v9 }
 0x17c   : > { %8590 = vst [vmem:[#allocation14_spill] sm:$0xff] %v7573_v39  ;;  %v5888_v17 = vpop.f32.mrf.mxu0 }
 0x17d   : > { %v7578_v23 = vpop.f32.mrf.mxu1 }
 0x17e   : > { %8592 = vst [vmem:[#allocation16_spill] sm:$0xff] %v7578_v23  ;;  %v5889_v15 = vpop.f32.mrf.mxu0  ;;  %v5875_v23 = vadd.f32 %v5874_v62, %v5873_v13 }
 0x17f   : > { %v7580_v1 = vpop.f32.mrf.mxu1 }
 0x180   : > { %8593 = vst [vmem:[#allocation17_spill] sm:$0xff] %v7580_v1  ;;  %v5891_v18 = vpop.f32.mrf.mxu0  ;;  %v5921_v1 = vadd.f32 %v7498_v7, %v7496_v14  ;;  %v2332_v7 = vadd.f32 %v5863_v30, %v7470_v3 }
 0x181   : > { %v7582_v56 = vpop.f32.mrf.mxu1 }
 0x182   : > { %8594 = vst [vmem:[#allocation18_spill] sm:$0xff] %v7582_v56  ;;  %v5892_v26 = vpop.f32.mrf.mxu0  ;;  %v5924_v56 = vadd.f32 %v7504_v42, %v7502_v35  ;;  %v2335_v35 = vadd.f32 %v5866_v61, %v7472_v55  ;;  %v5942_v42 = vadd.f32 %v7546_v57, %v7544_v6  ;;  %v2421_v3 = vadd.f32 %v5921_v1, %v7507_v63  ;;  %v8605_v1 = vld [vmem:[#allocation5_spill] sm:$0xff] }
 0x183   : > { %v7584_v2 = vpop.f32.mrf.mxu1  ;;  %v7620_v6 = vadd.f32 %v5933_v48, %v7535_v43  ;;  %v7623_v57 = vadd.f32 %v5936_v31, %v7542_v59  ;;  %v2445_v11 = vadd.f32 %v5939_v32, %v2332_v7  ;;  %v8601_v54 = vld [vmem:[#allocation14_spill] sm:$0xff] }
 0x184   : > { %8595 = vst [vmem:[#allocation19_spill] sm:$0xff] %v7584_v2  ;;  %v5894_v28 = vpop.f32.mrf.mxu0  ;;  %v5927_v2 = vadd.f32 %v7511_v46, %v7509_v4  ;;  %v5945_v4 = vadd.f32 %v7550_v36, %v7548_v34  ;;  %v2424_v55 = vadd.f32 %v5924_v56, %v7514_v20  ;;  %v5890_v20 = vadd.f32 %v5889_v15, %v5888_v17  ;;  %v8598_v15 = vld [vmem:[#allocation10_spill] sm:$0xff] }
 0x185   : > { %v7586_v8 = vpop.f32.mrf.mxu1  ;;  %v5893_v34 = vadd.f32 %v5892_v26, %v5891_v18  ;;  %v8606_v18 = vld [vmem:[#allocation6_spill] sm:$0xff] }
 0x186   : > { %8596 = vst [vmem:[#allocation20_spill] sm:$0xff] %v7586_v8  ;;  %v5895_v25 = vpop.f32.mrf.mxu0  ;;  %v5878_v8 = vadd.f32 %v5877_v51, %v5876_v44  ;;  %v2429_v9 = vadd.f32 %v5927_v2, %v7521_v47  ;;  %v7628_v63 = vadd.f32 %v5945_v4, %v7555_v53  ;;  %v8600_v53 = vld [vmem:[#allocation13_spill] sm:$0xff]  ;;  %v8602_v44 = vld [vmem:[#allocation4_spill] sm:$0xff] }
 0x187   : > { %v7588_v39 = vpop.f32.mrf.mxu1  ;;  %v5963_v13 = vadd.f32 %v8601_v54, %v8600_v53  ;;  %v8603_v51 = vld [vmem:[#allocation16_spill] sm:$0xff]  ;;  %v2372_v2 = vadd.f32 %v5893_v34, %v8606_v18  ;;  %v2961_v18 = vld [vmem:[#allocation3 + $0xc] sm:$0xf] }
 0x188   : > { %8597 = vst [vmem:[#allocation21_spill] sm:$0xff] %v7588_v39  ;;  %v5897_v16 = vpop.f32.mrf.mxu0  ;;  %v5930_v39 = vadd.f32 %v7518_v29, %v7516_v12  ;;  %v5948_v12 = vadd.f32 %v5947_v27, %v7552_v49  ;;  %v2348_v29 = vadd.f32 %v5875_v23, %v7478_v58  ;;  %v2351_v5 = vadd.f32 %v5878_v8, %v7480_v38  ;;  %v8599_v49 = vld [vmem:[#allocation11_spill] sm:$0xff] }
 0x189   : > { %v7590_v41 = vpop.f32.mrf.mxu1  ;;  %v5887_v58 = vadd.f32 %v5886_v40, %v5885_v19  ;;  %v7625_v38 = vadd.f32 %v5942_v42, %v2335_v35  ;;  %v5957_v40 = vadd.f32 %v7562_v0, %v7560_v37  ;;  %v5896_v19 = vadd.f32 %v5895_v25, %v5894_v28  ;;  %v8604_v37 = vld [vmem:[#allocation17_spill] sm:$0xff]  ;;  %v8607_v8 = vld [vmem:[#allocation18_spill] sm:$0xff] }
 0x18a   : > { %v5898_v14 = vpop.f32.mrf.mxu0  ;;  %v2432_v33 = vadd.f32 %v5930_v39, %v7528_v10  ;;  %v7633_v39 = vld [vmem:[%s8573_s3] ss:$0 sm:$0xff]  ;;  %v7635_v47 = vadd.f32 %v5951_v21, %v2348_v29  ;;  %v7638_v10 = vadd.f32 %v5948_v12, %v7558_v22  ;;  %v7642_v59 = vadd.f32 %v5954_v60, %v2351_v5  ;;  %v8612_v12 = vld [vmem:[#allocation8_spill] sm:$0xff] }
 0x18b   : > { %v5974_v46 = vpop.f32.mrf.mxu1  ;;  %v5960_v27 = vadd.f32 %v8599_v49, %v8598_v15  ;;  %v5899_v45 = vadd.f32 %v5898_v14, %v5897_v16  ;;  %v7651_v22 = vld [vmem:[%s8574_s4] ss:$0 sm:$0xff]  ;;  %v2364_v24 = vadd.f32 %v5887_v58, %v8602_v44  ;;  %v5966_v0 = vadd.f32 %v8604_v37, %v8603_v51 }
 0x18c   : > { %v5900_v52 = vpop.f32.mrf.mxu0  ;;  %v2367_v16 = vadd.f32 %v5890_v20, %v8605_v1  ;;  %v8608_v28 = vld [vmem:[#allocation19_spill] sm:$0xff]  ;;  %v5975_v21 = vadd.f32 %v5974_v46, %v7590_v41 }
 0x18d   : > { %v5976_v23 = vpop.f32.mrf.mxu1  ;;  %v5969_v25 = vadd.f32 %v8608_v28, %v8607_v8  ;;  %v8609_v30 = vld [vmem:[#allocation20_spill] sm:$0xff]  ;;  %v8611_v14 = vld [vmem:[#allocation7_spill] sm:$0xff]  ;;  %v2380_v29 = vadd.f32 %v5899_v45, %v8612_v12 }
 0x18e   : > { %v5901_v61 = vpop.f32.mrf.mxu0  ;;  %v2375_v7 = vadd.f32 %v5896_v19, %v8611_v14  ;;  %v7676_v41 = vadd.f32 %v5966_v0, %v2367_v16  ;;  %v8615_v46 = vld [vmem:[#allocation15_spill] sm:$0xff]  ;;  %v2952_v14 = vld [vmem:[#allocation3] sm:$0xf] }
 0x18f   : > { %v5902_v62 = vadd.f32 %v5901_v61, %v5900_v52  ;;  %v5977_v56 = vpop.f32.mrf.mxu1  ;;  %v8610_v48 = vld [vmem:[#allocation21_spill] sm:$0xff] }
 0x190   : > { %v6287_v36 = vpop.f32.mrf.mxu0  ;;  %v5972_v31 = vadd.f32 %v8610_v48, %v8609_v30  ;;  %v8613_v52 = vld [vmem:[#allocation9_spill] sm:$0xff]  ;;  %v5978_v60 = vadd.f32 %v5977_v56, %v5976_v23  ;;  %v7679_v23 = vadd.f32 %v5960_v27, %v8615_v46 }
 0x191   : > { %v2542_v43 = vadd.f32 %v6287_v36, %v2429_v9  ;;  %v2383_v5 = vadd.f32 %v5902_v62, %v8613_v52  ;;  %v7671_v36 = vadd.f32 %v5963_v13, %v2364_v24  ;;  %v7685_v13 = vadd.f32 %v5969_v25, %v2372_v2 }
 0x192   : > { %v2533_v50 = vpop.f32.mrf.mxu0  ;;  %v7687_v62 = vadd.f32 %v5972_v31, %v2375_v7 }
 0x193   : > { %v2621_v26 = vmul.f32 %v7633_v39, %v2542_v43  ;;  %v2534_v17 = vadd.f32 %v2533_v50, %v2421_v3  ;;  %v7689_v24 = vadd.f32 %v5978_v60, %v2383_v5 }
 0x194   : > { %v6288_v32 = vpop.f32.mrf.mxu0 }
 0x195   : > { %v2648_v35 = vadd.f32 %v7651_v22, %v2621_v26  ;;  %v2619_v42 = vmul.f32 %v7633_v39, %v2534_v17  ;;  %v2545_v4 = vadd.f32 %v6288_v32, %v2432_v33  ;;  %v8614_v33 = vld [vmem:[#allocation12_spill] sm:$0xff] }
 0x196   : > { %v2536_v3 = vpop.f32.mrf.mxu0  ;;  %v7674_v19 = vadd.f32 %v5957_v40, %v8614_v33 }
 0x197   : > { %v2668_v61 = vmax.f32 %v2648_v35, 0.0  ;;  %v2646_v9 = vadd.f32 %v7651_v22, %v2619_v42  ;;  %v2622_v58 = vmul.f32 %v7633_v39, %v2545_v4  ;;  %v2537_v20 = vadd.f32 %v2536_v3, %v2424_v55  ;;  %v2965_v3 = vld [vmem:[#allocation3 + $0x14] sm:$0x1] }
 0x198   : > { %v6291_v34 = vpop.f32.mrf.mxu0  ;;  %v7683_v55 = vadd.f32 %v5975_v21, %v2380_v29 }
 0x199   : > { %v5592_v43 = vpack.c.bf16 %v2668_v61, %v2668_v61  ;;  %v2666_v15 = vmax.f32 %v2646_v9, 0.0  ;;  %v2649_v49 = vadd.f32 %v7651_v22, %v2622_v58  ;;  %v2620_v53 = vmul.f32 %v7633_v39, %v2537_v20 }
 0x19a   : > { %v2558_v54 = vadd.f32 %v6291_v34, %v2445_v11  ;;  %v2549_v45 = vpop.f32.mrf.mxu0 }
 0x19b   : > { %v2767_v40 = vshrl.u32 %v5592_v43, 16  ;;  %v5590_v50 = vpack.c.bf16 %v2666_v15, %v2666_v15  ;;  %v2669_v44 = vmax.f32 %v2649_v49, 0.0  ;;  %v2770_v27 = vshll.u32 %v5592_v43, 16 }
 0x19c   : > { %v2647_v51 = vadd.f32 %v7651_v22, %v2620_v53  ;;  %v2625_v37 = vmul.f32 %v7633_v39, %v2558_v54  ;;  %v2550_v0 = vadd.f32 %v2549_v45, %v7620_v6  ;;  %v6292_v11 = vpop.f32.mrf.mxu0 }
 0x19d   : > { %v2769_v56 = vrot.slane %v2767_v40, 7  ;;  %v2750_v26 = vshrl.u32 %v5590_v50, 16  ;;  %v2753_v17 = vshll.u32 %v5590_v50, 16  ;;  %v5593_v1 = vpack.c.bf16 %v2669_v44, %v2669_v44 }
 0x19e   : > { %v2667_v2 = vmax.f32 %v2647_v51, 0.0  ;;  %v2652_v8 = vadd.f32 %v7651_v22, %v2625_v37  ;;  %v2623_v28 = vmul.f32 %v7633_v39, %v2550_v0  ;;  %v2561_v25 = vadd.f32 %v6292_v11, %v7625_v38  ;;  %v2552_v6 = vpop.f32.mrf.mxu0 }
 0x19f   : > { %v2772_v30 = vor.u32 %v2770_v27, %v2769_v56  ;;  %v2773_v48 = vrot.slane %v2769_v56, 4  ;;  %v2752_v31 = vrot.slane %v2750_v26, 7  ;;  %v2775_v32 = vshrl.u32 %v5593_v1, 16  ;;  %v2958_v27 = vld [vmem:[#allocation3 + $0x8] sm:$0x1] }
 0x1a0   : > { %v2778_v7 = vshll.u32 %v5593_v1, 16  ;;  %v5591_v35 = vpack.c.bf16 %v2667_v2, %v2667_v2  ;;  %v2672_v42 = vmax.f32 %v2652_v8, 0.0  ;;  %v2650_v4 = vadd.f32 %v7651_v22, %v2623_v28  ;;  %v6295_v12 = vpop.f32.mrf.mxu0  ;;  %v2975_v1 = vld [vmem:[#allocation3 + $0x24] sm:$0xf] }
 0x1a1   : > { %v2962_v38 = vsel %vm7696_vm7, %v2772_v30, %v2961_v18  ;;  %v2755_v21 = vor.u32 %v2753_v17, %v2752_v31  ;;  %v2756_v52 = vrot.slane %v2752_v31, 4  ;;  %v2777_v5 = vrot.slane %v2775_v32, 7 }
 0x1a2   : > { %2963 = vst [vmem:[#allocation3 + $0xc] sm:$0xf] %v2962_v38  ;;  %v2758_v61 = vshrl.u32 %v5591_v35, 16  ;;  %v2761_v9 = vshll.u32 %v5591_v35, 16  ;;  %v5596_v58 = vpack.c.bf16 %v2672_v42, %v2672_v42  ;;  %v2670_v20 = vmax.f32 %v2650_v4, 0.0  ;;  %v2565_v34 = vpop.f32.mrf.mxu0 }
 0x1a3   : > { %v2953_v33 = vsel %vm7696_vm7, %v2755_v21, %v2952_v14  ;;  %v2780_v46 = vor.u32 %v2778_v7, %v2777_v5  ;;  %v2782_v43 = vrot.slane %v2777_v5, 4  ;;  %v2626_v15 = vmul.f32 %v7633_v39, %v2561_v25  ;;  %v2968_v4 = vld [vmem:[#allocation3 + $0x18] sm:$0xf] }
 0x1a4   : > { %2954 = vst [vmem:[#allocation3] sm:$0xf] %v2953_v33  ;;  %v2760_v49 = vrot.slane %v2758_v61, 7  ;;  %v2801_v53 = vshrl.u32 %v5596_v58, 16  ;;  %v2804_v54 = vshll.u32 %v5596_v58, 16  ;;  %v5594_v45 = vpack.c.bf16 %v2670_v20, %v2670_v20  ;;  %v6296_v40 = vpop.f32.mrf.mxu0 }
 0x1a5   : > { %v2781_v50 = vsel %vm7714_vm9, %v2773_v48, %v2780_v46  ;;  %v2966_v44 = vsel %vm7706_vm8, %v2782_v43, %v2965_v3  ;;  %v2653_v51 = vadd.f32 %v7651_v22, %v2626_v15  ;;  %v2553_v37 = vadd.f32 %v2552_v6, %v7623_v57 }
 0x1a6   : > { %2964 = vst [vmem:[#allocation3 + $0x10] sm:$0xf] %v2781_v50  ;;  %2967 = vst [vmem:[#allocation3 + $0x14] sm:$0x1] %v2966_v44  ;;  %v2763_v0 = vor.u32 %v2761_v9, %v2760_v49  ;;  %v2765_v11 = vrot.slane %v2760_v49, 4  ;;  %v7727_v56 = vrot.slane %v2801_v53, 7  ;;  %v2568_v17 = vpop.f32.mrf.mxu0  ;;  %v2574_v28 = vadd.f32 %v6295_v12, %v7635_v47 }
 0x1a7   : > { %v2784_v26 = vshrl.u32 %v5594_v45, 16  ;;  %v2787_v18 = vshll.u32 %v5594_v45, 16  ;;  %v2673_v2 = vmax.f32 %v2653_v51, 0.0  ;;  %v2624_v8 = vmul.f32 %v7633_v39, %v2553_v37  ;;  %v2979_v45 = vld [vmem:[#allocation3 + $0x2c] sm:$0x1] }
 0x1a8   : > { %v2764_v25 = vsel %vm7714_vm9, %v2756_v52, %v2763_v0  ;;  %v2959_v57 = vsel %vm7706_vm8, %v2765_v11, %v2958_v27  ;;  %v2806_v6 = vor.u32 %v2804_v54, %v7727_v56  ;;  %v2807_v30 = vrot.slane %v7727_v56, 4  ;;  %v7737_v48 = vpop.f32.mrf.mxu0 }
 0x1a9   : > { %v3027_v31 = vld [vmem:[#allocation3 + $0xc] sm:$0x1]  ;;  %2955 = vst [vmem:[#allocation3 + $0x4] sm:$0xf] %v2764_v25  ;;  %2960 = vst [vmem:[#allocation3 + $0x8] sm:$0x1] %v2959_v57  ;;  %v5597_v14 = vpack.c.bf16 %v2673_v2, %v2673_v2  ;;  %v2651_v47 = vadd.f32 %v7651_v22, %v2624_v8  ;;  %v2629_v7 = vmul.f32 %v7633_v39, %v2574_v28 }
 0x1aa   : > { %v7739_v32 = vrot.slane %v2784_v26, 7  ;;  %v3028_v35 = vsel %vm7706_vm8, 0, %v3027_v31  ;;  %v2976_v42 = vsel %vm7696_vm7, %v2806_v6, %v2975_v1  ;;  %v2566_v12 = vadd.f32 %v2565_v34, %v7628_v63  ;;  %v7749_v21 = vpop.f32.mrf.mxu0 }
 0x1ab   : > { %v2577_v38 = vadd.f32 %v6296_v40, %v7642_v59  ;;  %3029 = vst [vmem:[#allocation3 + $0xc] sm:$0x1] %v3028_v35  ;;  %v3024_v5 = vld [vmem:[#allocation3] sm:$0x1]  ;;  %2977 = vst [vmem:[#allocation3 + $0x24] sm:$0xf] %v2976_v42  ;;  %v2656_v20 = vadd.f32 %v7651_v22, %v2629_v7  ;;  %v2569_v53 = vadd.f32 %v2568_v17, %v7638_v10 }
 0x1ac   : > { %v2789_v3 = vor.u32 %v2787_v18, %v7739_v32  ;;  %v2790_v61 = vrot.slane %v7739_v32, 4  ;;  %v2809_v9 = vshrl.u32 %v5597_v14, 16  ;;  %v2812_v58 = vshll.u32 %v5597_v14, 16  ;;  %v7763_v33 = vpop.f32.mrf.mxu0  ;;  %v2972_v7 = vld [vmem:[#allocation3 + $0x20] sm:$0x1] }
 0x1ad   : > { %v3025_v63 = vsel %vm7706_vm8, 0, %v3024_v5  ;;  %v2671_v59 = vmax.f32 %v2651_v47, 0.0  ;;  %v2627_v34 = vmul.f32 %v7633_v39, %v2566_v12  ;;  %v3058_v46 = vld [vmem:[#allocation3 + $0x14] sm:$0x1]  ;;  %v2630_v49 = vmul.f32 %v7633_v39, %v2577_v38  ;;  %v2989_v5 = vld [vmem:[#allocation3 + $0x3c] sm:$0xf] }
 0x1ae   : > { %3026 = vst [vmem:[#allocation3] sm:$0x1] %v3025_v63  ;;  %v2969_v43 = vsel %vm7696_vm7, %v2789_v3, %v2968_v4  ;;  %v2811_v15 = vrot.slane %v2809_v9, 7  ;;  %v3059_v54 = vsel %vm7753_vm10, 0, %v3058_v46  ;;  %v2676_v50 = vmax.f32 %v2656_v20, 0.0  ;;  %v7772_v27 = vpop.f32.mrf.mxu0 }
 0x1af   : > { %2970 = vst [vmem:[#allocation3 + $0x18] sm:$0xf] %v2969_v43  ;;  %v5595_v40 = vpack.c.bf16 %v2671_v59, %v2671_v59  ;;  %v2654_v44 = vadd.f32 %v7651_v22, %v2627_v34  ;;  %3060 = vst [vmem:[#allocation3 + $0x14] sm:$0x1] %v3059_v54  ;;  %v2657_v0 = vadd.f32 %v7651_v22, %v2630_v49 }
 0x1b0   : > { %v2814_v51 = vor.u32 %v2812_v58, %v2811_v15  ;;  %v2816_v37 = vrot.slane %v2811_v15, 4  ;;  %v2628_v11 = vmul.f32 %v7633_v39, %v2569_v53  ;;  %v3055_v56 = vld [vmem:[#allocation3 + $0x8] sm:$0x1]  ;;  %v5600_v17 = vpack.c.bf16 %v2676_v50, %v2676_v50  ;;  %v6303_v14 = vpop.f32.mrf.mxu0  ;;  %v2993_v50 = vld [vmem:[#allocation3 + $0x44] sm:$0x1] }
 0x1b1   : > { %v2792_v10 = vshrl.u32 %v5595_v40, 16  ;;  %v2795_v26 = vshll.u32 %v5595_v40, 16  ;;  %v2674_v1 = vmax.f32 %v2654_v44, 0.0  ;;  %v3056_v18 = vsel %vm7753_vm10, 0, %v3055_v56  ;;  %v2982_v40 = vld [vmem:[#allocation3 + $0x30] sm:$0xf] }
 0x1b2   : > { %v2815_v2 = vsel %vm7714_vm9, %v2807_v30, %v2814_v51  ;;  %v2980_v8 = vsel %vm7706_vm8, %v2816_v37, %v2979_v45  ;;  %v2677_v28 = vmax.f32 %v2657_v0, 0.0  ;;  %3057 = vst [vmem:[#allocation3 + $0x8] sm:$0x1] %v3056_v18  ;;  %v3033_v25 = vld [vmem:[#allocation3 + $0x24] sm:$0x1]  ;;  %v2835_v6 = vshrl.u32 %v5600_v17, 16  ;;  %v2597_v43 = vpop.f32.mrf.mxu0 }
 0x1b3   : > { %2978 = vst [vmem:[#allocation3 + $0x28] sm:$0xf] %v2815_v2  ;;  %2981 = vst [vmem:[#allocation3 + $0x2c] sm:$0x1] %v2980_v8  ;;  %v2794_v57 = vrot.slane %v2792_v10, 7  ;;  %v2838_v31 = vshll.u32 %v5600_v17, 16  ;;  %v5598_v32 = vpack.c.bf16 %v2674_v1, %v2674_v1  ;;  %v2655_v30 = vadd.f32 %v7651_v22, %v2628_v11 }
 0x1b4   : > { %v3034_v47 = vsel %vm7706_vm8, 0, %v3033_v25  ;;  %v5601_v35 = vpack.c.bf16 %v2677_v28, %v2677_v28  ;;  %v2590_v42 = vadd.f32 %v7737_v48, %v7671_v36  ;;  %v2837_v38 = vrot.slane %v2835_v6, 7  ;;  %v6304_v2 = vpop.f32.mrf.mxu0  ;;  %v2986_v6 = vld [vmem:[#allocation3 + $0x38] sm:$0x1] }
 0x1b5   : > { %3035 = vst [vmem:[#allocation3 + $0x24] sm:$0x1] %v3034_v47  ;;  %v2797_v4 = vor.u32 %v2795_v26, %v2794_v57  ;;  %v2799_v12 = vrot.slane %v2794_v57, 4  ;;  %v2818_v3 = vshrl.u32 %v5598_v32, 16  ;;  %v2821_v58 = vshll.u32 %v5598_v32, 16 }
 0x1b6   : > { %v3030_v9 = vld [vmem:[#allocation3 + $0x18] sm:$0x1]  ;;  %v2843_v63 = vshrl.u32 %v5601_v35, 16  ;;  %v2846_v59 = vshll.u32 %v5601_v35, 16  ;;  %v2675_v20 = vmax.f32 %v2655_v30, 0.0  ;;  %v2840_v48 = vor.u32 %v2838_v31, %v2837_v38 }
 0x1b7   : > { %v3031_v34 = vsel %vm7706_vm8, 0, %v3030_v9  ;;  %v2798_v46 = vsel %vm7714_vm9, %v2790_v61, %v2797_v4  ;;  %v2973_v36 = vsel %vm7706_vm8, %v2799_v12, %v2972_v7  ;;  %v2841_v15 = vrot.slane %v2837_v38, 4 }
 0x1b8   : > { %3032 = vst [vmem:[#allocation3 + $0x18] sm:$0x1] %v3031_v34  ;;  %2971 = vst [vmem:[#allocation3 + $0x1c] sm:$0xf] %v2798_v46  ;;  %v2820_v49 = vrot.slane %v2818_v3, 7  ;;  %v2845_v53 = vrot.slane %v2843_v63, 7  ;;  %v5599_v54 = vpack.c.bf16 %v2675_v20, %v2675_v20  ;;  %v2990_v45 = vsel %vm7696_vm7, %v2840_v48, %v2989_v5  ;;  %v2600_v20 = vpop.f32.mrf.mxu0 }
 0x1b9   : > { %2974 = vst [vmem:[#allocation3 + $0x20] sm:$0x1] %v2973_v36  ;;  %v2633_v44 = vmul.f32 %v7633_v39, %v2590_v42  ;;  %v2582_v61 = vadd.f32 %v7749_v21, %v7674_v19  ;;  %v2593_v51 = vadd.f32 %v7763_v33, %v7676_v41  ;;  %2991 = vst [vmem:[#allocation3 + $0x3c] sm:$0xf] %v2990_v45  ;;  %v3003_v46 = vld [vmem:[#allocation3 + $0x54] sm:$0xf] }
 0x1ba   : > { %v3064_v37 = vld [vmem:[#allocation3 + $0x2c] sm:$0x1]  ;;  %v2823_v0 = vor.u32 %v2821_v58, %v2820_v49  ;;  %v2824_v11 = vrot.slane %v2820_v49, 4  ;;  %v2848_v56 = vor.u32 %v2846_v59, %v2845_v53  ;;  %v2850_v10 = vrot.slane %v2845_v53, 4 }
 0x1bb   : > { %v3065_v26 = vsel %vm7753_vm10, 0, %v3064_v37  ;;  %v2826_v17 = vshrl.u32 %v5599_v54, 16  ;;  %v2829_v1 = vshll.u32 %v5599_v54, 16  ;;  %v2660_v18 = vadd.f32 %v7651_v22, %v2633_v44 }
 0x1bc   : > { %3066 = vst [vmem:[#allocation3 + $0x2c] sm:$0x1] %v3065_v26  ;;  %v2983_v19 = vsel %vm7696_vm7, %v2823_v0, %v2982_v40  ;;  %v2849_v41 = vsel %vm7714_vm9, %v2841_v15, %v2848_v56  ;;  %v2994_v21 = vsel %vm7706_vm8, %v2850_v10, %v2993_v50  ;;  %v2631_v33 = vmul.f32 %v7633_v39, %v2582_v61  ;;  %v2996_v10 = vld [vmem:[#allocation3 + $0x48] sm:$0xf] }
 0x1bd   : > { %2984 = vst [vmem:[#allocation3 + $0x30] sm:$0xf] %v2983_v19  ;;  %2992 = vst [vmem:[#allocation3 + $0x40] sm:$0xf] %v2849_v41  ;;  %v2828_v8 = vrot.slane %v2826_v17, 7  ;;  %v2680_v28 = vmax.f32 %v2660_v18, 0.0  ;;  %v2634_v25 = vmul.f32 %v7633_v39, %v2593_v51  ;;  %v2585_v57 = vadd.f32 %v7772_v27, %v7679_v23 }
 0x1be   : > { %2995 = vst [vmem:[#allocation3 + $0x44] sm:$0x1] %v2994_v21  ;;  %v2658_v31 = vadd.f32 %v7651_v22, %v2631_v33  ;;  %v2606_v32 = vadd.f32 %v6303_v14, %v7683_v55  ;;  %v2598_v47 = vadd.f32 %v2597_v43, %v7685_v13  ;;  %v2609_v7 = vadd.f32 %v6304_v2, %v7689_v24  ;;  %v3007_v21 = vld [vmem:[#allocation3 + $0x5c] sm:$0x1] }
 0x1bf   : > { %v2831_v30 = vor.u32 %v2829_v1, %v2828_v8  ;;  %v2833_v42 = vrot.slane %v2828_v8, 4  ;;  %v5604_v4 = vpack.c.bf16 %v2680_v28, %v2680_v28  ;;  %v2661_v12 = vadd.f32 %v7651_v22, %v2634_v25 }
 0x1c0   : > { %v3061_v35 = vld [vmem:[#allocation3 + $0x20] sm:$0x1]  ;;  %v2678_v5 = vmax.f32 %v2658_v31, 0.0  ;;  %v2632_v23 = vmul.f32 %v7633_v39, %v2585_v57  ;;  %v2637_v27 = vmul.f32 %v7633_v39, %v2606_v32  ;;  %v3039_v55 = vld [vmem:[#allocation3 + $0x3c] sm:$0x1]  ;;  %v2635_v48 = vmul.f32 %v7633_v39, %v2598_v47 }
 0x1c1   : > { %v3062_v38 = vsel %vm7753_vm10, 0, %v3061_v35  ;;  %v2832_v13 = vsel %vm7714_vm9, %v2824_v11, %v2831_v30  ;;  %v2987_v24 = vsel %vm7706_vm8, %v2833_v42, %v2986_v6  ;;  %v2869_v14 = vshrl.u32 %v5604_v4, 16 }
 0x1c2   : > { %3063 = vst [vmem:[#allocation3 + $0x20] sm:$0x1] %v3062_v38  ;;  %v2872_v3 = vshll.u32 %v5604_v4, 16  ;;  %v3040_v9 = vsel %vm7706_vm8, 0, %v3039_v55  ;;  %2985 = vst [vmem:[#allocation3 + $0x34] sm:$0xf] %v2832_v13  ;;  %v5602_v58 = vpack.c.bf16 %v2678_v5, %v2678_v5  ;;  %v2659_v59 = vadd.f32 %v7651_v22, %v2632_v23 }
 0x1c3   : > { %2988 = vst [vmem:[#allocation3 + $0x38] sm:$0x1] %v2987_v24  ;;  %v2681_v63 = vmax.f32 %v2661_v12, 0.0  ;;  %3041 = vst [vmem:[#allocation3 + $0x3c] sm:$0x1] %v3040_v9  ;;  %v2871_v34 = vrot.slane %v2869_v14, 7  ;;  %v2664_v36 = vadd.f32 %v7651_v22, %v2637_v27  ;;  %v2638_v43 = vmul.f32 %v7633_v39, %v2609_v7 }
 0x1c4   : > { %v3036_v15 = vld [vmem:[#allocation3 + $0x30] sm:$0x1]  ;;  %v2852_v53 = vshrl.u32 %v5602_v58, 16  ;;  %v2855_v54 = vshll.u32 %v5602_v58, 16  ;;  %v2601_v61 = vadd.f32 %v2600_v20, %v7687_v62  ;;  %v2679_v11 = vmax.f32 %v2659_v59, 0.0 }
 0x1c5   : > { %v3070_v49 = vld [vmem:[#allocation3 + $0x44] sm:$0x1]  ;;  %v5605_v45 = vpack.c.bf16 %v2681_v63, %v2681_v63  ;;  %v3037_v40 = vsel %vm7706_vm8, 0, %v3036_v15  ;;  %v2874_v44 = vor.u32 %v2872_v3, %v2871_v34  ;;  %v2875_v51 = vrot.slane %v2871_v34, 4  ;;  %v3000_v38 = vld [vmem:[#allocation3 + $0x50] sm:$0x1] }
 0x1c6   : > { %v3071_v50 = vsel %vm7753_vm10, 0, %v3070_v49  ;;  %3038 = vst [vmem:[#allocation3 + $0x30] sm:$0x1] %v3037_v40  ;;  %v2854_v37 = vrot.slane %v2852_v53, 7  ;;  %v2684_v26 = vmax.f32 %v2664_v36, 0.0  ;;  %v2662_v17 = vadd.f32 %v7651_v22, %v2635_v48 }
 0x1c7   : > { %3072 = vst [vmem:[#allocation3 + $0x44] sm:$0x1] %v3071_v50  ;;  %v2877_v0 = vshrl.u32 %v5605_v45, 16  ;;  %v3004_v56 = vsel %vm7696_vm7, %v2874_v44, %v3003_v46  ;;  %v2665_v1 = vadd.f32 %v7651_v22, %v2638_v43  ;;  %v2880_v19 = vshll.u32 %v5605_v45, 16  ;;  %v3017_v13 = vld [vmem:[#allocation3 + $0x6c] sm:$0xf] }
 0x1c8   : > { %3005 = vst [vmem:[#allocation3 + $0x54] sm:$0xf] %v3004_v56  ;;  %v2857_v18 = vor.u32 %v2855_v54, %v2854_v37  ;;  %v5603_v62 = vpack.c.bf16 %v2679_v11, %v2679_v11  ;;  %v5608_v33 = vpack.c.bf16 %v2684_v26, %v2684_v26  ;;  %v2682_v8 = vmax.f32 %v2662_v17, 0.0  ;;  %v3010_v49 = vld [vmem:[#allocation3 + $0x60] sm:$0xf] }
 0x1c9   : > { %v2879_v2 = vrot.slane %v2877_v0, 7  ;;  %v2685_v28 = vmax.f32 %v2665_v1, 0.0  ;;  %v2636_v25 = vmul.f32 %v7633_v39, %v2601_v61  ;;  %v2858_v55 = vrot.slane %v2854_v37, 4  ;;  %v3021_v53 = vld [vmem:[#allocation3 + $0x74] sm:$0x1] }
 0x1ca   : > { %v3067_v41 = vld [vmem:[#allocation3 + $0x38] sm:$0x1]  ;;  %v2997_v6 = vsel %vm7696_vm7, %v2857_v18, %v2996_v10  ;;  %v2860_v47 = vshrl.u32 %v5603_v62, 16  ;;  %v2863_v7 = vshll.u32 %v5603_v62, 16  ;;  %v2903_v35 = vshrl.u32 %v5608_v33, 16 }
 0x1cb   : > { %v3068_v57 = vsel %vm7753_vm10, 0, %v3067_v41  ;;  %v2882_v31 = vor.u32 %v2880_v19, %v2879_v2  ;;  %v2884_v32 = vrot.slane %v2879_v2, 4  ;;  %2998 = vst [vmem:[#allocation3 + $0x48] sm:$0xf] %v2997_v6  ;;  %v5606_v39 = vpack.c.bf16 %v2682_v8, %v2682_v8  ;;  %v3014_v18 = vld [vmem:[#allocation3 + $0x68] sm:$0x1] }
 0x1cc   : > { %3069 = vst [vmem:[#allocation3 + $0x38] sm:$0x1] %v3068_v57  ;;  %v5609_v4 = vpack.c.bf16 %v2685_v28, %v2685_v28  ;;  %v2862_v12 = vrot.slane %v2860_v47, 7  ;;  %v2905_v5 = vrot.slane %v2903_v35, 7  ;;  %v2906_v23 = vshll.u32 %v5608_v33, 16 }
 0x1cd   : > { %v2883_v30 = vsel %vm7714_vm9, %v2875_v51, %v2882_v31  ;;  %v3008_v42 = vsel %vm7706_vm8, %v2884_v32, %v3007_v21  ;;  %v2663_v27 = vadd.f32 %v7651_v22, %v2636_v25  ;;  %v2886_v24 = vshrl.u32 %v5606_v39, 16 }
 0x1ce   : > { %3006 = vst [vmem:[#allocation3 + $0x58] sm:$0xf] %v2883_v30  ;;  %3009 = vst [vmem:[#allocation3 + $0x5c] sm:$0x1] %v3008_v42  ;;  %v2889_v14 = vshll.u32 %v5606_v39, 16  ;;  %v2911_v3 = vshrl.u32 %v5609_v4, 16  ;;  %v2865_v58 = vor.u32 %v2863_v7, %v2862_v12  ;;  %v2908_v59 = vor.u32 %v2906_v23, %v2905_v5 }
 0x1cf   : > { %v3045_v9 = vld [vmem:[#allocation3 + $0x54] sm:$0x1]  ;;  %v2867_v63 = vrot.slane %v2862_v12, 4  ;;  %v2914_v20 = vshll.u32 %v5609_v4, 16  ;;  %v2888_v46 = vrot.slane %v2886_v24, 7  ;;  %v2683_v48 = vmax.f32 %v2663_v27, 0.0 }
 0x1d0   : > { %v3046_v34 = vsel %vm7706_vm8, 0, %v3045_v9  ;;  %v2913_v36 = vrot.slane %v2911_v3, 7  ;;  %v2866_v22 = vsel %vm7714_vm9, %v2858_v55, %v2865_v58  ;;  %v3018_v15 = vsel %vm7696_vm7, %v2908_v59, %v3017_v13 }
 0x1d1   : > { %3047 = vst [vmem:[#allocation3 + $0x54] sm:$0x1] %v3046_v34  ;;  %v3001_v43 = vsel %vm7706_vm8, %v2867_v63, %v3000_v38  ;;  %2999 = vst [vmem:[#allocation3 + $0x4c] sm:$0xf] %v2866_v22  ;;  %v2909_v45 = vrot.slane %v2905_v5, 4  ;;  %v2891_v40 = vor.u32 %v2889_v14, %v2888_v46  ;;  %v5607_v51 = vpack.c.bf16 %v2683_v48, %v2683_v48 }
 0x1d2   : > { %v3042_v54 = vld [vmem:[#allocation3 + $0x48] sm:$0x1]  ;;  %3002 = vst [vmem:[#allocation3 + $0x50] sm:$0x1] %v3001_v43  ;;  %3019 = vst [vmem:[#allocation3 + $0x6c] sm:$0xf] %v3018_v15  ;;  %v2916_v50 = vor.u32 %v2914_v20, %v2913_v36 }
 0x1d3   : > { %v2918_v44 = vrot.slane %v2913_v36, 4  ;;  %v3043_v61 = vsel %vm7706_vm8, 0, %v3042_v54  ;;  %v3011_v0 = vsel %vm7696_vm7, %v2891_v40, %v3010_v49  ;;  %v2894_v26 = vshrl.u32 %v5607_v51, 16 }
 0x1d4   : > { %3044 = vst [vmem:[#allocation3 + $0x48] sm:$0x1] %v3043_v61  ;;  %v2917_v11 = vsel %vm7714_vm9, %v2909_v45, %v2916_v50  ;;  %3012 = vst [vmem:[#allocation3 + $0x60] sm:$0xf] %v3011_v0  ;;  %v2897_v1 = vshll.u32 %v5607_v51, 16  ;;  %v2892_v19 = vrot.slane %v2888_v46, 4 }
 0x1d5   : > { %v3076_v37 = vld [vmem:[#allocation3 + $0x5c] sm:$0x1]  ;;  %v3022_v56 = vsel %vm7706_vm8, %v2918_v44, %v3021_v53  ;;  %3020 = vst [vmem:[#allocation3 + $0x70] sm:$0xf] %v2917_v11  ;;  %v2896_v17 = vrot.slane %v2894_v26, 7 }
 0x1d6   : > { %v3077_v10 = vsel %vm7753_vm10, 0, %v3076_v37  ;;  %3023 = vst [vmem:[#allocation3 + $0x74] sm:$0x1] %v3022_v56 }
 0x1d7   : > { %3078 = vst [vmem:[#allocation3 + $0x5c] sm:$0x1] %v3077_v10  ;;  %v2899_v62 = vor.u32 %v2897_v1, %v2896_v17  ;;  %v2901_v41 = vrot.slane %v2896_v17, 4 }
 0x1d9   : > { %v3073_v2 = vld [vmem:[#allocation3 + $0x50] sm:$0x1]  ;;  %v3051_v16 = vld [vmem:[#allocation3 + $0x6c] sm:$0x1]  ;;  %v2900_v8 = vsel %vm7714_vm9, %v2892_v19, %v2899_v62  ;;  %v3015_v28 = vsel %vm7706_vm8, %v2901_v41, %v3014_v18 }
 0x1da   : > { %v3074_v21 = vsel %vm7753_vm10, 0, %v3073_v2  ;;  %v3052_v33 = vsel %vm7706_vm8, 0, %v3051_v16  ;;  %3013 = vst [vmem:[#allocation3 + $0x64] sm:$0xf] %v2900_v8  ;;  %3016 = vst [vmem:[#allocation3 + $0x68] sm:$0x1] %v3015_v28 }
 0x1db   : > { %3075 = vst [vmem:[#allocation3 + $0x50] sm:$0x1] %v3074_v21  ;;  %3053 = vst [vmem:[#allocation3 + $0x6c] sm:$0x1] %v3052_v33  ;;  %v3048_v25 = vld [vmem:[#allocation3 + $0x60] sm:$0x1] }
 0x1dc   : > { %v3049_v6 = vsel %vm7706_vm8, 0, %v3048_v25 }
 0x1dd   : > { %v3082_v57 = vld [vmem:[#allocation3 + $0x74] sm:$0x1]  ;;  %3050 = vst [vmem:[#allocation3 + $0x60] sm:$0x1] %v3049_v6 }
 0x1de   : > { %v3083_v31 = vsel %vm7753_vm10, 0, %v3082_v57 }
 0x1df   : > { %3084 = vst [vmem:[#allocation3 + $0x74] sm:$0x1] %v3083_v31  ;;  %3088 = sbr.rel (%p5417_p9) target bundleno = 487 (0x1e7), region = 56 }
 0x1e1   : > { %v3079_v32 = vld [vmem:[#allocation3 + $0x68] sm:$0x1] }
 0x1e2   : > { %v3080_v60 = vsel %vm7753_vm10, 0, %v3079_v32 }
 0x1e3   : > { %3081 = vst [vmem:[#allocation3 + $0x68] sm:$0x1] %v3080_v60 }
 0x1e4   : > { %v6728_v47 = vmov 0  }
 0x1e5   : > { %3089 = vst [vmem:[#allocation3] sm:$0xf] %v6728_v47  ;;  %3090 = vst [vmem:[#allocation3 + $0x4] sm:$0xf] %v6728_v47 }
 0x1e6   : > { %3091 = vst [vmem:[#allocation3 + $0x8] sm:$0x1] %v6728_v47 }
 0x1e7 PF: > { %p5418_p10 = scmp.ne.s32.totalorder %s6710_s27, 1 }
 0x1e9   : > { %3095 = sbr.rel (%p5418_p10) target bundleno = 497 (0x1f1), region = 60 }
 0x1ee   : > { %v6729_v29 = vmov 0  }
 0x1ef   : > { %3097 = vst [vmem:[#allocation3 + $0x6c] sm:$0xf] %v6729_v29  ;;  %3098 = vst [vmem:[#allocation3 + $0x70] sm:$0xf] %v6729_v29 }
 0x1f0   : > { %3099 = vst [vmem:[#allocation3 + $0x74] sm:$0x1] %v6729_v29 }
 0x1f1 PF: > { %v6544_v52 = vld [vmem:[%s8575_s5 + $0x78] sm:$0xff]   ;;  %v6548_v42 = vld [vmem:[%s8575_s5 + $0x70] sm:$0xff]   ;;  %v6552_v38 = vld [vmem:[%s8575_s5 + $0x68] sm:$0xff]  }
 0x1f2   : > { %v6545_v7 = vld [vmem:[%s8575_s5 + $0xf8] sm:$0xff]   ;;  %5997 = vmatprep.subr.bf16.mxu1 %v6544_v52  ;;  %v6549_v39 = vld [vmem:[%s8575_s5 + $0xf0] sm:$0xff]   ;;  %v6553_v5 = vld [vmem:[%s8575_s5 + $0xe8] sm:$0xff]  }
 0x1f3   : > { %v6546_v35 = vld [vmem:[%s8575_s5 + $0x38] sm:$0xff]   ;;  %6061 = vmatprep.subr.bf16.mxu0 %v6545_v7  ;;  %v6550_v4 = vld [vmem:[%s8575_s5 + $0x30] sm:$0xff]   ;;  %v6554_v23 = vld [vmem:[%s8575_s5 + $0x28] sm:$0xff]  }
 0x1f4   : > { %v6547_v30 = vld [vmem:[%s8575_s5 + $0xb8] sm:$0xff]   ;;  %5998 = vmatpush3.bf16.msra.mxu1 %v6546_v35  ;;  %v6551_v12 = vld [vmem:[%s8575_s5 + $0xb0] sm:$0xff]   ;;  %v6555_v27 = vld [vmem:[%s8575_s5 + $0xa8] sm:$0xff]  }
 0x1f5   : > { %6062 = vmatpush3.bf16.msra.mxu0 %v6547_v30  ;;  %5999 = vmatprep.subr.bf16.mxu1 %v6548_v42  ;;  %v6556_v55 = vld [vmem:[%s8575_s5 + $0x60] sm:$0xff]   ;;  %v6560_v3 = vld [vmem:[%s8575_s5 + $0x58] sm:$0xff]   ;;  %v6564_v59 = vld [vmem:[%s8575_s5 + $0x50] sm:$0xff]  }
 0x1f6   : > { %6063 = vmatprep.subr.bf16.mxu0 %v6549_v39  ;;  %v6557_v13 = vld [vmem:[%s8575_s5 + $0xe0] sm:$0xff]   ;;  %v6561_v9 = vld [vmem:[%s8575_s5 + $0xd8] sm:$0xff]   ;;  %v6565_v20 = vld [vmem:[%s8575_s5 + $0xd0] sm:$0xff]  }
 0x1f7   : > { %v6558_v24 = vld [vmem:[%s8575_s5 + $0x20] sm:$0xff]   ;;  %v6562_v58 = vld [vmem:[%s8575_s5 + $0x18] sm:$0xff]   ;;  %v6566_v34 = vld [vmem:[%s8575_s5 + $0x10] sm:$0xff]  }
 0x1f8   : > { %6000 = vmatpush3.bf16.msra.mxu1 %v6550_v4  ;;  %v6559_v14 = vld [vmem:[%s8575_s5 + $0xa0] sm:$0xff]   ;;  %v6563_v63 = vld [vmem:[%s8575_s5 + $0x98] sm:$0xff]   ;;  %v6567_v46 = vld [vmem:[%s8575_s5 + $0x90] sm:$0xff]  }
 0x1f9   : > { %6064 = vmatpush3.bf16.msra.mxu0 %v6551_v12  ;;  %6001 = vmatprep.subr.bf16.mxu1 %v6552_v38  ;;  %v6568_v36 = vld [vmem:[%s8575_s5 + $0x48] sm:$0xff]   ;;  %v6572_v15 = vld [vmem:[%s8575_s5 + $0x40] sm:$0xff]   ;;  %v3100_v45 = vld [vmem:[#allocation3] sm:$0xf] }
 0x1fa   : > { %6065 = vmatprep.subr.bf16.mxu0 %v6553_v5  ;;  %v6569_v48 = vld [vmem:[%s8575_s5 + $0xc8] sm:$0xff]   ;;  %v6573_v49 = vld [vmem:[%s8575_s5 + $0xc0] sm:$0xff]   ;;  %v3101_v40 = vld [vmem:[#allocation3 + $0x4] sm:$0xf] }
 0x1fb   : > { %v6570_v22 = vld [vmem:[%s8575_s5 + $0x8] sm:$0xff]   ;;  %v6574_v53 = vld [vmem:[%s8575_s5] sm:$0xff]   ;;  %v5419_v50 = vcombine.low %v3100_v45, %v3101_v40  ;;  %v6577_v44 = vld [vmem:[#allocation3 + $0x8] ss:$0 sps:$4 sm:$0x11]  }
 0x1fc   : > { %6002 = vmatpush3.bf16.msra.mxu1 %v6554_v23  ;;  %v6571_v43 = vld [vmem:[%s8575_s5 + $0x88] sm:$0xff]   ;;  %v6575_v54 = vld [vmem:[%s8575_s5 + $0x80] sm:$0xff]   ;;  %v3133_v61 = vld [vmem:[#allocation3 + $0xc] sm:$0xf]  ;;  %v3278_v10 = vshll.u32 %v6577_v44, 16  ;;  %v3399_v1 = vrot.slane %v6577_v44, 1 }
 0x1fd   : > { %6066 = vmatpush3.bf16.msra.mxu0 %v6555_v27  ;;  %6003 = vmatprep.subr.bf16.mxu1 %v6556_v55  ;;  %v6580_v51 = vld [vmem:[%s8575_s5 + $0x178] sm:$0xff]   ;;  %v7984_v37 = vld [vmem:[#allocation3 + $0x10] sm:$0xf]  ;;  %v3124_v0 = vld [vmem:[#allocation3] sm:$0xe]  ;;  %v3271_v11 = vshrl.u32 %v5419_v50, 16 }
 0x1fe   : > { %6067 = vmatprep.subr.bf16.mxu0 %v6557_v13  ;;  %v3273_v56 = vshll.u32 %v5419_v50, 16  ;;  %v7987_v26 = vcombine.low %v3133_v61, %v7984_v37  ;;  %v5435_v17 = vcombine.low %v3124_v0, %v3101_v40  ;;  %v3280_v2 = vrot.slane %v3278_v10, 1  ;;  %v3102_v16 = vld [vmem:[#allocation3 + $0xc] sm:$0xf]  ;;  %v3103_v62 = vld [vmem:[#allocation3 + $0x10] sm:$0xf] }
 0x1ff   : > { %v6581_v21 = vld [vmem:[%s8575_s5 + $0x138] sm:$0xff]   ;;  %v5420_v33 = vcombine.low %v3102_v16, %v3103_v62  ;;  %v6583_v8 = vld [vmem:[#allocation3 + $0x14] ss:$0 sps:$4 sm:$0x11]   ;;  %v3135_v28 = vld [vmem:[#allocation3 + $0x18] sm:$0xf] }
 0x200   : > { %6004 = vmatpush3.bf16.msra.mxu1 %v6558_v24  ;;  %v3275_v18 = vrot.slane %v3273_v56, 1  ;;  %4599 = vmatprep.mubr.bf16.mxu0 %v7987_v26  ;;  %v3398_v19 = vrot.slane %v5435_v17, 1  ;;  %v7994_v57 = vld [vmem:[#allocation3 + $0x1c] sm:$0xf]  ;;  %v3125_v6 = vld [vmem:[#allocation3 + $0xc] sm:$0xe] }
 0x201   : > { %6068 = vmatpush3.bf16.msra.mxu0 %v6559_v14  ;;  %6005 = vmatprep.subr.bf16.mxu1 %v6560_v3  ;;  %v3283_v32 = vshrl.u32 %v5420_v33, 16  ;;  %v3285_v60 = vshll.u32 %v5420_v33, 16  ;;  %v3290_v47 = vshll.u32 %v6583_v8, 16  ;;  %v6586_v29 = vld [vmem:[%s8575_s5 + $0x170] sm:$0xff]   ;;  %v8001_v52 = vcombine.low %v3135_v28, %v7994_v57  ;;  %v3104_v4 = vld [vmem:[#allocation3 + $0x18] sm:$0xf] }
 0x202   : > { %6069 = vmatprep.subr.bf16.mxu0 %v6561_v9  ;;  %v3276_v41 = vor.u32 %v3275_v18, %v3271_v11  ;;  %v3400_v25 = vsel %vm850_vm0, %v3398_v19, %v3399_v1  ;;  %v5436_v7 = vcombine.low %v3125_v6, %v3103_v62  ;;  %v3402_v35 = vrot.slane %v6583_v8, 1  ;;  %v6587_v30 = vld [vmem:[%s8575_s5 + $0x130] sm:$0xff]   ;;  %v3105_v12 = vld [vmem:[#allocation3 + $0x1c] sm:$0xf]  ;;  %v8012_v24 = vld [vmem:[#allocation3 + $0x28] sm:$0xf] }
 0x203   : > { %v3287_v42 = vrot.slane %v3285_v60, 1  ;;  %v3292_v39 = vrot.slane %v3290_v47, 1  ;;  %v6592_v38 = vld [vmem:[%s8575_s5 + $0x168] sm:$0xff]   ;;  %v8010_v23 = vcombine.low %v3104_v4, %v3105_v12  ;;  %v6589_v27 = vld [vmem:[#allocation3 + $0x20] ss:$0 sps:$4 sm:$0x11]  }
 0x204   : > { %6006 = vmatpush3.bf16.msra.mxu1 %v6562_v58  ;;  %v3281_v31 = vsel %vm689_vm1, %v3276_v41, %v3280_v2  ;;  %v3401_v5 = vrot.slane %v5436_v7, 1  ;;  %v3137_v13 = vld [vmem:[#allocation3 + $0x24] sm:$0xf]  ;;  %v3126_v14 = vld [vmem:[#allocation3 + $0x18] sm:$0xe]  ;;  %v6601_v61 = vld [vmem:[%s8575_s5 + $0x1b8] sm:$0xff]  }
 0x205   : > { %6070 = vmatpush3.bf16.msra.mxu0 %v6563_v63  ;;  %6007 = vmatprep.subr.bf16.mxu1 %v6564_v59  ;;  %v3288_v55 = vor.u32 %v3287_v42, %v3283_v32  ;;  %v3295_v9 = vshrl.u32 %v8010_v23, 16  ;;  %v3297_v58 = vshll.u32 %v8010_v23, 16  ;;  %v3302_v63 = vshll.u32 %v6589_v27, 16  ;;  %v6593_v59 = vld [vmem:[%s8575_s5 + $0x128] sm:$0xff]   ;;  %v3139_v44 = vld [vmem:[#allocation3 + $0x30] sm:$0xf] }
 0x206   : > { %6071 = vmatprep.subr.bf16.mxu0 %v6565_v20  ;;  %4502 = vmatprep.mubr.bf16.mxu1 %v3281_v31  ;;  %v3403_v3 = vsel %vm850_vm0, %v3401_v5, %v3402_v35  ;;  %v3127_v0 = vld [vmem:[#allocation3 + $0x24] sm:$0xe]  ;;  %v6599_v1 = vld [vmem:[%s8575_s5 + $0x120] sm:$0xff]   ;;  %v6606_v16 = vld [vmem:[%s8575_s5 + $0x158] sm:$0xff]  }
 0x207   : > { %v3293_v20 = vsel %vm689_vm1, %v3288_v55, %v3292_v39  ;;  %v6608_v28 = vld [vmem:[%s8575_s5 + $0x1f0] sm:$0xff]   ;;  %v3108_v6 = vld [vmem:[#allocation3 + $0x30] sm:$0xf]  ;;  %v3109_v31 = vld [vmem:[#allocation3 + $0x34] sm:$0xf] }
 0x208   : > { %6008 = vmatpush3.bf16.msra.mxu1 %v6566_v34  ;;  %v8022_v34 = vcombine.low %v3137_v13, %v8012_v24  ;;  %v8057_v32 = vcombine.low %v3108_v6, %v3109_v31  ;;  %v6603_v60 = vld [vmem:[#allocation3 + $0x38] ss:$0 sps:$4 sm:$0x11]   ;;  %v3141_v47 = vld [vmem:[#allocation3 + $0x3c] sm:$0xf]  ;;  %v6615_v5 = vld [vmem:[%s8575_s5 + $0x110] sm:$0xff]  }
 0x209   : > { %6072 = vmatpush3.bf16.msra.mxu0 %v6567_v46  ;;  %6009 = vmatprep.subr.bf16.mxu1 %v6568_v36  ;;  %v5437_v46 = vcombine.low %v3126_v14, %v3105_v12  ;;  %v3405_v36 = vrot.slane %v6589_v27, 1  ;;  %v8064_v35 = vld [vmem:[#allocation3 + $0x40] sm:$0xf]  ;;  %v3326_v4 = vshll.u32 %v6603_v60, 16  ;;  %v6616_v14 = vld [vmem:[%s8575_s5 + $0x1e8] sm:$0xff]  }
 0x20a   : > { %6073 = vmatprep.subr.bf16.mxu0 %v6569_v48  ;;  %v6598_v48 = vld [vmem:[%s8575_s5 + $0x160] sm:$0xff]   ;;  %v3319_v42 = vshrl.u32 %v8057_v32, 16  ;;  %v3321_v39 = vshll.u32 %v8057_v32, 16  ;;  %v6614_v12 = vld [vmem:[%s8575_s5 + $0x150] sm:$0xff]   ;;  %v8077_v13 = vcombine.low %v3141_v47, %v8064_v35  ;;  %v6627_v47 = vld [vmem:[%s8575_s5 + $0x198] sm:$0xff]  }
 0x20b   : > { %v3328_v55 = vrot.slane %v3326_v4, 1 }
 0x20c   : > { %6010 = vmatpush3.bf16.msra.mxu1 %v6570_v22  ;;  %v3299_v22 = vrot.slane %v3297_v58, 1  ;;  %v3323_v27 = vrot.slane %v3321_v39, 1  ;;  %v3111_v58 = vld [vmem:[#allocation3 + $0x40] sm:$0xf] }
 0x20d   : > { %6074 = vmatpush3.bf16.msra.mxu0 %v6571_v43  ;;  %6011 = vmatprep.subr.bf16.mxu1 %v6572_v15  ;;  %v3304_v43 = vrot.slane %v3302_v63, 1  ;;  %v3106_v15 = vld [vmem:[#allocation3 + $0x24] sm:$0xf] }
 0x20e   : > { %6075 = vmatprep.subr.bf16.mxu0 %v6573_v49  ;;  %v3404_v49 = vrot.slane %v5437_v46, 1  ;;  %v3300_v45 = vor.u32 %v3299_v22, %v3295_v9  ;;  %v3110_v9 = vld [vmem:[#allocation3 + $0x3c] sm:$0xf]  ;;  %v6611_v46 = vld [vmem:[#allocation3 + $0x44] ss:$0 sps:$4 sm:$0x11]  }
 0x20f   : > { %v3143_v22 = vld [vmem:[#allocation3 + $0x48] sm:$0xf] }
 0x210   : > { %6012 = vmatpush3.bf16.msra.mxu1 %v6574_v53  ;;  %v3107_v53 = vld [vmem:[#allocation3 + $0x28] sm:$0xf]  ;;  %v3305_v11 = vsel %vm689_vm1, %v3300_v45, %v3304_v43  ;;  %v3406_v19 = vsel %vm850_vm0, %v3404_v49, %v3405_v36  ;;  %v6617_v36 = vld [vmem:[%s8575_s5 + $0x1a8] sm:$0xff]   ;;  %v8088_v43 = vld [vmem:[#allocation3 + $0x4c] sm:$0xf] }
 0x211   : > { %6076 = vmatpush3.bf16.msra.mxu0 %v6575_v54  ;;  %6125 = vmatprep.subr.bf16.mxu1 %v6580_v51  ;;  %v6600_v54 = vld [vmem:[%s8575_s5 + $0x1f8] sm:$0xff]   ;;  %v8031_v40 = vcombine.low %v3106_v15, %v3107_v53  ;;  %v8036_v51 = vld [vmem:[#allocation3 + $0x34] sm:$0xf]  ;;  %v5438_v18 = vcombine.low %v3127_v0, %v3107_v53  ;;  %v3129_v15 = vld [vmem:[#allocation3 + $0x3c] sm:$0xe] }
 0x212   : > { %6189 = vmatprep.subr.bf16.mxu0 %v6600_v54  ;;  %v3338_v54 = vshll.u32 %v6611_v46, 16  ;;  %v6618_v45 = vld [vmem:[%s8575_s5 + $0x1e0] sm:$0xff]  }
 0x213   : > { %4503 = vmatmul.mubr.bf16.vlgmr.msra.gmra.mxu1 %v5419_v50  ;;  %v6595_v50 = vld [vmem:[#allocation3 + $0x2c] ss:$0 sps:$4 sm:$0x11]   ;;  %v3307_v56 = vshrl.u32 %v8031_v40, 16  ;;  %v3309_v10 = vshll.u32 %v8031_v40, 16  ;;  %v3407_v8 = vrot.slane %v5438_v18, 1 }
 0x214   : > { %4600 = vmatmul.mubr.bf16.vlgmr.msra.gmra.mxu0 %v3400_v25  ;;  %6126 = vmatpush3.bf16.msra.mxu1 %v6581_v21  ;;  %v3314_v17 = vshll.u32 %v6595_v50, 16  ;;  %v3408_v2 = vrot.slane %v6595_v50, 1  ;;  %v8049_v21 = vcombine.low %v3139_v44, %v8036_v51  ;;  %v6622_v50 = vld [vmem:[%s8575_s5 + $0x1a0] sm:$0xff]   ;;  %v3340_v0 = vrot.slane %v3338_v54, 1  ;;  %v6636_v54 = vld [vmem:[%s8575_s5 + $0x1c8] sm:$0xff]  }
 0x215   : > { %4607 = vmatprep.mubr.bf16.mxu0 %v8001_v52  ;;  %6127 = vmatprep.subr.bf16.mxu1 %v6586_v29  ;;  %v3311_v62 = vrot.slane %v3309_v10, 1  ;;  %v6609_v29 = vld [vmem:[%s8575_s5 + $0x1b0] sm:$0xff]  }
 0x216   : > { %4510 = vmatprep.mubr.bf16.mxu1 %v3293_v20  ;;  %6190 = vmatpush3.bf16.msra.mxu0 %v6601_v61  ;;  %v3316_v41 = vrot.slane %v3314_v17, 1  ;;  %v8082_v20 = vcombine.low %v3110_v9, %v3111_v58  ;;  %v5440_v61 = vcombine.low %v3129_v15, %v3111_v58  ;;  %v8105_v17 = vcombine.low %v3143_v22, %v8088_v43  ;;  %v3147_v9 = vld [vmem:[#allocation3 + $0x60] sm:$0xf]  ;;  %v8138_v58 = vld [vmem:[#allocation3 + $0x64] sm:$0xf]  ;;  %v6635_v22 = vld [vmem:[%s8575_s5 + $0x100] sm:$0xff]  }
 0x217   : > { %v3312_v25 = vor.u32 %v3311_v62, %v3307_v56  ;;  %6191 = vmatprep.subr.bf16.mxu0 %v6608_v28  ;;  %v6625_v62 = vld [vmem:[%s8575_s5 + $0x108] sm:$0xff]   ;;  %v3130_v28 = vld [vmem:[#allocation3 + $0x48] sm:$0xe]  ;;  %v3505_v15 = vshll.u32 %v7987_v26, 16 }
 0x218   : > { %6128 = vmatpush3.bf16.msra.mxu1 %v6587_v30  ;;  %v3128_v30 = vld [vmem:[#allocation3 + $0x30] sm:$0xe]  ;;  %v3331_v49 = vshrl.u32 %v8082_v20, 16  ;;  %v3333_v53 = vshll.u32 %v8082_v20, 16  ;;  %v3413_v18 = vrot.slane %v5440_v61, 1  ;;  %v6637_v61 = vld [vmem:[%s8575_s5 + $0x188] sm:$0xff]  }
 0x219   : > { %6129 = vmatprep.subr.bf16.mxu1 %v6592_v38  ;;  %v3317_v7 = vsel %vm689_vm1, %v3312_v25, %v3316_v41  ;;  %v5439_v38 = vcombine.low %v3128_v30, %v3109_v31 }
 0x21a   : > { %6192 = vmatpush3.bf16.msra.mxu0 %v6609_v29  ;;  %v3335_v44 = vrot.slane %v3333_v53, 1 }
 0x21b   : > { %4511 = vmatmul.mubr.bf16.gmra.mxu1 %v5420_v33  ;;  %v6607_v33 = vld [vmem:[%s8575_s5 + $0x118] sm:$0xff]   ;;  %v3410_v63 = vrot.slane %v5439_v38, 1  ;;  %6193 = vmatprep.subr.bf16.mxu0 %v6616_v14  ;;  %v3115_v38 = vld [vmem:[#allocation3 + $0x58] sm:$0xf]  ;;  %v6632_v14 = vld [vmem:[%s8575_s5 + $0x190] sm:$0xff]  }
 0x21c   : > { %4608 = vmatmul.mubr.bf16.gmra.mxu0 %v3403_v3  ;;  %6130 = vmatpush3.bf16.msra.mxu1 %v6593_v59  ;;  %v3324_v3 = vor.u32 %v3323_v27, %v3319_v42  ;;  %v3411_v59 = vrot.slane %v6603_v60, 1  ;;  %v3336_v10 = vor.u32 %v3335_v44, %v3331_v49  ;;  %v6626_v60 = vld [vmem:[%s8575_s5 + $0x1d8] sm:$0xff]   ;;  %v6628_v42 = vld [vmem:[%s8575_s5 + $0x1d0] sm:$0xff]  }
 0x21d   : > { %4615 = vmatprep.mubr.bf16.mxu0 %v8022_v34  ;;  %4518 = vmatprep.mubr.bf16.mxu1 %v3305_v11  ;;  %v6624_v11 = vld [vmem:[%s8575_s5 + $0x148] sm:$0xff]  }
 0x21e   : > { %6131 = vmatprep.subr.bf16.mxu1 %v6598_v48  ;;  %v3329_v48 = vsel %vm689_vm1, %v3324_v3, %v3328_v55  ;;  %6194 = vmatpush3.bf16.msra.mxu0 %v6617_v36  ;;  %v3412_v56 = vsel %vm850_vm0, %v3410_v63, %v3411_v59  ;;  %v3341_v41 = vsel %vm689_vm1, %v3336_v10, %v3340_v0  ;;  %v3131_v36 = vld [vmem:[#allocation3 + $0x54] sm:$0xe] }
 0x21f   : > { %6195 = vmatprep.subr.bf16.mxu0 %v6618_v45  ;;  %v5442_v44 = vcombine.low %v3131_v36, %v3115_v38 }
 0x220   : > { %6132 = vmatpush3.bf16.msra.mxu1 %v6599_v1  ;;  %v3113_v1 = vld [vmem:[#allocation3 + $0x4c] sm:$0xf] }
 0x221   : > { %6133 = vmatprep.subr.bf16.mxu1 %v6606_v16  ;;  %v5441_v30 = vcombine.low %v3130_v28, %v3113_v1 }
 0x222   : > { %6196 = vmatpush3.bf16.msra.mxu0 %v6622_v50 }
 0x223   : > { %4519 = vmatmul.mubr.bf16.gmra.mxu1 %v8010_v23  ;;  %v3409_v23 = vsel %vm850_vm0, %v3407_v8, %v3408_v2  ;;  %v3414_v2 = vrot.slane %v6611_v46, 1  ;;  %v8113_v8 = vld [vmem:[#allocation3 + $0x58] sm:$0xf]  ;;  %6197 = vmatprep.subr.bf16.mxu0 %v6626_v60  ;;  %v3507_v60 = vrot.slane %v3505_v15, 1  ;;  %v3515_v15 = vshrl.u32 %v8001_v52, 16 }
 0x224   : > { %4616 = vmatmul.mubr.bf16.gmra.mxu0 %v3406_v19  ;;  %4526 = vmatprep.mubr.bf16.mxu1 %v3317_v7  ;;  %v6620_v19 = vld [vmem:[#allocation3 + $0x50] ss:$0 sps:$4 sm:$0x11]  }
 0x225   : > { %4623 = vmatprep.mubr.bf16.mxu0 %v8049_v21  ;;  %6134 = vmatpush3.bf16.msra.mxu1 %v6607_v33  ;;  %v3145_v33 = vld [vmem:[#allocation3 + $0x54] sm:$0xf]  ;;  %v3350_v31 = vshll.u32 %v6620_v19, 16  ;;  %v3415_v39 = vsel %vm850_vm0, %v3413_v18, %v3414_v2  ;;  %v3417_v27 = vrot.slane %v6620_v19, 1  ;;  %v3419_v2 = vrot.slane %v5442_v44, 1  ;;  %v8173_v19 = vld [vmem:[%s8575_s5 + $0x238] sm:$0xff]  }
 0x226   : > { %6135 = vmatprep.subr.bf16.mxu1 %v6614_v12  ;;  %6198 = vmatpush3.bf16.msra.mxu0 %v6627_v47  ;;  %v8130_v12 = vcombine.low %v3145_v33, %v8113_v8  ;;  %v6641_v18 = vld [vmem:[%s8575_s5 + $0x180] sm:$0xff]   ;;  %v8176_v33 = vld [vmem:[#allocation3 + $0x1c] sm:$0xf] }
 0x227   : > { %v3352_v7 = vrot.slane %v3350_v31, 1  ;;  %6199 = vmatprep.subr.bf16.mxu0 %v6628_v42  ;;  %v3503_v31 = vshrl.u32 %v7987_v26, 16 }
 0x229   : > { %6136 = vmatpush3.bf16.msra.mxu1 %v6615_v5  ;;  %v3416_v5 = vrot.slane %v5441_v30, 1  ;;  %v3508_v26 = vor.u32 %v3507_v60, %v3503_v31  ;;  %v6652_v31 = vld [vmem:[%s8575_s5 + $0x228] sm:$0xff]  }
 0x22a   : > { %6137 = vmatprep.subr.bf16.mxu1 %v6624_v11  ;;  %6200 = vmatpush3.bf16.msra.mxu0 %v6632_v14  ;;  %v6638_v11 = vld [vmem:[%s8575_s5 + $0x1c0] sm:$0xff]   ;;  %v8192_v14 = vld [vmem:[#allocation3 + $0x2c] ss:$0 sps:$4 sm:$0x11]  }
 0x22b   : > { %4527 = vmatmul.mubr.bf16.gmra.mxu1 %v8031_v40  ;;  %v3112_v40 = vld [vmem:[#allocation3 + $0x48] sm:$0xf]  ;;  %v3418_v45 = vsel %vm850_vm0, %v3416_v5, %v3417_v27  ;;  %6201 = vmatprep.subr.bf16.mxu0 %v6636_v54 }
 0x22c   : > { %4624 = vmatmul.mubr.bf16.gmra.mxu0 %v3409_v23  ;;  %4534 = vmatprep.mubr.bf16.mxu1 %v3329_v48  ;;  %v8107_v16 = vcombine.low %v3112_v40, %v3113_v1  ;;  %v6630_v23 = vld [vmem:[#allocation3 + $0x5c] ss:$0 sps:$4 sm:$0x11]   ;;  %v6634_v48 = vld [vmem:[%s8575_s5 + $0x140] sm:$0xff]   ;;  %v8187_v27 = vld [vmem:[#allocation3 + $0x28] sm:$0xf] }
 0x22d   : > { %4631 = vmatprep.mubr.bf16.mxu0 %v8077_v13  ;;  %6138 = vmatpush3.bf16.msra.mxu1 %v6625_v62  ;;  %v3362_v46 = vshll.u32 %v6630_v23, 16  ;;  %v3420_v0 = vrot.slane %v6630_v23, 1  ;;  %v6639_v40 = vld [vmem:[#allocation3 + $0x14] ss:$0 sps:$4 sm:$0x11]  }
 0x22e   : > { %v3343_v25 = vshrl.u32 %v8107_v16, 16  ;;  %v3345_v6 = vshll.u32 %v8107_v16, 16  ;;  %6139 = vmatprep.subr.bf16.mxu1 %v6634_v48  ;;  %6202 = vmatpush3.bf16.msra.mxu0 %v6637_v61  ;;  %v3754_v48 = vshll.u32 %v8192_v14, 16 }
 0x22f   : > { %v3364_v53 = vrot.slane %v3362_v46, 1  ;;  %6203 = vmatprep.subr.bf16.mxu0 %v6638_v11  ;;  %v3421_v47 = vsel %vm850_vm0, %v3419_v2, %v3420_v0  ;;  %v8206_v0 = vld [vmem:[#allocation3 + $0x38] ss:$0 sps:$4 sm:$0x11]  }
 0x230   : > { %v3347_v29 = vrot.slane %v3345_v6, 1  ;;  %v3158_v6 = vld [vmem:[#allocation3 + $0x18] sm:$0xe]  ;;  %v3756_v54 = vrot.slane %v3754_v48, 1 }
 0x231   : > { %6140 = vmatpush3.bf16.msra.mxu1 %v6635_v22  ;;  %v5460_v42 = vcombine.low %v3158_v6, %v7994_v57 }
 0x232   : > { %v3348_v4 = vor.u32 %v3347_v29, %v3343_v25  ;;  %6204 = vmatpush3.bf16.msra.mxu0 %v6641_v18  ;;  %6305 = vmatprep.subr.bf16.mxu1 %v8173_v19  ;;  %v8180_v25 = vld [vmem:[#allocation3 + $0x20] ss:$0 sps:$4 sm:$0x11]  }
 0x233   : > { %4535 = vmatmul.mubr.bf16.gmra.mxu1 %v8057_v32  ;;  %v3114_v32 = vld [vmem:[#allocation3 + $0x54] sm:$0xf]  ;;  %v3742_v30 = vshll.u32 %v8180_v25, 16  ;;  %v3633_v57 = vrot.slane %v5460_v42, 1 }
 0x234   : > { %4632 = vmatmul.mubr.bf16.gmra.mxu0 %v3412_v56  ;;  %4542 = vmatprep.mubr.bf16.mxu1 %v3341_v41  ;;  %v8132_v55 = vcombine.low %v3114_v32, %v3115_v38  ;;  %v3353_v3 = vsel %vm689_vm1, %v3348_v4, %v3352_v7  ;;  %v3157_v56 = vld [vmem:[#allocation3 + $0xc] sm:$0xe]  ;;  %v3166_v41 = vld [vmem:[#allocation3 + $0x18] sm:$0xf]  ;;  %v3168_v4 = vld [vmem:[#allocation3 + $0x24] sm:$0xf] }
 0x235   : > { %4639 = vmatprep.mubr.bf16.mxu0 %v8105_v17  ;;  %v5459_v1 = vcombine.low %v3157_v56, %v7984_v37  ;;  %v3631_v37 = vrot.slane %v6639_v40, 1  ;;  %v5467_v28 = vcombine.low %v3166_v41, %v8176_v33  ;;  %v3744_v5 = vrot.slane %v3742_v30, 1 }
 0x236   : > { %v3355_v63 = vshrl.u32 %v8132_v55, 16  ;;  %v3357_v59 = vshll.u32 %v8132_v55, 16  ;;  %v8190_v23 = vcombine.low %v3168_v4, %v8187_v27  ;;  %v8228_v4 = vld [vmem:[#allocation3 + $0x44] ss:$0 sps:$4 sm:$0x11]  }
 0x237   : > { %v3630_v62 = vrot.slane %v5459_v1, 1  ;;  %v3735_v29 = vshrl.u32 %v5467_v28, 16  ;;  %v3737_v7 = vshll.u32 %v5467_v28, 16 }
 0x238   : > { %v3359_v49 = vrot.slane %v3357_v59, 1  ;;  %v3747_v46 = vshrl.u32 %v8190_v23, 16  ;;  %v3749_v36 = vshll.u32 %v8190_v23, 16 }
 0x239   : > { %v3632_v32 = vsel %vm850_vm0, %v3630_v62, %v3631_v37  ;;  %v3739_v38 = vrot.slane %v3737_v7, 1  ;;  %v3766_v62 = vshll.u32 %v8206_v0, 16  ;;  %v3529_v37 = vshll.u32 %v8022_v34, 16  ;;  %v8223_v7 = vld [vmem:[#allocation3 + $0x40] sm:$0xf] }
 0x23a   : > { %v3360_v50 = vor.u32 %v3359_v49, %v3355_v63  ;;  %v3517_v63 = vshll.u32 %v8001_v52, 16  ;;  %v6650_v49 = vld [vmem:[#allocation3 + $0x2c] ss:$0 sps:$4 sm:$0x11]  }
 0x23b   : > { %4543 = vmatmul.mubr.bf16.gmra.mxu1 %v8082_v20  ;;  %v8156_v20 = vcombine.low %v3147_v9, %v8138_v58  ;;  %v3740_v9 = vor.u32 %v3739_v38, %v3735_v29  ;;  %v3160_v29 = vld [vmem:[#allocation3 + $0x30] sm:$0xe]  ;;  %v3531_v38 = vrot.slane %v3529_v37, 1 }
 0x23c   : > { %4640 = vmatmul.mubr.bf16.gmra.mxu0 %v3415_v39  ;;  %4550 = vmatprep.mubr.bf16.mxu1 %v3353_v3  ;;  %v3365_v10 = vsel %vm689_vm1, %v3360_v50, %v3364_v53  ;;  %v6645_v39 = vld [vmem:[#allocation3 + $0x20] ss:$0 sps:$4 sm:$0x11]   ;;  %v3170_v53 = vld [vmem:[#allocation3 + $0x30] sm:$0xf] }
 0x23d   : > { %4647 = vmatprep.mubr.bf16.mxu0 %v8130_v12  ;;  %v3634_v59 = vrot.slane %v6645_v39, 1  ;;  %v3745_v22 = vsel %vm689_vm1, %v3740_v9, %v3744_v5  ;;  %v8201_v50 = vld [vmem:[#allocation3 + $0x34] sm:$0xf]  ;;  %v3522_v44 = vshll.u32 %v6645_v39, 16  ;;  %v3534_v5 = vshll.u32 %v6650_v49, 16 }
 0x23e   : > { %v8204_v61 = vcombine.low %v3170_v53, %v8201_v50 }
 0x23f   : > { %v3635_v56 = vsel %vm850_vm0, %v3633_v57, %v3634_v59  ;;  %v3524_v6 = vrot.slane %v3522_v44, 1  ;;  %v6655_v57 = vld [vmem:[#allocation3 + $0x38] ss:$0 sps:$4 sm:$0x11]   ;;  %v3778_v59 = vshll.u32 %v8228_v4, 16 }
 0x240   : > { %v3759_v18 = vshrl.u32 %v8204_v61, 16  ;;  %v3761_v2 = vshll.u32 %v8204_v61, 16 }
 0x242   : > { %v3763_v60 = vrot.slane %v3761_v2, 1 }
 0x243   : > { %4551 = vmatmul.mubr.bf16.gmra.mxu1 %v8107_v16  ;;  %v3510_v16 = vshll.u32 %v6639_v40, 16  ;;  %v6647_v40 = vld [vmem:[%s8575_s5 + $0x230] sm:$0xff]  }
 0x244   : > { %4648 = vmatmul.mubr.bf16.gmra.mxu0 %v3418_v45  ;;  %4558 = vmatprep.mubr.bf16.mxu1 %v3365_v10  ;;  %v3159_v45 = vld [vmem:[#allocation3 + $0x24] sm:$0xe]  ;;  %v3519_v10 = vrot.slane %v3517_v63, 1  ;;  %v3764_v42 = vor.u32 %v3763_v60, %v3759_v18  ;;  %v5462_v63 = vcombine.low %v3160_v29, %v8036_v51  ;;  %v8247_v51 = vld [vmem:[#allocation3 + $0x50] ss:$0 sps:$4 sm:$0x11]  }
 0x245   : > { %4655 = vmatprep.mubr.bf16.mxu0 %v8156_v20  ;;  %v3512_v3 = vrot.slane %v3510_v16, 1  ;;  %v5461_v1 = vcombine.low %v3159_v45, %v8012_v24  ;;  %v3768_v24 = vrot.slane %v3766_v62, 1  ;;  %v3790_v2 = vshll.u32 %v8247_v51, 16  ;;  %v3176_v62 = vld [vmem:[#allocation3 + $0x54] sm:$0xf]  ;;  %v6667_v29 = vld [vmem:[%s8575_s5 + $0x210] sm:$0xff]  }
 0x246   : > { %v3520_v16 = vor.u32 %v3519_v10, %v3515_v15  ;;  %v3639_v44 = vrot.slane %v5462_v63, 1  ;;  %v3553_v60 = vshll.u32 %v8077_v13, 16 }
 0x247   : > { %v3513_v11 = vsel %vm689_vm1, %v3508_v26, %v3512_v3  ;;  %v3636_v30 = vrot.slane %v5461_v1, 1  ;;  %v3769_v26 = vsel %vm689_vm1, %v3764_v42, %v3768_v24 }
 0x248   : > { %v3525_v9 = vsel %vm689_vm1, %v3520_v16, %v3524_v6  ;;  %v8258_v6 = vld [vmem:[#allocation3 + $0x58] sm:$0xf] }
 0x249   : > { %v8263_v24 = vcombine.low %v3176_v62, %v8258_v6 }
 0x24b   : > { %4559 = vmatmul.mubr.bf16.gmra.mxu1 %v8132_v55  ;;  %v3751_v55 = vrot.slane %v3749_v36, 1  ;;  %v6657_v36 = vld [vmem:[%s8575_s5 + $0x220] sm:$0xff]  }
 0x24c   : > { %4656 = vmatmul.mubr.bf16.gmra.mxu0 %v3421_v47  ;;  %4696 = vmatprep.mubr.bf16.mxu1 %v3632_v32  ;;  %v3172_v47 = vld [vmem:[#allocation3 + $0x3c] sm:$0xf]  ;;  %v3527_v32 = vshrl.u32 %v8022_v34, 16 }
 0x24d   : > { %4793 = vmatprep.mubr.bf16.mxu0 %v3745_v22  ;;  %v3752_v52 = vor.u32 %v3751_v55, %v3747_v46  ;;  %v8226_v39 = vcombine.low %v3172_v47, %v8223_v7  ;;  %v3174_v46 = vld [vmem:[#allocation3 + $0x48] sm:$0xf]  ;;  %v8242_v22 = vld [vmem:[#allocation3 + $0x4c] sm:$0xf]  ;;  %v3780_v55 = vrot.slane %v3778_v59, 1 }
 0x24e   : > { %v8245_v15 = vcombine.low %v3174_v46, %v8242_v22  ;;  %v3532_v45 = vor.u32 %v3531_v38, %v3527_v32  ;;  %v3792_v38 = vrot.slane %v3790_v2, 1  ;;  %v3162_v59 = vld [vmem:[#allocation3 + $0x48] sm:$0xe]  ;;  %v3795_v46 = vshrl.u32 %v8263_v24, 16  ;;  %v3191_v2 = vld [vmem:[#allocation3 + $0x24] sm:$0xe] }
 0x24f   : > { %v3757_v41 = vsel %vm689_vm1, %v3752_v52, %v3756_v54  ;;  %v3773_v3 = vshll.u32 %v8226_v39, 16  ;;  %v6662_v54 = vld [vmem:[%s8575_s5 + $0x218] sm:$0xff]   ;;  %v3161_v52 = vld [vmem:[#allocation3 + $0x3c] sm:$0xe] }
 0x250   : > { %v3785_v10 = vshll.u32 %v8245_v15, 16  ;;  %v3783_v1 = vshrl.u32 %v8245_v15, 16  ;;  %v5463_v16 = vcombine.low %v3161_v52, %v8064_v35  ;;  %v3555_v35 = vrot.slane %v3553_v60, 1 }
 0x251   : > { %v3775_v48 = vrot.slane %v3773_v3, 1  ;;  %v8278_v3 = vld [vmem:[#allocation3 + $0x64] sm:$0xf]  ;;  %v3863_v60 = vrot.slane %v8180_v25, 1 }
 0x252   : > { %v3787_v18 = vrot.slane %v3785_v10, 1  ;;  %v8295_v10 = vld [vmem:[#allocation3 + $0x68] ss:$0 sps:$4 sm:$0x11]  }
 0x253   : > { %4697 = vmatmul.mubr.bf16.vlgmr.msra.gmra.mxu1 %v3513_v11  ;;  %v3640_v11 = vrot.slane %v6655_v57, 1  ;;  %v6670_v25 = vld [vmem:[#allocation3 + $0x5c] ss:$0 sps:$4 sm:$0x11]  }
 0x254   : > { %4794 = vmatmul.mubr.bf16.vlgmr.msra.gmra.mxu0 %v5467_v28  ;;  %v3637_v28 = vrot.slane %v6650_v49, 1  ;;  %6306 = vmatpush3.bf16.msra.mxu1 %v8173_v19  ;;  %v3771_v19 = vshrl.u32 %v8226_v39, 16  ;;  %v3536_v49 = vrot.slane %v3534_v5, 1  ;;  %v3788_v32 = vor.u32 %v3787_v18, %v3783_v1  ;;  %v8272_v5 = vld [vmem:[#allocation3 + $0x5c] ss:$0 sps:$4 sm:$0x11]  }
 0x255   : > { %4801 = vmatprep.mubr.bf16.mxu0 %v3757_v41  ;;  %4704 = vmatprep.mubr.bf16.mxu1 %v3635_v56  ;;  %v6660_v56 = vld [vmem:[#allocation3 + $0x44] ss:$0 sps:$4 sm:$0x11]   ;;  %v3539_v41 = vshrl.u32 %v8049_v21, 16  ;;  %v3641_v47 = vsel %vm850_vm0, %v3639_v44, %v3640_v11  ;;  %v6677_v44 = vld [vmem:[%s8575_s5 + $0x200] sm:$0xff]   ;;  %v3563_v11 = vshrl.u32 %v8105_v17, 16 }
 0x256   : > { %6307 = vmatprep.subr.bf16.mxu1 %v6647_v40  ;;  %v3638_v34 = vsel %vm850_vm0, %v3636_v30, %v3637_v28  ;;  %v3776_v53 = vor.u32 %v3775_v48, %v3771_v19  ;;  %v3537_v28 = vsel %vm689_vm1, %v3532_v45, %v3536_v49  ;;  %v3643_v42 = vrot.slane %v6660_v56, 1  ;;  %v3178_v19 = vld [vmem:[#allocation3 + $0x60] sm:$0xf]  ;;  %v3180_v1 = vld [vmem:[#allocation3 + $0x6c] sm:$0xf] }
 0x257   : > { %v3793_v63 = vsel %vm689_vm1, %v3788_v32, %v3792_v38  ;;  %v8284_v48 = vcombine.low %v3178_v19, %v8278_v3  ;;  %v5464_v45 = vcombine.low %v3162_v59, %v8088_v43  ;;  %v8298_v43 = vld [vmem:[#allocation3 + $0x70] sm:$0xf]  ;;  %v3190_v18 = vld [vmem:[#allocation3 + $0x18] sm:$0xe] }
 0x258   : > { %6308 = vmatpush3.bf16.msra.mxu1 %v6647_v40  ;;  %v3546_v40 = vshll.u32 %v6655_v57, 16  ;;  %v3781_v37 = vsel %vm689_vm1, %v3776_v53, %v3780_v55  ;;  %v3558_v57 = vshll.u32 %v6660_v56, 16  ;;  %v3565_v56 = vshll.u32 %v8105_v17, 16 }
 0x259   : > { %6309 = vmatprep.subr.bf16.mxu1 %v6652_v31  ;;  %v3807_v17 = vshrl.u32 %v8284_v48, 16 }
 0x25a   : > { %v3548_v30 = vrot.slane %v3546_v40, 1  ;;  %v3560_v55 = vrot.slane %v3558_v57, 1  ;;  %v3809_v40 = vshll.u32 %v8284_v48, 16  ;;  %v3567_v32 = vrot.slane %v3565_v56, 1 }
 0x25b   : > { %4705 = vmatmul.mubr.bf16.gmra.mxu1 %v3525_v9  ;;  %v3642_v9 = vrot.slane %v5463_v16, 1  ;;  %v3866_v16 = vrot.slane %v8192_v14, 1  ;;  %v6675_v56 = vld [vmem:[#allocation3 + $0x68] ss:$0 sps:$4 sm:$0x11]  }
 0x25c   : > { %4802 = vmatmul.mubr.bf16.gmra.mxu0 %v8190_v23  ;;  %v3541_v23 = vshll.u32 %v8049_v21, 16  ;;  %4712 = vmatprep.mubr.bf16.mxu1 %v3638_v34  ;;  %v3551_v21 = vshrl.u32 %v8077_v13, 16  ;;  %v6672_v13 = vld [vmem:[%s8575_s5 + $0x208] sm:$0xff]  }
 0x25d   : > { %4809 = vmatprep.mubr.bf16.mxu0 %v3769_v26  ;;  %6310 = vmatpush3.bf16.msra.mxu1 %v6652_v31 }
 0x25e   : > { %6311 = vmatprep.subr.bf16.mxu1 %v6657_v36  ;;  %v3543_v31 = vrot.slane %v3541_v23, 1  ;;  %v3644_v23 = vsel %vm850_vm0, %v3642_v9, %v3643_v42  ;;  %v3556_v53 = vor.u32 %v3555_v35, %v3551_v21  ;;  %v5474_v42 = vcombine.low %v3180_v1, %v8298_v43  ;;  %v8314_v9 = vld [vmem:[#allocation3 + $0x74] ss:$0 sps:$4 sm:$0x11]  }
 0x260   : > { %v3544_v26 = vor.u32 %v3543_v31, %v3539_v41  ;;  %v3561_v62 = vsel %vm689_vm1, %v3556_v53, %v3560_v55  ;;  %v3645_v41 = vrot.slane %v5464_v45, 1  ;;  %v5483_v31 = vcombine.low %v3190_v18, %v8176_v33 }
 0x261   : > { %6312 = vmatpush3.bf16.msra.mxu1 %v6657_v36  ;;  %v3802_v36 = vshll.u32 %v8272_v5, 16  ;;  %v3821_v57 = vshll.u32 %v5474_v42, 16  ;;  %v3826_v53 = vshll.u32 %v8314_v9, 16 }
 0x262   : > { %6313 = vmatprep.subr.bf16.mxu1 %v6662_v54  ;;  %v3549_v49 = vsel %vm689_vm1, %v3544_v26, %v3548_v30  ;;  %v3814_v30 = vshll.u32 %v8295_v10, 16 }
 0x263   : > { %4713 = vmatmul.mubr.bf16.gmra.mxu1 %v3537_v28  ;;  %v3804_v52 = vrot.slane %v3802_v36, 1  ;;  %v3163_v28 = vld [vmem:[#allocation3 + $0x54] sm:$0xe]  ;;  %v3164_v36 = vld [vmem:[#allocation3 + $0x60] sm:$0xe] }
 0x264   : > { %4810 = vmatmul.mubr.bf16.gmra.mxu0 %v8204_v61  ;;  %v3797_v61 = vshll.u32 %v8263_v24, 16  ;;  %4720 = vmatprep.mubr.bf16.mxu1 %v3641_v47  ;;  %v5484_v47 = vcombine.low %v3191_v2, %v8187_v27  ;;  %v5465_v27 = vcombine.low %v3163_v28, %v8113_v8  ;;  %v3816_v19 = vrot.slane %v3814_v30, 1  ;;  %v3193_v30 = vld [vmem:[#allocation3 + $0x3c] sm:$0xe] }
 0x265   : > { %4817 = vmatprep.mubr.bf16.mxu0 %v3781_v37  ;;  %6314 = vmatpush3.bf16.msra.mxu1 %v6662_v54  ;;  %v6665_v54 = vld [vmem:[#allocation3 + $0x50] ss:$0 sps:$4 sm:$0x11]   ;;  %v3589_v2 = vshll.u32 %v8156_v20, 16  ;;  %v3594_v28 = vshll.u32 %v6675_v56, 16 }
 0x266   : > { %6315 = vmatprep.subr.bf16.mxu1 %v6667_v29  ;;  %v3799_v34 = vrot.slane %v3797_v61, 1  ;;  %v3646_v37 = vrot.slane %v6665_v54, 1  ;;  %v3570_v38 = vshll.u32 %v6665_v54, 16  ;;  %v3862_v61 = vrot.slane %v5483_v31, 1 }
 0x267   : > { %v3865_v26 = vrot.slane %v5484_v47, 1  ;;  %v3575_v54 = vshrl.u32 %v8130_v12, 16  ;;  %v3192_v47 = vld [vmem:[#allocation3 + $0x30] sm:$0xe] }
 0x268   : > { %v3647_v33 = vsel %vm850_vm0, %v3645_v41, %v3646_v37  ;;  %v3864_v14 = vsel %vm850_vm0, %v3862_v61, %v3863_v60  ;;  %v3572_v59 = vrot.slane %v3570_v38, 1  ;;  %v3587_v37 = vshrl.u32 %v8156_v20, 16 }
 0x269   : > { %6316 = vmatpush3.bf16.msra.mxu1 %v6667_v29  ;;  %v3811_v29 = vrot.slane %v3809_v40, 1  ;;  %v3867_v35 = vsel %vm850_vm0, %v3865_v26, %v3866_v16  ;;  %v3828_v40 = vrot.slane %v3826_v53, 1  ;;  %v3596_v60 = vrot.slane %v3594_v28, 1 }
 0x26a   : > { %6317 = vmatprep.subr.bf16.mxu1 %v6672_v13 }
 0x26b   : > { %4721 = vmatmul.mubr.bf16.gmra.mxu1 %v3549_v49  ;;  %v3819_v49 = vshrl.u32 %v5474_v42, 16 }
 0x26c   : > { %4818 = vmatmul.mubr.bf16.gmra.mxu0 %v8226_v39  ;;  %v3800_v39 = vor.u32 %v3799_v34, %v3795_v46  ;;  %4728 = vmatprep.mubr.bf16.mxu1 %v3644_v23  ;;  %v3648_v46 = vrot.slane %v5465_v27, 1  ;;  %v3649_v34 = vrot.slane %v6670_v25, 1  ;;  %v3823_v23 = vrot.slane %v3821_v57, 1  ;;  %v3196_v27 = vld [vmem:[#allocation3 + $0x60] sm:$0xe] }
 0x26d   : > { %4825 = vmatprep.mubr.bf16.mxu0 %v3793_v63  ;;  %6318 = vmatpush3.bf16.msra.mxu1 %v6672_v13  ;;  %v3812_v13 = vor.u32 %v3811_v29, %v3807_v17  ;;  %v3568_v63 = vor.u32 %v3567_v32, %v3563_v11  ;;  %v3591_v17 = vrot.slane %v3589_v2, 1  ;;  %v3869_v29 = vrot.slane %v8206_v0, 1  ;;  %v3197_v57 = vld [vmem:[#allocation3 + $0x6c] sm:$0xe] }
 0x26e   : > { %6319 = vmatprep.subr.bf16.mxu1 %v6677_v44  ;;  %v3805_v21 = vsel %vm689_vm1, %v3800_v39, %v3804_v52  ;;  %v3650_v11 = vsel %vm850_vm0, %v3648_v46, %v3649_v34  ;;  %v5466_v39 = vcombine.low %v3164_v36, %v8138_v58  ;;  %v3824_v52 = vor.u32 %v3823_v23, %v3819_v49 }
 0x26f   : > { %v3817_v8 = vsel %vm689_vm1, %v3812_v13, %v3816_v19  ;;  %v3573_v55 = vsel %vm689_vm1, %v3568_v63, %v3572_v59  ;;  %v3592_v31 = vor.u32 %v3591_v17, %v3587_v37  ;;  %v5486_v32 = vcombine.low %v3193_v30, %v8223_v7 }
 0x270   : > { %v3829_v41 = vsel %vm689_vm1, %v3824_v52, %v3828_v40  ;;  %v5489_v13 = vcombine.low %v3196_v27, %v8278_v3  ;;  %v5490_v63 = vcombine.low %v3197_v57, %v8298_v43  ;;  %v3884_v3 = vrot.slane %v8314_v9, 1 }
 0x271   : > { %6320 = vmatpush3.bf16.msra.mxu1 %v6677_v44  ;;  %v3582_v44 = vshll.u32 %v6670_v25, 16  ;;  %v3597_v16 = vsel %vm689_vm1, %v3592_v31, %v3596_v60  ;;  %v3871_v26 = vrot.slane %v5486_v32, 1  ;;  %v3195_v25 = vld [vmem:[#allocation3 + $0x54] sm:$0xe] }
 0x272   : > { %v3880_v19 = vrot.slane %v5489_v13, 1 }
 0x273   : > { %4729 = vmatmul.mubr.bf16.gmra.mxu1 %v3561_v62  ;;  %v3584_v18 = vrot.slane %v3582_v44, 1  ;;  %v3651_v62 = vrot.slane %v5466_v39, 1 }
 0x274   : > { %4826 = vmatmul.mubr.bf16.gmra.mxu0 %v8245_v15  ;;  %4736 = vmatprep.mubr.bf16.mxu1 %v3647_v33  ;;  %v3577_v15 = vshll.u32 %v8130_v12, 16  ;;  %v3652_v12 = vrot.slane %v6675_v56, 1 }
 0x275   : > { %4833 = vmatprep.mubr.bf16.mxu0 %v3805_v21  ;;  %v5485_v21 = vcombine.low %v3192_v47, %v8201_v50  ;;  %v3875_v50 = vrot.slane %v8247_v51, 1 }
 0x276   : > { %v3579_v45 = vrot.slane %v3577_v15, 1  ;;  %v3653_v58 = vsel %vm850_vm0, %v3651_v62, %v3652_v12 }
 0x277   : > { %v3868_v20 = vrot.slane %v5485_v21, 1 }
 0x278   : > { %v3580_v1 = vor.u32 %v3579_v45, %v3575_v54 }
 0x279   : > { %v3870_v38 = vsel %vm850_vm0, %v3868_v20, %v3869_v29 }
 0x27b   : > { %4737 = vmatmul.mubr.bf16.gmra.mxu1 %v3573_v55 }
 0x27c   : > { %4834 = vmatmul.mubr.bf16.gmra.mxu0 %v8263_v24  ;;  %4744 = vmatprep.mubr.bf16.mxu1 %v3650_v11  ;;  %v3585_v24 = vsel %vm689_vm1, %v3580_v1, %v3584_v18 }
 0x27d   : > { %4841 = vmatprep.mubr.bf16.mxu0 %v3817_v8 }
 0x283   : > { %4745 = vmatmul.mubr.bf16.gmra.mxu1 %v3585_v24 }
 0x284   : > { %4842 = vmatmul.mubr.bf16.gmra.mxu0 %v8284_v48  ;;  %4752 = vmatprep.mubr.bf16.mxu1 %v3653_v58  ;;  %v3194_v48 = vld [vmem:[#allocation3 + $0x48] sm:$0xe] }
 0x285   : > { %4849 = vmatprep.mubr.bf16.mxu0 %v3829_v41  ;;  %v5487_v61 = vcombine.low %v3194_v48, %v8242_v22 }
 0x287   : > { %v3874_v33 = vrot.slane %v5487_v61, 1 }
 0x289   : > { %v3876_v7 = vsel %vm850_vm0, %v3874_v33, %v3875_v50 }
 0x28b   : > { %4753 = vmatmul.mubr.bf16.gmra.mxu1 %v3597_v16 }
 0x28c   : > { %4850 = vmatmul.mubr.bf16.gmra.mxu0 %v5474_v42  ;;  %6321 = vmatprep.mubr.bf16.mxu1 %v3864_v14  ;;  %v3872_v42 = vrot.slane %v8228_v4, 1  ;;  %v5488_v14 = vcombine.low %v3195_v25, %v8258_v6  ;;  %v3881_v4 = vrot.slane %v8295_v10, 1  ;;  %v3883_v6 = vrot.slane %v5490_v63, 1 }
 0x28e   : > { %v3873_v0 = vsel %vm850_vm0, %v3871_v26, %v3872_v42  ;;  %v3877_v22 = vrot.slane %v5488_v14, 1  ;;  %v3882_v59 = vsel %vm850_vm0, %v3880_v19, %v3881_v4  ;;  %v3885_v15 = vsel %vm850_vm0, %v3883_v6, %v3884_v3 }
 0x293   : > { %6322 = vmatmul.mubr.bf16.vlgmr.msra.gmra.mxu1 %v3867_v35  ;;  %v3878_v35 = vrot.slane %v8272_v5, 1 }
 0x294   : > { %6325 = vmatprep.mubr.bf16.mxu1 %v3870_v38 }
 0x295   : > { %v3879_v51 = vsel %vm850_vm0, %v3877_v22, %v3878_v35 }
 0x29b   : > { %6326 = vmatmul.mubr.bf16.gmra.mxu1 %v3873_v0 }
 0x29c   : > { %6329 = vmatprep.mubr.bf16.mxu1 %v3876_v7 }
 0x2a3   : > { %6330 = vmatmul.mubr.bf16.gmra.mxu1 %v3879_v51 }
 0x2a4   : > { %6333 = vmatprep.mubr.bf16.mxu1 %v3882_v59 }
 0x2ab   : > { %6334 = vmatmul.mubr.bf16.gmra.mxu1 %v3885_v15 }
 0x2d3   : > { %v6013_v5 = vpop.f32.mrf.mxu1 }
 0x2d4   : > { %v6077_v46 = vpop.f32.mrf.mxu0 }
 0x2d5   : > { %v6014_v10 = vpop.f32.mrf.mxu1 }
 0x2d6   : > { %v6078_v34 = vpop.f32.mrf.mxu0  ;;  %v6015_v49 = vadd.f32 %v6014_v10, %v6013_v5 }
 0x2d7   : > { %v6079_v36 = vadd.f32 %v6078_v34, %v6077_v46  ;;  %v6016_v23 = vpop.f32.mrf.mxu1 }
 0x2d8   : > { %v6080_v8 = vpop.f32.mrf.mxu0 }
 0x2d9   : > { %v8349_v43 = vadd.f32 %v6079_v36, %v6015_v49  ;;  %v6017_v54 = vpop.f32.mrf.mxu1 }
 0x2da   : > { %v6081_v53 = vpop.f32.mrf.mxu0  ;;  %v6018_v44 = vadd.f32 %v6017_v54, %v6016_v23 }
 0x2db   : > { %v6082_v55 = vadd.f32 %v6081_v53, %v6080_v8  ;;  %v6019_v11 = vpop.f32.mrf.mxu1 }
 0x2dc   : > { %v6083_v45 = vpop.f32.mrf.mxu0 }
 0x2dd   : > { %v8351_v56 = vadd.f32 %v6082_v55, %v6018_v44  ;;  %v6020_v52 = vpop.f32.mrf.mxu1 }
 0x2de   : > { %v6084_v9 = vpop.f32.mrf.mxu0  ;;  %v6021_v1 = vadd.f32 %v6020_v52, %v6019_v11 }
 0x2df   : > { %v6085_v39 = vadd.f32 %v6084_v9, %v6083_v45  ;;  %v6022_v18 = vpop.f32.mrf.mxu1 }
 0x2e0   : > { %v6086_v40 = vpop.f32.mrf.mxu0 }
 0x2e1   : > { %v8353_v62 = vadd.f32 %v6085_v39, %v6021_v1  ;;  %v6023_v41 = vpop.f32.mrf.mxu1 }
 0x2e2   : > { %v6087_v2 = vpop.f32.mrf.mxu0  ;;  %v6024_v37 = vadd.f32 %v6023_v41, %v6022_v18 }
 0x2e3   : > { %v6088_v12 = vadd.f32 %v6087_v2, %v6086_v40  ;;  %v6025_v17 = vpop.f32.mrf.mxu1 }
 0x2e4   : > { %v6089_v24 = vpop.f32.mrf.mxu0 }
 0x2e5   : > { %v8355_v58 = vadd.f32 %v6088_v12, %v6024_v37  ;;  %v6026_v60 = vpop.f32.mrf.mxu1 }
 0x2e6   : > { %v6090_v28 = vpop.f32.mrf.mxu0  ;;  %v6027_v16 = vadd.f32 %v6026_v60, %v6025_v17 }
 0x2e7   : > { %v6091_v31 = vadd.f32 %v6090_v28, %v6089_v24  ;;  %v6028_v21 = vpop.f32.mrf.mxu1 }
 0x2e8   : > { %v6092_v47 = vpop.f32.mrf.mxu0 }
 0x2e9   : > { %v8357_v29 = vadd.f32 %v6091_v31, %v6027_v16  ;;  %v6029_v48 = vpop.f32.mrf.mxu1 }
 0x2ea   : > { %v6093_v20 = vpop.f32.mrf.mxu0  ;;  %v6030_v38 = vadd.f32 %v6029_v48, %v6028_v21 }
 0x2eb   : > { %v6094_v30 = vadd.f32 %v6093_v20, %v6092_v47  ;;  %v6031_v61 = vpop.f32.mrf.mxu1 }
 0x2ec   : > { %v6095_v32 = vpop.f32.mrf.mxu0 }
 0x2ed   : > { %v8359_v42 = vadd.f32 %v6094_v30, %v6030_v38  ;;  %v6032_v50 = vpop.f32.mrf.mxu1 }
 0x2ee   : > { %v6096_v26 = vpop.f32.mrf.mxu0  ;;  %v6033_v27 = vadd.f32 %v6032_v50, %v6031_v61 }
 0x2ef   : > { %v6097_v33 = vadd.f32 %v6096_v26, %v6095_v32  ;;  %v6034_v0 = vpop.f32.mrf.mxu1 }
 0x2f0   : > { %v6098_v25 = vpop.f32.mrf.mxu0 }
 0x2f1   : > { %v8361_v7 = vadd.f32 %v6097_v33, %v6033_v27  ;;  %v6035_v22 = vpop.f32.mrf.mxu1 }
 0x2f2   : > { %v6099_v14 = vpop.f32.mrf.mxu0  ;;  %v6036_v19 = vadd.f32 %v6035_v22, %v6034_v0 }
 0x2f3   : > { %v6100_v13 = vadd.f32 %v6099_v14, %v6098_v25  ;;  %v6037_v4 = vpop.f32.mrf.mxu1 }
 0x2f4   : > { %v6101_v35 = vpop.f32.mrf.mxu0 }
 0x2f5   : > { %v8363_v51 = vadd.f32 %v6100_v13, %v6036_v19  ;;  %v6038_v59 = vpop.f32.mrf.mxu1 }
 0x2f6   : > { %v6102_v57 = vpop.f32.mrf.mxu0  ;;  %v6039_v3 = vadd.f32 %v6038_v59, %v6037_v4 }
 0x2f7   : > { %v6103_v63 = vadd.f32 %v6102_v57, %v6101_v35  ;;  %v6040_v15 = vpop.f32.mrf.mxu1 }
 0x2f8   : > { %v6104_v6 = vpop.f32.mrf.mxu0 }
 0x2f9   : > { %v8365_v5 = vadd.f32 %v6103_v63, %v6039_v3  ;;  %v6041_v36 = vpop.f32.mrf.mxu1 }
 0x2fa   : > { %v6105_v46 = vpop.f32.mrf.mxu0  ;;  %v6042_v8 = vadd.f32 %v6041_v36, %v6040_v15 }
 0x2fb   : > { %8624 = vst [vmem:[#allocation10_spill] sm:$0xff] %v8365_v5  ;;  %v6106_v34 = vadd.f32 %v6105_v46, %v6104_v6  ;;  %v6043_v49 = vpop.f32.mrf.mxu1 }
 0x2fc   : > { %v6107_v10 = vpop.f32.mrf.mxu0 }
 0x2fd   : > { %v8367_v53 = vadd.f32 %v6106_v34, %v6042_v8  ;;  %v6044_v54 = vpop.f32.mrf.mxu1 }
 0x2fe   : > { %v6108_v23 = vpop.f32.mrf.mxu0  ;;  %v6045_v44 = vadd.f32 %v6044_v54, %v6043_v49 }
 0x2ff   : > { %8625 = vst [vmem:[#allocation11_spill] sm:$0xff] %v8367_v53  ;;  %v6109_v55 = vadd.f32 %v6108_v23, %v6107_v10  ;;  %v6046_v11 = vpop.f32.mrf.mxu1 }
 0x300   : > { %v6110_v45 = vpop.f32.mrf.mxu0 }
 0x301   : > { %v8369_v39 = vadd.f32 %v6109_v55, %v6045_v44  ;;  %v6047_v40 = vpop.f32.mrf.mxu1 }
 0x302   : > { %v6111_v9 = vpop.f32.mrf.mxu0  ;;  %v6048_v18 = vadd.f32 %v6047_v40, %v6046_v11 }
 0x303   : > { %v6112_v52 = vadd.f32 %v6111_v9, %v6110_v45  ;;  %v6049_v2 = vpop.f32.mrf.mxu1 }
 0x304   : > { %v6113_v1 = vpop.f32.mrf.mxu0 }
 0x305   : > { %v8371_v41 = vadd.f32 %v6112_v52, %v6048_v18  ;;  %v6050_v37 = vpop.f32.mrf.mxu1 }
 0x306   : > { %v6114_v12 = vpop.f32.mrf.mxu0  ;;  %v6051_v28 = vadd.f32 %v6050_v37, %v6049_v2 }
 0x307   : > { %8626 = vst [vmem:[#allocation13_spill] sm:$0xff] %v8371_v41  ;;  %v6115_v24 = vadd.f32 %v6114_v12, %v6113_v1  ;;  %v6052_v31 = vpop.f32.mrf.mxu1 }
 0x308   : > { %v6116_v17 = vpop.f32.mrf.mxu0 }
 0x309   : > { %v8373_v47 = vadd.f32 %v6115_v24, %v6051_v28  ;;  %v6053_v21 = vpop.f32.mrf.mxu1 }
 0x30a   : > { %v6117_v60 = vpop.f32.mrf.mxu0  ;;  %v6054_v30 = vadd.f32 %v6053_v21, %v6052_v31 }
 0x30b   : > { %8627 = vst [vmem:[#allocation14_spill] sm:$0xff] %v8373_v47  ;;  %v6118_v16 = vadd.f32 %v6117_v60, %v6116_v17  ;;  %v6055_v48 = vpop.f32.mrf.mxu1 }
 0x30c   : > { %v6119_v20 = vpop.f32.mrf.mxu0 }
 0x30d   : > { %v8375_v38 = vadd.f32 %v6118_v16, %v6054_v30  ;;  %v6056_v26 = vpop.f32.mrf.mxu1 }
 0x30e   : > { %v6120_v32 = vpop.f32.mrf.mxu0  ;;  %v6057_v50 = vadd.f32 %v6056_v26, %v6055_v48 }
 0x30f   : > { %8628 = vst [vmem:[#allocation4_spill] sm:$0xff] %v8375_v38  ;;  %v6121_v61 = vadd.f32 %v6120_v32, %v6119_v20  ;;  %v6058_v25 = vpop.f32.mrf.mxu1 }
 0x310   : > { %v8377_v33 = vpop.f32.mrf.mxu0 }
 0x311   : > { %v8381_v0 = vadd.f32 %v6121_v61, %v6057_v50  ;;  %v6059_v14 = vpop.f32.mrf.mxu1 }
 0x312   : > { %v8379_v27 = vpop.f32.mrf.mxu0  ;;  %v8385_v22 = vadd.f32 %v6059_v14, %v6058_v25 }
 0x313   : > { %8629 = vst [vmem:[#allocation16_spill] sm:$0xff] %v8381_v0  ;;  %v6141_v35 = vpop.f32.mrf.mxu1 }
 0x314   : > { %v8383_v13 = vpop.f32.mrf.mxu0  ;;  %8630 = vst [vmem:[#allocation17_spill] sm:$0xff] %v8385_v22 }
 0x315   : > { %v6142_v4 = vpop.f32.mrf.mxu1 }
 0x316   : > { %v6206_v19 = vpop.f32.mrf.mxu0  ;;  %v6143_v63 = vadd.f32 %v6142_v4, %v6141_v35 }
 0x317   : > { %v6144_v59 = vpop.f32.mrf.mxu1 }
 0x318   : > { %v8387_v57 = vpop.f32.mrf.mxu0  ;;  %v8392_v3 = vadd.f32 %v6143_v63, %v8349_v43 }
 0x319   : > { %v6145_v15 = vpop.f32.mrf.mxu1 }
 0x31a   : > { %v8389_v6 = vpop.f32.mrf.mxu0 }
 0x31b   : > { %v6147_v34 = vpop.f32.mrf.mxu1 }
 0x31c   : > { %v6211_v46 = vpop.f32.mrf.mxu0 }
 0x31d   : > { %v6148_v10 = vpop.f32.mrf.mxu1 }
 0x31e   : > { %v6212_v36 = vpop.f32.mrf.mxu0  ;;  %v6149_v22 = vadd.f32 %v6148_v10, %v6147_v34 }
 0x31f   : > { %v6150_v49 = vpop.f32.mrf.mxu1 }
 0x320   : > { %v6214_v8 = vpop.f32.mrf.mxu0 }
 0x321   : > { %v6151_v55 = vpop.f32.mrf.mxu1 }
 0x322   : > { %v6215_v23 = vpop.f32.mrf.mxu0  ;;  %v6152_v53 = vadd.f32 %v6151_v55, %v6150_v49 }
 0x323   : > { %v6153_v45 = vpop.f32.mrf.mxu1  ;;  %v6216_v34 = vadd.f32 %v6215_v23, %v6214_v8 }
 0x324   : > { %v6217_v54 = vpop.f32.mrf.mxu0 }
 0x325   : > { %v6154_v11 = vpop.f32.mrf.mxu1 }
 0x326   : > { %v6218_v44 = vpop.f32.mrf.mxu0  ;;  %v6155_v10 = vadd.f32 %v6154_v11, %v6153_v45 }
 0x327   : > { %v6156_v52 = vpop.f32.mrf.mxu1 }
 0x328   : > { %v8394_v9 = vpop.f32.mrf.mxu0 }
 0x329   : > { %v6157_v43 = vpop.f32.mrf.mxu1 }
 0x32a   : > { %v8396_v40 = vpop.f32.mrf.mxu0 }
 0x32b   : > { %v6159_v18 = vpop.f32.mrf.mxu1 }
 0x32c   : > { %v6223_v1 = vpop.f32.mrf.mxu0 }
 0x32d   : > { %v6160_v12 = vpop.f32.mrf.mxu1 }
 0x32e   : > { %v6224_v2 = vpop.f32.mrf.mxu0 }
 0x32f   : > { %v6162_v37 = vpop.f32.mrf.mxu1  ;;  %v6225_v45 = vadd.f32 %v6224_v2, %v6223_v1 }
 0x330   : > { %v8398_v24 = vpop.f32.mrf.mxu0 }
 0x331   : > { %v6163_v28 = vpop.f32.mrf.mxu1 }
 0x332   : > { %v8400_v17 = vpop.f32.mrf.mxu0 }
 0x333   : > { %v8404_v60 = vpop.f32.mrf.mxu1 }
 0x334   : > { %v8402_v31 = vpop.f32.mrf.mxu0 }
 0x335   : > { %v8408_v21 = vpop.f32.mrf.mxu1 }
 0x336   : > { %v8406_v16 = vpop.f32.mrf.mxu0 }
 0x337   : > { %v8412_v30 = vpop.f32.mrf.mxu1 }
 0x338   : > { %v8410_v20 = vpop.f32.mrf.mxu0 }
 0x339   : > { %8631 = vst [vmem:[#allocation5_spill] sm:$0xff] %v8410_v20  ;;  %v8416_v32 = vpop.f32.mrf.mxu1 }
 0x33a   : > { %v8414_v48 = vpop.f32.mrf.mxu0 }
 0x33b   : > { %8632 = vst [vmem:[#allocation6_spill] sm:$0xff] %v8414_v48  ;;  %v6171_v26 = vpop.f32.mrf.mxu1 }
 0x33c   : > { %v8418_v61 = vpop.f32.mrf.mxu0 }
 0x33d   : > { %v6172_v50 = vpop.f32.mrf.mxu1 }
 0x33e   : > { %v8420_v25 = vpop.f32.mrf.mxu0 }
 0x33f   : > { %v8422_v14 = vpop.f32.mrf.mxu1 }
 0x340   : > { %v8426_v4 = vpop.f32.mrf.mxu0 }
 0x341   : > { %v8424_v35 = vpop.f32.mrf.mxu1  ;;  %8634 = vst [vmem:[#allocation19_spill] sm:$0xff] %v8426_v4  ;;  %v4707_v4 = vadd.f32 %v6149_v22, %v8353_v62  ;;  %v8458_v22 = vld [vmem:[%s8576_s6] ss:$0 sm:$0xff] }
 0x342   : > { %8633 = vst [vmem:[#allocation18_spill] sm:$0xff] %v8424_v35  ;;  %v8432_v47 = vpop.f32.mrf.mxu0  ;;  %v6213_v35 = vadd.f32 %v6212_v36, %v6211_v46  ;;  %v6164_v46 = vadd.f32 %v6163_v28, %v6162_v37 }
 0x343   : > { %v8428_v63 = vpop.f32.mrf.mxu1  ;;  %8637 = vst [vmem:[#allocation7_spill] sm:$0xff] %v8432_v47  ;;  %v6207_v47 = vadd.f32 %v6206_v19, %v8383_v13 }
 0x344   : > { %8635 = vst [vmem:[#allocation20_spill] sm:$0xff] %v8428_v63  ;;  %v8438_v48 = vpop.f32.mrf.mxu0  ;;  %v4804_v55 = vadd.f32 %v6213_v35, %v4707_v4 }
 0x345   : > { %v8430_v38 = vpop.f32.mrf.mxu1  ;;  %8640 = vst [vmem:[#allocation12_spill] sm:$0xff] %v8438_v48  ;;  %v4796_v19 = vadd.f32 %v6207_v47, %v8392_v3 }
 0x346   : > { %8636 = vst [vmem:[#allocation21_spill] sm:$0xff] %v8430_v38  ;;  %v8445_v63 = vpop.f32.mrf.mxu0 }
 0x347   : > { %v8434_v0 = vpop.f32.mrf.mxu1 }
 0x348   : > { %8638 = vst [vmem:[#allocation8_spill] sm:$0xff] %v8434_v0  ;;  %v6146_v0 = vadd.f32 %v6145_v15, %v6144_v59  ;;  %v8453_v49 = vpop.f32.mrf.mxu0  ;;  %v4715_v59 = vadd.f32 %v6155_v10, %v8357_v29  ;;  %v6219_v15 = vadd.f32 %v6218_v44, %v6217_v54  ;;  %v8475_v29 = vld [vmem:[%s8577_s7] ss:$0 sm:$0xff]  ;;  %v4726_v54 = vadd.f32 %v6164_v46, %v8363_v51  ;;  %v8644_v10 = vld [vmem:[#allocation10_spill] sm:$0xff]  ;;  %v8648_v46 = vld [vmem:[#allocation17_spill] sm:$0xff] }
 0x349   : > { %v8436_v41 = vpop.f32.mrf.mxu1  ;;  %v6170_v51 = vadd.f32 %v8416_v32, %v8412_v30 }
 0x34a   : > { %8639 = vst [vmem:[#allocation9_spill] sm:$0xff] %v8436_v41  ;;  %v4710_v41 = vadd.f32 %v6152_v53, %v8355_v58  ;;  %v4702_v13 = vadd.f32 %v6146_v0, %v8351_v56  ;;  %v6210_v58 = vadd.f32 %v8389_v6, %v8387_v57  ;;  %v8466_v11 = vpop.f32.mrf.mxu0  ;;  %v6222_v57 = vadd.f32 %v8396_v40, %v8394_v9 }
 0x34b   : > { %v8440_v20 = vpop.f32.mrf.mxu1  ;;  %v4812_v9 = vadd.f32 %v6219_v15, %v4715_v59 }
 0x34c   : > { %8641 = vst [vmem:[#allocation15_spill] sm:$0xff] %v8440_v20  ;;  %v6161_v20 = vadd.f32 %v6160_v12, %v6159_v18  ;;  %v4807_v8 = vadd.f32 %v6216_v34, %v4710_v41  ;;  %v4799_v3 = vadd.f32 %v6210_v58, %v4702_v13  ;;  %v6247_v40 = vpop.f32.mrf.mxu0  ;;  %v8647_v58 = vld [vmem:[#allocation6_spill] sm:$0xff] }
 0x34d   : > { %v8442_v5 = vpop.f32.mrf.mxu1 }
 0x34e   : > { %8642 = vst [vmem:[#allocation22_spill] sm:$0xff] %v8442_v5  ;;  %v6158_v5 = vadd.f32 %v6157_v43, %v6156_v52  ;;  %v4723_v23 = vadd.f32 %v6161_v20, %v8361_v7  ;;  %v6124_v7 = vadd.f32 %v8379_v27, %v8377_v33  ;;  %v6167_v33 = vadd.f32 %v8408_v21, %v8404_v60  ;;  %v8643_v21 = vld [vmem:[#allocation18_spill] sm:$0xff]  ;;  %v6248_v30 = vpop.f32.mrf.mxu0 }
 0x34f   : > { %v8447_v38 = vpop.f32.mrf.mxu1  ;;  %v6231_v27 = vadd.f32 %v8406_v16, %v8402_v31  ;;  %v6237_v60 = vadd.f32 %v8420_v25, %v8418_v61  ;;  %v6176_v31 = vadd.f32 %v8643_v21, %v8422_v14 }
 0x350   : > { %v4718_v0 = vadd.f32 %v6158_v5, %v8359_v42  ;;  %v6228_v42 = vadd.f32 %v8400_v17, %v8398_v24  ;;  %v6173_v5 = vadd.f32 %v6172_v50, %v6171_v26  ;;  %v4820_v2 = vadd.f32 %v6225_v45, %v4723_v23  ;;  %v8650_v45 = vld [vmem:[#allocation19_spill] sm:$0xff] }
 0x351   : > { %v8451_v48 = vpop.f32.mrf.mxu1 }
 0x352   : > { %v4815_v24 = vadd.f32 %v6222_v57, %v4718_v0  ;;  %v4739_v26 = vadd.f32 %v6173_v5, %v8369_v39  ;;  %v4823_v50 = vadd.f32 %v6228_v42, %v4726_v54  ;;  %v8646_v39 = vld [vmem:[#allocation5_spill] sm:$0xff] }
 0x353   : > { %v6323_v62 = vpop.f32.mrf.mxu1 }
 0x354   : > { %v4901_v53 = vadd.f32 %v6323_v62, %v4804_v55  ;;  %v4731_v55 = vadd.f32 %v6167_v33, %v8644_v10  ;;  %v8645_v62 = vld [vmem:[#allocation11_spill] sm:$0xff]  ;;  %v4836_v5 = vadd.f32 %v6237_v60, %v4739_v26  ;;  %v8656_v60 = vld [vmem:[#allocation16_spill] sm:$0xff]  ;;  %v8660_v10 = vld [vmem:[#allocation9_spill] sm:$0xff] }
 0x355   : > { %v4892_v36 = vpop.f32.mrf.mxu1  ;;  %v4734_v13 = vadd.f32 %v6170_v51, %v8645_v62 }
 0x356   : > { %v4964_v52 = vmul.f32 %v8458_v22, %v4901_v53  ;;  %v4893_v56 = vadd.f32 %v4892_v36, %v4796_v19  ;;  %v6234_v53 = vadd.f32 %v8647_v58, %v8646_v39  ;;  %v4661_v36 = vadd.f32 %v6124_v7, %v8648_v46 }
 0x357   : > { %v6324_v47 = vpop.f32.mrf.mxu1  ;;  %v6246_v46 = vadd.f32 %v8466_v11, %v8453_v49 }
 0x358   : > { %v4962_v41 = vmul.f32 %v8458_v22, %v4893_v56  ;;  %v4904_v6 = vadd.f32 %v6324_v47, %v4807_v8  ;;  %v4987_v43 = vadd.f32 %v8475_v29, %v4964_v52  ;;  %v8649_v8 = vld [vmem:[#allocation13_spill] sm:$0xff]  ;;  %v8651_v52 = vld [vmem:[#allocation7_spill] sm:$0xff] }
 0x359   : > { %v4895_v44 = vpop.f32.mrf.mxu1  ;;  %v4742_v23 = vadd.f32 %v6176_v31, %v8649_v8  ;;  %v6240_v56 = vadd.f32 %v8651_v52, %v8650_v45  ;;  %v8652_v47 = vld [vmem:[#allocation15_spill] sm:$0xff]  ;;  %v8661_v45 = vld [vmem:[#allocation4_spill] sm:$0xff] }
 0x35a   : > { %v4965_v1 = vmul.f32 %v8458_v22, %v4904_v6  ;;  %v4896_v18 = vadd.f32 %v4895_v44, %v4799_v3  ;;  %v4985_v37 = vadd.f32 %v8475_v29, %v4962_v41  ;;  %v5003_v32 = vmax.f32 %v4987_v43, 0.0  ;;  %v8653_v41 = vld [vmem:[#allocation22_spill] sm:$0xff]  ;;  %v6250_v3 = vpop.f32.mrf.mxu0  ;;  %v8654_v44 = vld [vmem:[#allocation20_spill] sm:$0xff] }
 0x35b   : > { %v6327_v12 = vpop.f32.mrf.mxu1  ;;  %v6185_v6 = vadd.f32 %v8653_v41, %v8652_v47  ;;  %v4839_v26 = vadd.f32 %v6240_v56, %v4742_v23 }
 0x35c   : > { %v4988_v17 = vadd.f32 %v8475_v29, %v4965_v1  ;;  %v4963_v28 = vmul.f32 %v8458_v22, %v4896_v18  ;;  %v4917_v20 = vadd.f32 %v6327_v12, %v4820_v2  ;;  %v5001_v14 = vmax.f32 %v4985_v37, 0.0  ;;  %v6251_v31 = vpop.f32.mrf.mxu0 }
 0x35d   : > { %v4908_v16 = vpop.f32.mrf.mxu1  ;;  %v4828_v2 = vadd.f32 %v6231_v27, %v4731_v55  ;;  %v4831_v37 = vadd.f32 %v6234_v53, %v4734_v13  ;;  %v4755_v21 = vadd.f32 %v6185_v6, %v8656_v60  ;;  %v6252_v53 = vadd.f32 %v6251_v31, %v6250_v3 }
 0x35e   : > { %v5004_v35 = vmax.f32 %v4988_v17, 0.0  ;;  %v4986_v4 = vadd.f32 %v8475_v29, %v4963_v28  ;;  %v4909_v34 = vadd.f32 %v4908_v16, %v4812_v9  ;;  %v4968_v61 = vmul.f32 %v8458_v22, %v4917_v20  ;;  %v8655_v9 = vld [vmem:[#allocation21_spill] sm:$0xff] }
 0x35f   : > { %v6328_v25 = vpop.f32.mrf.mxu1  ;;  %v6179_v43 = vadd.f32 %v8655_v9, %v8654_v44  ;;  %v6249_v17 = vadd.f32 %v6248_v30, %v6247_v40 }
 0x360   : > { %v5634_v19 = vpack.c.bf16 %v5004_v35, %v5003_v32  ;;  %v5002_v59 = vmax.f32 %v4986_v4, 0.0  ;;  %v4966_v15 = vmul.f32 %v8458_v22, %v4909_v34  ;;  %v4920_v0 = vadd.f32 %v6328_v25, %v4823_v50  ;;  %v8657_v32 = vld [vmem:[#allocation14_spill] sm:$0xff]  ;;  %v8658_v4 = vld [vmem:[#allocation12_spill] sm:$0xff] }
 0x361   : > { %v4911_v57 = vpop.f32.mrf.mxu1  ;;  %v4991_v7 = vadd.f32 %v8475_v29, %v4968_v61  ;;  %v4747_v35 = vadd.f32 %v6179_v43, %v8657_v32  ;;  %v6243_v40 = vadd.f32 %v8445_v63, %v8658_v4 }
 0x362   : > { %5668 = vst [vmem:[%s6879_s14 + $0x8] sm:$0xff] %v5634_v19   ;;  %v5629_v54 = vpack.c.bf16 %v5002_v59, %v5001_v14  ;;  %v4912_v42 = vadd.f32 %v4911_v57, %v4815_v24  ;;  %v4969_v1 = vmul.f32 %v8458_v22, %v4920_v0  ;;  %v4989_v33 = vadd.f32 %v8475_v29, %v4966_v15 }
 0x363   : > { %v6331_v18 = vpop.f32.mrf.mxu1  ;;  %v6188_v24 = vadd.f32 %v8451_v48, %v8447_v38  ;;  %v5007_v30 = vmax.f32 %v4991_v7, 0.0  ;;  %v8659_v48 = vld [vmem:[#allocation8_spill] sm:$0xff]  ;;  %v4852_v15 = vadd.f32 %v6249_v17, %v4755_v21  ;;  %v4844_v0 = vadd.f32 %v6243_v40, %v4747_v35 }
 0x364   : > { %5630 = vst [vmem:[%s6879_s14] sm:$0xff] %v5629_v54   ;;  %v4967_v51 = vmul.f32 %v8458_v22, %v4912_v42  ;;  %v4933_v12 = vadd.f32 %v6331_v18, %v4836_v5  ;;  %v4992_v28 = vadd.f32 %v8475_v29, %v4969_v1  ;;  %v6182_v55 = vadd.f32 %v8660_v10, %v8659_v48 }
 0x365   : > { %v4924_v20 = vpop.f32.mrf.mxu1  ;;  %v5005_v62 = vmax.f32 %v4989_v33, 0.0  ;;  %v4758_v58 = vadd.f32 %v6188_v24, %v4661_v36 }
 0x366   : > { %v4990_v27 = vadd.f32 %v8475_v29, %v4967_v51  ;;  %v4972_v16 = vmul.f32 %v8458_v22, %v4933_v12  ;;  %v4925_v50 = vadd.f32 %v4924_v20, %v4828_v2  ;;  %v5008_v34 = vmax.f32 %v4992_v28, 0.0 }
 0x367   : > { %v6332_v38 = vpop.f32.mrf.mxu1  ;;  %v4750_v52 = vadd.f32 %v6182_v55, %v8661_v45  ;;  %v4855_v6 = vadd.f32 %v6252_v53, %v4758_v58 }
 0x368   : > { %v5006_v13 = vmax.f32 %v4990_v27, 0.0  ;;  %v4936_v39 = vadd.f32 %v6332_v38, %v4839_v26  ;;  %v5644_v61 = vpack.c.bf16 %v5008_v34, %v5007_v30  ;;  %v4970_v25 = vmul.f32 %v8458_v22, %v4925_v50 }
 0x369   : > { %v4927_v14 = vpop.f32.mrf.mxu1  ;;  %v4995_v63 = vadd.f32 %v8475_v29, %v4972_v16  ;;  %v4847_v7 = vadd.f32 %v6246_v46, %v4750_v52 }
 0x36a   : > { %v5639_v19 = vpack.c.bf16 %v5006_v13, %v5005_v62  ;;  %v4973_v59 = vmul.f32 %v8458_v22, %v4936_v39  ;;  %5670 = vst [vmem:[%s6879_s14 + $0x18] sm:$0xff] %v5644_v61   ;;  %v4928_v8 = vadd.f32 %v4927_v14, %v4831_v37  ;;  %v4993_v57 = vadd.f32 %v8475_v29, %v4970_v25 }
 0x36b   : > { %v6335_v23 = vpop.f32.mrf.mxu1  ;;  %v5011_v3 = vmax.f32 %v4995_v63, 0.0 }
 0x36c   : > { %5669 = vst [vmem:[%s6879_s14 + $0x10] sm:$0xff] %v5639_v19   ;;  %v4996_v36 = vadd.f32 %v8475_v29, %v4973_v59  ;;  %v4949_v56 = vadd.f32 %v6335_v23, %v4852_v15  ;;  %v4971_v47 = vmul.f32 %v8458_v22, %v4928_v8  ;;  %v5009_v1 = vmax.f32 %v4993_v57, 0.0 }
 0x36d   : > { %v4940_v41 = vpop.f32.mrf.mxu1 }
 0x36e   : > { %v5012_v54 = vmax.f32 %v4996_v36, 0.0  ;;  %v4976_v49 = vmul.f32 %v8458_v22, %v4949_v56  ;;  %v4941_v11 = vadd.f32 %v4940_v41, %v4844_v0  ;;  %v4994_v42 = vadd.f32 %v8475_v29, %v4971_v47 }
 0x36f   : > { %v6336_v5 = vpop.f32.mrf.mxu1 }
 0x370   : > { %v5654_v44 = vpack.c.bf16 %v5012_v54, %v5011_v3  ;;  %v4974_v9 = vmul.f32 %v8458_v22, %v4941_v11  ;;  %v4952_v43 = vadd.f32 %v6336_v5, %v4855_v6  ;;  %v5010_v18 = vmax.f32 %v4994_v42, 0.0 }
 0x371   : > { %v4943_v2 = vpop.f32.mrf.mxu1  ;;  %v4999_v33 = vadd.f32 %v8475_v29, %v4976_v49 }
 0x372   : > { %5672 = vst [vmem:[%s6879_s14 + $0x28] sm:$0xff] %v5654_v44   ;;  %v4977_v51 = vmul.f32 %v8458_v22, %v4952_v43  ;;  %v4944_v12 = vadd.f32 %v4943_v2, %v4847_v7  ;;  %v5649_v37 = vpack.c.bf16 %v5010_v18, %v5009_v1  ;;  %v4997_v17 = vadd.f32 %v8475_v29, %v4974_v9 }
 0x373   : > { %v5015_v20 = vmax.f32 %v4999_v33, 0.0 }
 0x374   : > { %v5000_v24 = vadd.f32 %v8475_v29, %v4977_v51  ;;  %v4975_v28 = vmul.f32 %v8458_v22, %v4944_v12  ;;  %5671 = vst [vmem:[%s6879_s14 + $0x20] sm:$0xff] %v5649_v37   ;;  %v5013_v21 = vmax.f32 %v4997_v17, 0.0 }
 0x376   : > { %v5016_v26 = vmax.f32 %v5000_v24, 0.0  ;;  %v4998_v60 = vadd.f32 %v8475_v29, %v4975_v28 }
 0x378   : > { %v5664_v31 = vpack.c.bf16 %v5016_v26, %v5015_v20  ;;  %v5014_v27 = vmax.f32 %v4998_v60, 0.0 }
 0x37a   : > { %5674 = vst [vmem:[%s6879_s14 + $0x38] sm:$0xff] %v5664_v31   ;;  %v5659_v16 = vpack.c.bf16 %v5014_v27, %v5013_v21 }
 0x37c   : > { %5673 = vst [vmem:[%s6879_s14 + $0x30] sm:$0xff] %v5659_v16  }
 0x37d PF: > { %s18_s9 = sadd.s32 1, %s6726_s9   ;;  %s8662_s27 = smov %s6718_s29 }
 0x37e   : > { %p15_p11 = scmp.ge.s32.totalorder %s18_s9, 6   ;;  %s8663_s28 = smov %s6722_s30 }
 0x37f   : > { %s8664_s29 = smov %s8667_s10  ;;  %s8665_s30 = smov %s8671_s11 }
 0x380   :  { %17 = sbr.rel (!%p15_p11) target bundleno = 3 (0x3), region = 99 }

</bundles_post_ra>
